<compile_context>
chip_gen: v7x
topology: tpu7x:2x2x1
jax: 0.10.0
libtpu: 0.0.40
codegen_flags: <defaults>
</compile_context>

<pallas_src>
from functools import partial

import jax
import jax.numpy as jnp
from jax.experimental import pallas as pl
from jax.experimental.pallas import tpu as pltpu

EPS = 1e-5  # BatchNorm2d default eps


def _round_up(x, m):
    return (x + m - 1) // m * m


def _pick_tile_h(H, W, target_rows=512):
    """Largest even TH dividing H with TH*W near target_rows (fills MXU M-rows)."""
    th = min(H, max(2, (target_rows // max(W, 1)) & ~1))
    while th > 2 and H % th != 0:
        th -= 2
    return max(th, 2)


def _pool_matrix(TH, W, vpu_hpool):
    """Constant AvgPool(2x2) matrix (bf16) for one tile; 0.25 factor folded in."""
    TH2, W2 = TH // 2, W // 2
    r = jnp.arange(TH2 * W2)
    if vpu_hpool:
        # Applied after the VPU H-pair add: columns indexed by (t2, w).
        c = jnp.arange(TH2 * W)
        hit = ((r[:, None] // W2) == (c[None, :] // W)) & \
              ((r[:, None] % W2) == (c[None, :] % W) // 2)
    else:
        # Does both H and W pooling: columns indexed by (t, w).
        c = jnp.arange(TH * W)
        hit = ((r[:, None] // W2) == (c[None, :] // W) // 2) & \
              ((r[:, None] % W2) == (c[None, :] % W) // 2)
    return jnp.where(hit, 0.25, 0.0).astype(jnp.bfloat16)


def _vmem_limit_bytes(block_bytes, temp_bytes):
    """Shape- and generation-aware VMEM limit (double-buffered blocks + headroom)."""
    try:
        phys = int(getattr(pltpu.get_tpu_info(), "vmem_capacity_bytes", 128 << 20))
    except Exception:
        phys = 128 << 20
    need = 2 * block_bytes + temp_bytes + (8 << 20)
    return int(min(max(need, 32 << 20), int(phys * 0.7)))


def _conv_tile(x_ref, w_ref, W, TH, Cp, fuse_taps):
    """3x3 conv for output rows [h*TH, h*TH + TH) of this batch element.

    Returns a (TH*W, Cp) f32 accumulator; matmul operands are bf16 (MXU path).
    `w_ref` holds the kernel reshaped to (9*Cin_p, Cout_p), tap-major (dy, dx, c).
    """
    h0 = pl.multiple_of(pl.program_id(1) * TH, TH)
    cin_p = x_ref.shape[-1]
    xwin = x_ref[0, pl.ds(h0, TH + 2), :, :]                 # (TH+2, W+2, Cin_p) bf16
    taps = [xwin[dy:dy + TH, dx:dx + W, :].reshape(TH * W, cin_p)
            for dy in range(3) for dx in range(3)]
    if fuse_taps:
        # One MXU matmul with K = 9*Cin_p instead of 9 matmuls of K = Cin_p: the
        # im2col LHS is built in VMEM by a lane-axis concat of the shifted windows.
        lhs = jnp.concatenate(taps, axis=-1)                 # (TH*W, 9*Cin_p)
        return jnp.dot(lhs, w_ref[...], preferred_element_type=jnp.float32)
    # Per-tap accumulate: used when Cin_p already fills the MXU contraction
    # (Cin_p >= 128) or as a compile-safety fallback.
    acc = jnp.zeros((TH * W, Cp), jnp.float32)
    for t, tap in enumerate(taps):
        acc = acc + jnp.dot(tap, w_ref[t * cin_p:(t + 1) * cin_p, :],
                            preferred_element_type=jnp.float32)
    return acc


def _conv_stats_kernel(W, TH, Cp, fuse_taps, x_ref, w_ref, stats_ref):
    """Pass 1: per-channel sum / sum-of-squares of the conv output.

    The output block is revisited across the H-tile axis (index_map (n, h) -> (n, 0)),
    so stats accumulate in VMEM and are written to HBM once per batch element.
    Only rows 0 (sum) and 1 (sum of squares) are consumed downstream.
    """
    acc = _conv_tile(x_ref, w_ref, W, TH, Cp, fuse_taps)
    s1 = jnp.sum(acc, axis=0, keepdims=True)
    s2 = jnp.sum(acc * acc, axis=0, keepdims=True)
    h = pl.program_id(1)

    @pl.when(h == 0)
    def _():
        stats_ref[0:1, :] = s1
        stats_ref[1:2, :] = s2

    @pl.when(h != 0)
    def _():
        stats_ref[0:1, :] += s1
        stats_ref[1:2, :] += s2


def _conv_bn_relu_pool_kernel(W, TH, Cp, fuse_taps, vpu_hpool,
                              x_ref, w_ref, pmat_ref, scale_ref, shift_ref, o_ref):
    """Pass 2: conv (recompute) -> fused BN scale/shift -> ReLU -> AvgPool(2x2)."""
    acc = _conv_tile(x_ref, w_ref, W, TH, Cp, fuse_taps)             # (TH*W, Cp) f32
    y = jnp.maximum(acc * scale_ref[...] + shift_ref[...], 0.0)      # BN + ReLU (VPU)
    if vpu_hpool:
        # H-direction pooling on the VPU via aligned sublane slices (W and 2W are
        # multiples of 8 -> layout-preserving reshapes, no relayout).
        TH2 = TH // 2
        y3 = y.reshape(TH2, 2 * W, Cp)
        y = (y3[:, :W, :] + y3[:, W:, :]).reshape(TH2 * W, Cp)
    # Remaining pooling: one whole-tile bf16 matmul with a constant block-diagonal
    # 0.25-average matrix, then a single unmasked full-block store.
    o_ref[...] = jnp.dot(pmat_ref[...], y.astype(jnp.bfloat16),
                         preferred_element_type=jnp.float32)


def down_block2d(x_nchw, w_hwio, b, gamma, beta, *, eps=EPS, target_rows=512,
                 fuse_taps=None, vpu_hpool=None):
    """DownBlock2d forward. x: (N, Cin, H, W) NCHW -> (N, Cout, H//2, W//2)."""
    # Conv bias is exactly cancelled by the training-mode BatchNorm mean subtraction,
    # so it never enters the kernels (zero numerical change).
    del b
    N, Cin, H, W = x_nchw.shape
    kh, kw, wcin, Cout = w_hwio.shape
    assert (kh, kw) == (3, 3) and wcin == Cin
    assert H % 2 == 0 and W % 2 == 0, "AvgPool2d(2,2) needs even H, W"

    Cin_p = _round_up(Cin, 8)
    Cout_p = _round_up(Cout, 128)
    TH = _pick_tile_h(H, W, target_rows)
    NUM_HT = H // TH
    TH2, H2, W2 = TH // 2, H // 2, W // 2
    K = 9 * Cin_p
    if fuse_taps is None:
        fuse_taps = Cin_p < 128          # fuse unless Cin already fills the MXU K
    if vpu_hpool is None:
        vpu_hpool = (W % 8 == 0)         # aligned-slice H-pool needs W % 8 == 0

    # ---- layout / padding glue (pure data movement, done once in XLA) ----
    x_nhwc = jnp.transpose(x_nchw, (0, 2, 3, 1))
    xp = jnp.pad(x_nhwc, ((0, 0), (1, 1), (1, 1), (0, Cin_p - Cin))
                 ).astype(jnp.bfloat16)                              # (N, H+2, W+2, Cin_p)
    wp = jnp.pad(w_hwio, ((0, 0), (0, 0), (0, Cin_p - Cin), (0, Cout_p - Cout))
                 ).astype(jnp.bfloat16).reshape(K, Cout_p)           # tap-major (dy,dx,c)
    pmat = _pool_matrix(TH, W, vpu_hpool)
    p_rows, p_cols = pmat.shape

    x_spec = pl.BlockSpec((1, H + 2, W + 2, Cin_p), lambda n, h: (n, 0, 0, 0))
    w_spec = pl.BlockSpec((K, Cout_p), lambda n, h: (0, 0))

    # VMEM budget: double-buffered blocks + in-kernel temporaries (im2col LHS, f32
    # conv accumulator, BN/ReLU result, bf16 pool operand).
    block_bytes = ((H + 2) * (W + 2) * Cin_p * 2 + K * Cout_p * 2 +
                   p_rows * p_cols * 2 + 2 * Cout_p * 4 +
                   max(8 * Cout_p * 4, TH2 * W2 * Cout_p * 4))
    temp_bytes = TH * W * (K * 2 + 2 * Cout_p * 4 + Cout_p * 2)
    vlim = _vmem_limit_bytes(block_bytes, temp_bytes)
    cparams_stats = pltpu.CompilerParams(
        dimension_semantics=("parallel", "arbitrary"), vmem_limit_bytes=vlim)
    cparams_main = pltpu.CompilerParams(
        dimension_semantics=("parallel", "parallel"), vmem_limit_bytes=vlim)

    conv_flops = 2 * N * H * W * K * Cout_p
    io_bytes = int(xp.size) * 2 + int(wp.size) * 2

    # ---- pass 1: per-channel sum / sum-of-squares of the conv output ----
    stats = pl.pallas_call(
        partial(_conv_stats_kernel, W, TH, Cout_p, fuse_taps),
        out_shape=jax.ShapeDtypeStruct((N * 8, Cout_p), jnp.float32),
        grid=(N, NUM_HT),
        in_specs=[x_spec, w_spec],
        out_specs=pl.BlockSpec((8, Cout_p), lambda n, h: (n, 0)),
        compiler_params=cparams_stats,
        cost_estimate=pl.CostEstimate(
            flops=conv_flops, transcendentals=0,
            bytes_accessed=io_bytes + N * 8 * Cout_p * 4),
    )(xp, wp)

    # ---- fold BatchNorm into a single scale/shift (tiny, plain JAX) ----
    st = stats.reshape(N, 8, Cout_p)
    cnt = jnp.float32(N * H * W)
    mean = st[:, 0, :].sum(axis=0) / cnt
    # NOTE: E[x^2] - E[x]^2 in f32, clamped at 0.
    # TODO(synk): switch to a centered second pass if conv outputs ever have
    #             |mean| >> std (catastrophic cancellation risk).
    var = jnp.maximum(st[:, 1, :].sum(axis=0) / cnt - mean * mean, 0.0)
    gamma_p = jnp.pad(gamma.astype(jnp.float32), (0, Cout_p - Cout))
    beta_p = jnp.pad(beta.astype(jnp.float32), (0, Cout_p - Cout))
    inv = jax.lax.rsqrt(var + eps)
    scale = (gamma_p * inv).reshape(1, Cout_p)
    shift = (beta_p - gamma_p * inv * mean).reshape(1, Cout_p)

    # ---- pass 2: conv (recompute) -> scale/shift -> ReLU -> AvgPool(2x2) ----
    # TODO(synk): for large Cin/Cout (compute-bound), spill a bf16 conv activation in
    #             pass 1 and make pass 2 a pure scale/ReLU/pool kernel instead of
    #             recomputing the conv; recompute is the right call for small Cin.
    out2d = pl.pallas_call(
        partial(_conv_bn_relu_pool_kernel, W, TH, Cout_p, fuse_taps, vpu_hpool),
        out_shape=jax.ShapeDtypeStruct((N * H2 * W2, Cout_p), jnp.float32),
        grid=(N, NUM_HT),
        in_specs=[
            x_spec,
            w_spec,
            pl.BlockSpec((p_rows, p_cols), lambda n, h: (0, 0)),
            pl.BlockSpec((1, Cout_p), lambda n, h: (0, 0)),
            pl.BlockSpec((1, Cout_p), lambda n, h: (0, 0)),
        ],
        out_specs=pl.BlockSpec((TH2 * W2, Cout_p),
                               lambda n, h: (n * NUM_HT + h, 0)),
        compiler_params=cparams_main,
        cost_estimate=pl.CostEstimate(
            flops=conv_flops + 2 * N * NUM_HT * p_rows * p_cols * Cout_p,
            transcendentals=0,
            bytes_accessed=io_bytes + N * H2 * W2 * Cout_p * 4),
    )(xp, wp, pmat, scale, shift)

    # TODO(synk): for small Cout, a Cout-wide (masked) output or spatial lane-packing
    #             would cut pass-2 HBM writes by Cout_p/Cout; keep the lane-dense 128
    #             layout until benchmarked.
    out = out2d.reshape(N, H2, W2, Cout_p)[..., :Cout]
    return jnp.transpose(out, (0, 3, 1, 2))                          # NHWC -> NCHW


# ------------------------- pure-JAX reference (for checking) -------------------------
def _ref_down_block2d(x_nchw, w_hwio, b, gamma, beta, eps=EPS):
    x = jnp.transpose(x_nchw, (0, 2, 3, 1))
    y = jax.lax.conv_general_dilated(
        x, w_hwio, (1, 1), ((1, 1), (1, 1)),
        dimension_numbers=("NHWC", "HWIO", "NHWC"),
        precision=jax.lax.Precision.HIGHEST,
    ) + b
    mean = y.mean(axis=(0, 1, 2), keepdims=True)
    var = ((y - mean) ** 2).mean(axis=(0, 1, 2), keepdims=True)
    y = (y - mean) * jax.lax.rsqrt(var + eps) * gamma + beta
    y = jnp.maximum(y, 0.0)
    N, H, W, C = y.shape
    y = y.reshape(N, H // 2, 2, W // 2, 2, C).mean(axis=(2, 4))
    return jnp.transpose(y, (0, 3, 1, 2))


if __name__ == "__main__":
    # DownBlock2d(in_features=4, out_features=16), x: (N=2, C=4, H=16, W=16)
    key = jax.random.PRNGKey(0)
    kx, kw, kb, kg, kbe = jax.random.split(key, 5)
    N, Cin, H, W = 2, 4, 16, 16
    Cout = 16

    x = jax.random.normal(kx, (N, Cin, H, W), jnp.float32)
    fan_in = 9 * Cin
    w = jax.random.normal(kw, (3, 3, Cin, Cout), jnp.float32) / jnp.sqrt(fan_in)
    b = 0.1 * jax.random.normal(kb, (Cout,), jnp.float32)
    gamma = 1.0 + 0.1 * jax.random.normal(kg, (Cout,), jnp.float32)
    beta = 0.1 * jax.random.normal(kbe, (Cout,), jnp.float32)

    try:
        out = jax.block_until_ready(down_block2d(x, w, b, gamma, beta))
    except Exception:
        # Compile-safety fallback: per-tap conv accumulate + single combined pooling
        # matmul (no lane-axis concat, no H-pool reshapes) -- same structure as the
        # previously validated kernel, so the script always produces a result.
        out = jax.block_until_ready(
            down_block2d(x, w, b, gamma, beta, fuse_taps=False, vpu_hpool=False))

    ref = jax.block_until_ready(_ref_down_block2d(x, w, b, gamma, beta))
    assert out.shape == (N, Cout, H // 2, W // 2), out.shape
    err = float(jnp.max(jnp.abs(out - ref)))
    assert err < 3e-2, err
    print("KERNEL_OK")
</pallas_src>

<mosaic_0001>
module attributes {stable_mosaic.version = 11 : i64} {
  func.func @_conv_stats_kernel(%arg0: i32, %arg1: i32, %arg2: memref<1x18x18x8xbf16, #tpu.memory_space<vmem>>, %arg3: memref<72x128xbf16, #tpu.memory_space<vmem>>, %arg4: memref<8x128xf32, #tpu.memory_space<vmem>>) attributes {dimension_semantics = [#tpu.dimension_semantics<parallel>, #tpu.dimension_semantics<arbitrary>], iteration_bounds = array<i64: 2, 1>, scalar_prefetch = 0 : i64, scratch_operands = 0 : i64, tpu.core_type = #tpu.core_type<tc>, window_params = [{transform_indices = @transform_0, window_bounds = array<i64: 1, 18, 18, 8>}, {pipeline_mode = #tpu.pipeline_mode<synchronous>, transform_indices = @transform_1, window_bounds = array<i64: 72, 128>}, {transform_indices = @transform_2, window_bounds = array<i64: 8, 128>}]} {
    %c16_i32 = arith.constant 16 : i32
    %0 = arith.muli %arg1, %c16_i32 : i32
    %1 = tpu.assume_multiple %0, 16 : i32
    %c0 = arith.constant 0 : index
    %2 = arith.index_cast %1 : i32 to index
    %c0_0 = arith.constant 0 : index
    %c0_1 = arith.constant 0 : index
    %3 = vector.load %arg2[%c0, %2, %c0_0, %c0_1] : memref<1x18x18x8xbf16, #tpu.memory_space<vmem>>, vector<1x18x18x8xbf16>
    %4 = vector.shape_cast %3 : vector<1x18x18x8xbf16> to vector<18x18x8xbf16>
    %5 = vector.extract_strided_slice %4 {offsets = [0, 0, 0], sizes = [16, 16, 8], strides = [1, 1, 1]} : vector<18x18x8xbf16> to vector<16x16x8xbf16>
    %6 = vector.shape_cast %5 : vector<16x16x8xbf16> to vector<256x8xbf16>
    %7 = vector.extract_strided_slice %4 {offsets = [0, 1, 0], sizes = [16, 16, 8], strides = [1, 1, 1]} : vector<18x18x8xbf16> to vector<16x16x8xbf16>
    %8 = vector.shape_cast %7 : vector<16x16x8xbf16> to vector<256x8xbf16>
    %9 = vector.extract_strided_slice %4 {offsets = [0, 2, 0], sizes = [16, 16, 8], strides = [1, 1, 1]} : vector<18x18x8xbf16> to vector<16x16x8xbf16>
    %10 = vector.shape_cast %9 : vector<16x16x8xbf16> to vector<256x8xbf16>
    %11 = vector.extract_strided_slice %4 {offsets = [1, 0, 0], sizes = [16, 16, 8], strides = [1, 1, 1]} : vector<18x18x8xbf16> to vector<16x16x8xbf16>
    %12 = vector.shape_cast %11 : vector<16x16x8xbf16> to vector<256x8xbf16>
    %13 = vector.extract_strided_slice %4 {offsets = [1, 1, 0], sizes = [16, 16, 8], strides = [1, 1, 1]} : vector<18x18x8xbf16> to vector<16x16x8xbf16>
    %14 = vector.shape_cast %13 : vector<16x16x8xbf16> to vector<256x8xbf16>
    %15 = vector.extract_strided_slice %4 {offsets = [1, 2, 0], sizes = [16, 16, 8], strides = [1, 1, 1]} : vector<18x18x8xbf16> to vector<16x16x8xbf16>
    %16 = vector.shape_cast %15 : vector<16x16x8xbf16> to vector<256x8xbf16>
    %17 = vector.extract_strided_slice %4 {offsets = [2, 0, 0], sizes = [16, 16, 8], strides = [1, 1, 1]} : vector<18x18x8xbf16> to vector<16x16x8xbf16>
    %18 = vector.shape_cast %17 : vector<16x16x8xbf16> to vector<256x8xbf16>
    %19 = vector.extract_strided_slice %4 {offsets = [2, 1, 0], sizes = [16, 16, 8], strides = [1, 1, 1]} : vector<18x18x8xbf16> to vector<16x16x8xbf16>
    %20 = vector.shape_cast %19 : vector<16x16x8xbf16> to vector<256x8xbf16>
    %21 = vector.extract_strided_slice %4 {offsets = [2, 2, 0], sizes = [16, 16, 8], strides = [1, 1, 1]} : vector<18x18x8xbf16> to vector<16x16x8xbf16>
    %22 = vector.shape_cast %21 : vector<16x16x8xbf16> to vector<256x8xbf16>
    %23 = tpu.concatenate %6, %8, %10, %12, %14, %16, %18, %20, %22 in 1 : vector<256x8xbf16>, vector<256x8xbf16>, vector<256x8xbf16>, vector<256x8xbf16>, vector<256x8xbf16>, vector<256x8xbf16>, vector<256x8xbf16>, vector<256x8xbf16>, vector<256x8xbf16> -> vector<256x72xbf16>
    %c0_2 = arith.constant 0 : index
    %c0_3 = arith.constant 0 : index
    %24 = vector.load %arg3[%c0_2, %c0_3] : memref<72x128xbf16, #tpu.memory_space<vmem>>, vector<72x128xbf16>
    %cst = arith.constant dense<0.000000e+00> : vector<256x128xf32>
    %25 = tpu.matmul %23, %24, %cst {dimension_numbers = #tpu.dot_dimension_numbers<[1], [0], [0], [1], [0, 0, 1, 1], [], []>} : vector<256x72xbf16>, vector<72x128xbf16>, vector<256x128xf32> -> vector<256x128xf32>
    %cst_4 = arith.constant dense<0.000000e+00> : vector<128xf32>
    %26 = vector.multi_reduction <add>, %25, %cst_4 [0] : vector<256x128xf32> to vector<128xf32>
    %27 = vector.shape_cast %26 : vector<128xf32> to vector<1x128xf32>
    %28 = arith.mulf %25, %25 : vector<256x128xf32>
    %cst_5 = arith.constant dense<0.000000e+00> : vector<128xf32>
    %29 = vector.multi_reduction <add>, %28, %cst_5 [0] : vector<256x128xf32> to vector<128xf32>
    %30 = vector.shape_cast %29 : vector<128xf32> to vector<1x128xf32>
    %c0_i32 = arith.constant 0 : i32
    %31 = arith.cmpi eq, %arg1, %c0_i32 : i32
    %32 = arith.extui %31 : i1 to i32
    %c0_i32_6 = arith.constant 0 : i32
    %33 = arith.cmpi ne, %32, %c0_i32_6 : i32
    scf.if %33 {
      %c0_9 = arith.constant 0 : index
      %c0_10 = arith.constant 0 : index
      %37 = vector.load %arg4[%c0_9, %c0_10] : memref<8x128xf32, #tpu.memory_space<vmem>>, vector<1x128xf32>
      tpu.vector_store %arg4[%c0_9, %c0_10], %27 {strides = array<i32>} : memref<8x128xf32, #tpu.memory_space<vmem>>, vector<1x128xf32>,
      %c1 = arith.constant 1 : index
      %c0_11 = arith.constant 0 : index
      %38 = vector.load %arg4[%c1, %c0_11] : memref<8x128xf32, #tpu.memory_space<vmem>>, vector<1x128xf32>
      tpu.vector_store %arg4[%c1, %c0_11], %30 {strides = array<i32>} : memref<8x128xf32, #tpu.memory_space<vmem>>, vector<1x128xf32>,
    } else {
    }
    %c0_i32_7 = arith.constant 0 : i32
    %34 = arith.cmpi ne, %arg1, %c0_i32_7 : i32
    %35 = arith.extui %34 : i1 to i32
    %c0_i32_8 = arith.constant 0 : i32
    %36 = arith.cmpi ne, %35, %c0_i32_8 : i32
    scf.if %36 {
      %c0_9 = arith.constant 0 : index
      %c0_10 = arith.constant 0 : index
      %37 = vector.load %arg4[%c0_9, %c0_10] : memref<8x128xf32, #tpu.memory_space<vmem>>, vector<1x128xf32>
      %38 = arith.addf %37, %27 : vector<1x128xf32>
      %c0_11 = arith.constant 0 : index
      %c0_12 = arith.constant 0 : index
      %39 = vector.load %arg4[%c0_11, %c0_12] : memref<8x128xf32, #tpu.memory_space<vmem>>, vector<1x128xf32>
      tpu.vector_store %arg4[%c0_11, %c0_12], %38 {strides = array<i32>} : memref<8x128xf32, #tpu.memory_space<vmem>>, vector<1x128xf32>,
      %c1 = arith.constant 1 : index
      %c0_13 = arith.constant 0 : index
      %40 = vector.load %arg4[%c1, %c0_13] : memref<8x128xf32, #tpu.memory_space<vmem>>, vector<1x128xf32>
      %41 = arith.addf %40, %30 : vector<1x128xf32>
      %c1_14 = arith.constant 1 : index
      %c0_15 = arith.constant 0 : index
      %42 = vector.load %arg4[%c1_14, %c0_15] : memref<8x128xf32, #tpu.memory_space<vmem>>, vector<1x128xf32>
      tpu.vector_store %arg4[%c1_14, %c0_15], %41 {strides = array<i32>} : memref<8x128xf32, #tpu.memory_space<vmem>>, vector<1x128xf32>,
    } else {
    }
    return
  }
  func.func @transform_0(%arg0: i32, %arg1: i32) -> (i32, i32, i32, i32) {
    %c0_i32 = arith.constant 0 : i32
    %c0_i32_0 = arith.constant 0 : i32
    %c0_i32_1 = arith.constant 0 : i32
    %c0_i32_2 = arith.constant 0 : i32
    return %arg0, %c0_i32, %c0_i32_0, %c0_i32_1 : i32, i32, i32, i32
  }
  func.func @transform_1(%arg0: i32, %arg1: i32) -> (i32, i32) {
    %c0_i32 = arith.constant 0 : i32
    %c0_i32_0 = arith.constant 0 : i32
    %c0_i32_1 = arith.constant 0 : i32
    return %c0_i32, %c0_i32_0 : i32, i32
  }
  func.func @transform_2(%arg0: i32, %arg1: i32) -> (i32, i32) {
    %c0_i32 = arith.constant 0 : i32
    %c0_i32_0 = arith.constant 0 : i32
    return %arg0, %c0_i32 : i32, i32
  }
}

module attributes {stable_mosaic.version = 11 : i64} {
  func.func @_conv_stats_kernel(%arg0: i32, %arg1: i32, %arg2: memref<1x18x18x8xbf16, #tpu.memory_space<vmem>>, %arg3: memref<72x128xbf16, #tpu.memory_space<vmem>>, %arg4: memref<8x128xf32, #tpu.memory_space<vmem>>) attributes {dimension_semantics = [#tpu.dimension_semantics<parallel>, #tpu.dimension_semantics<arbitrary>], iteration_bounds = array<i64: 2, 1>, scalar_prefetch = 0 : i64, scratch_operands = 0 : i64, tpu.core_type = #tpu.core_type<tc>, window_params = [{transform_indices = @transform_0, window_bounds = array<i64: 1, 18, 18, 8>}, {pipeline_mode = #tpu.pipeline_mode<synchronous>, transform_indices = @transform_1, window_bounds = array<i64: 72, 128>}, {transform_indices = @transform_2, window_bounds = array<i64: 8, 128>}]} {
    %c16_i32 = arith.constant 16 : i32
    %0 = arith.muli %arg1, %c16_i32 : i32
    %1 = tpu.assume_multiple %0, 16 : i32
    %c0 = arith.constant 0 : index
    %2 = arith.index_cast %1 : i32 to index
    %c0_0 = arith.constant 0 : index
    %c0_1 = arith.constant 0 : index
    %3 = vector.load %arg2[%c0, %2, %c0_0, %c0_1] : memref<1x18x18x8xbf16, #tpu.memory_space<vmem>>, vector<1x18x18x8xbf16>
    %4 = vector.shape_cast %3 : vector<1x18x18x8xbf16> to vector<18x18x8xbf16>
    %5 = vector.extract_strided_slice %4 {offsets = [0, 0, 0], sizes = [16, 16, 8], strides = [1, 1, 1]} : vector<18x18x8xbf16> to vector<16x16x8xbf16>
    %6 = vector.shape_cast %5 : vector<16x16x8xbf16> to vector<256x8xbf16>
    %7 = vector.extract_strided_slice %4 {offsets = [0, 1, 0], sizes = [16, 16, 8], strides = [1, 1, 1]} : vector<18x18x8xbf16> to vector<16x16x8xbf16>
    %8 = vector.shape_cast %7 : vector<16x16x8xbf16> to vector<256x8xbf16>
    %9 = vector.extract_strided_slice %4 {offsets = [0, 2, 0], sizes = [16, 16, 8], strides = [1, 1, 1]} : vector<18x18x8xbf16> to vector<16x16x8xbf16>
    %10 = vector.shape_cast %9 : vector<16x16x8xbf16> to vector<256x8xbf16>
    %11 = vector.extract_strided_slice %4 {offsets = [1, 0, 0], sizes = [16, 16, 8], strides = [1, 1, 1]} : vector<18x18x8xbf16> to vector<16x16x8xbf16>
    %12 = vector.shape_cast %11 : vector<16x16x8xbf16> to vector<256x8xbf16>
    %13 = vector.extract_strided_slice %4 {offsets = [1, 1, 0], sizes = [16, 16, 8], strides = [1, 1, 1]} : vector<18x18x8xbf16> to vector<16x16x8xbf16>
    %14 = vector.shape_cast %13 : vector<16x16x8xbf16> to vector<256x8xbf16>
    %15 = vector.extract_strided_slice %4 {offsets = [1, 2, 0], sizes = [16, 16, 8], strides = [1, 1, 1]} : vector<18x18x8xbf16> to vector<16x16x8xbf16>
    %16 = vector.shape_cast %15 : vector<16x16x8xbf16> to vector<256x8xbf16>
    %17 = vector.extract_strided_slice %4 {offsets = [2, 0, 0], sizes = [16, 16, 8], strides = [1, 1, 1]} : vector<18x18x8xbf16> to vector<16x16x8xbf16>
    %18 = vector.shape_cast %17 : vector<16x16x8xbf16> to vector<256x8xbf16>
    %19 = vector.extract_strided_slice %4 {offsets = [2, 1, 0], sizes = [16, 16, 8], strides = [1, 1, 1]} : vector<18x18x8xbf16> to vector<16x16x8xbf16>
    %20 = vector.shape_cast %19 : vector<16x16x8xbf16> to vector<256x8xbf16>
    %21 = vector.extract_strided_slice %4 {offsets = [2, 2, 0], sizes = [16, 16, 8], strides = [1, 1, 1]} : vector<18x18x8xbf16> to vector<16x16x8xbf16>
    %22 = vector.shape_cast %21 : vector<16x16x8xbf16> to vector<256x8xbf16>
    %cst = arith.constant 0.000000e+00 : f32
    %23 = vector.broadcast %cst : f32 to vector<256x128xf32>
    %c0_2 = arith.constant 0 : index
    %c0_3 = arith.constant 0 : index
    %24 = vector.load %arg3[%c0_2, %c0_3] : memref<72x128xbf16, #tpu.memory_space<vmem>>, vector<8x128xbf16>
    %cst_4 = arith.constant dense<0.000000e+00> : vector<256x128xf32>
    %25 = tpu.matmul %6, %24, %cst_4 {dimension_numbers = #tpu.dot_dimension_numbers<[1], [0], [0], [1], [0, 0, 1, 1], [], []>} : vector<256x8xbf16>, vector<8x128xbf16>, vector<256x128xf32> -> vector<256x128xf32>
    %26 = arith.addf %23, %25 : vector<256x128xf32>
    %c8 = arith.constant 8 : index
    %c0_5 = arith.constant 0 : index
    %27 = vector.load %arg3[%c8, %c0_5] : memref<72x128xbf16, #tpu.memory_space<vmem>>, vector<8x128xbf16>
    %cst_6 = arith.constant dense<0.000000e+00> : vector<256x128xf32>
    %28 = tpu.matmul %8, %27, %cst_6 {dimension_numbers = #tpu.dot_dimension_numbers<[1], [0], [0], [1], [0, 0, 1, 1], [], []>} : vector<256x8xbf16>, vector<8x128xbf16>, vector<256x128xf32> -> vector<256x128xf32>
    %29 = arith.addf %26, %28 : vector<256x128xf32>
    %c16 = arith.constant 16 : index
    %c0_7 = arith.constant 0 : index
    %30 = vector.load %arg3[%c16, %c0_7] : memref<72x128xbf16, #tpu.memory_space<vmem>>, vector<8x128xbf16>
    %cst_8 = arith.constant dense<0.000000e+00> : vector<256x128xf32>
    %31 = tpu.matmul %10, %30, %cst_8 {dimension_numbers = #tpu.dot_dimension_numbers<[1], [0], [0], [1], [0, 0, 1, 1], [], []>} : vector<256x8xbf16>, vector<8x128xbf16>, vector<256x128xf32> -> vector<256x128xf32>
    %32 = arith.addf %29, %31 : vector<256x128xf32>
    %c24 = arith.constant 24 : index
    %c0_9 = arith.constant 0 : index
    %33 = vector.load %arg3[%c24, %c0_9] : memref<72x128xbf16, #tpu.memory_space<vmem>>, vector<8x128xbf16>
    %cst_10 = arith.constant dense<0.000000e+00> : vector<256x128xf32>
    %34 = tpu.matmul %12, %33, %cst_10 {dimension_numbers = #tpu.dot_dimension_numbers<[1], [0], [0], [1], [0, 0, 1, 1], [], []>} : vector<256x8xbf16>, vector<8x128xbf16>, vector<256x128xf32> -> vector<256x128xf32>
    %35 = arith.addf %32, %34 : vector<256x128xf32>
    %c32 = arith.constant 32 : index
    %c0_11 = arith.constant 0 : index
    %36 = vector.load %arg3[%c32, %c0_11] : memref<72x128xbf16, #tpu.memory_space<vmem>>, vector<8x128xbf16>
    %cst_12 = arith.constant dense<0.000000e+00> : vector<256x128xf32>
    %37 = tpu.matmul %14, %36, %cst_12 {dimension_numbers = #tpu.dot_dimension_numbers<[1], [0], [0], [1], [0, 0, 1, 1], [], []>} : vector<256x8xbf16>, vector<8x128xbf16>, vector<256x128xf32> -> vector<256x128xf32>
    %38 = arith.addf %35, %37 : vector<256x128xf32>
    %c40 = arith.constant 40 : index
    %c0_13 = arith.constant 0 : index
    %39 = vector.load %arg3[%c40, %c0_13] : memref<72x128xbf16, #tpu.memory_space<vmem>>, vector<8x128xbf16>
    %cst_14 = arith.constant dense<0.000000e+00> : vector<256x128xf32>
    %40 = tpu.matmul %16, %39, %cst_14 {dimension_numbers = #tpu.dot_dimension_numbers<[1], [0], [0], [1], [0, 0, 1, 1], [], []>} : vector<256x8xbf16>, vector<8x128xbf16>, vector<256x128xf32> -> vector<256x128xf32>
    %41 = arith.addf %38, %40 : vector<256x128xf32>
    %c48 = arith.constant 48 : index
    %c0_15 = arith.constant 0 : index
    %42 = vector.load %arg3[%c48, %c0_15] : memref<72x128xbf16, #tpu.memory_space<vmem>>, vector<8x128xbf16>
    %cst_16 = arith.constant dense<0.000000e+00> : vector<256x128xf32>
    %43 = tpu.matmul %18, %42, %cst_16 {dimension_numbers = #tpu.dot_dimension_numbers<[1], [0], [0], [1], [0, 0, 1, 1], [], []>} : vector<256x8xbf16>, vector<8x128xbf16>, vector<256x128xf32> -> vector<256x128xf32>
    %44 = arith.addf %41, %43 : vector<256x128xf32>
    %c56 = arith.constant 56 : index
    %c0_17 = arith.constant 0 : index
    %45 = vector.load %arg3[%c56, %c0_17] : memref<72x128xbf16, #tpu.memory_space<vmem>>, vector<8x128xbf16>
    %cst_18 = arith.constant dense<0.000000e+00> : vector<256x128xf32>
    %46 = tpu.matmul %20, %45, %cst_18 {dimension_numbers = #tpu.dot_dimension_numbers<[1], [0], [0], [1], [0, 0, 1, 1], [], []>} : vector<256x8xbf16>, vector<8x128xbf16>, vector<256x128xf32> -> vector<256x128xf32>
    %47 = arith.addf %44, %46 : vector<256x128xf32>
    %c64 = arith.constant 64 : index
    %c0_19 = arith.constant 0 : index
    %48 = vector.load %arg3[%c64, %c0_19] : memref<72x128xbf16, #tpu.memory_space<vmem>>, vector<8x128xbf16>
    %cst_20 = arith.constant dense<0.000000e+00> : vector<256x128xf32>
    %49 = tpu.matmul %22, %48, %cst_20 {dimension_numbers = #tpu.dot_dimension_numbers<[1], [0], [0], [1], [0, 0, 1, 1], [], []>} : vector<256x8xbf16>, vector<8x128xbf16>, vector<256x128xf32> -> vector<256x128xf32>
    %50 = arith.addf %47, %49 : vector<256x128xf32>
    %cst_21 = arith.constant dense<0.000000e+00> : vector<128xf32>
    %51 = vector.multi_reduction <add>, %50, %cst_21 [0] : vector<256x128xf32> to vector<128xf32>
    %52 = vector.shape_cast %51 : vector<128xf32> to vector<1x128xf32>
    %53 = arith.mulf %50, %50 : vector<256x128xf32>
    %cst_22 = arith.constant dense<0.000000e+00> : vector<128xf32>
    %54 = vector.multi_reduction <add>, %53, %cst_22 [0] : vector<256x128xf32> to vector<128xf32>
    %55 = vector.shape_cast %54 : vector<128xf32> to vector<1x128xf32>
    %c0_i32 = arith.constant 0 : i32
    %56 = arith.cmpi eq, %arg1, %c0_i32 : i32
    %57 = arith.extui %56 : i1 to i32
    %c0_i32_23 = arith.constant 0 : i32
    %58 = arith.cmpi ne, %57, %c0_i32_23 : i32
    scf.if %58 {
      %c0_26 = arith.constant 0 : index
      %c0_27 = arith.constant 0 : index
      %62 = vector.load %arg4[%c0_26, %c0_27] : memref<8x128xf32, #tpu.memory_space<vmem>>, vector<1x128xf32>
      tpu.vector_store %arg4[%c0_26, %c0_27], %52 {strides = array<i32>} : memref<8x128xf32, #tpu.memory_space<vmem>>, vector<1x128xf32>,
      %c1 = arith.constant 1 : index
      %c0_28 = arith.constant 0 : index
      %63 = vector.load %arg4[%c1, %c0_28] : memref<8x128xf32, #tpu.memory_space<vmem>>, vector<1x128xf32>
      tpu.vector_store %arg4[%c1, %c0_28], %55 {strides = array<i32>} : memref<8x128xf32, #tpu.memory_space<vmem>>, vector<1x128xf32>,
    } else {
    }
    %c0_i32_24 = arith.constant 0 : i32
    %59 = arith.cmpi ne, %arg1, %c0_i32_24 : i32
    %60 = arith.extui %59 : i1 to i32
    %c0_i32_25 = arith.constant 0 : i32
    %61 = arith.cmpi ne, %60, %c0_i32_25 : i32
    scf.if %61 {
      %c0_26 = arith.constant 0 : index
      %c0_27 = arith.constant 0 : index
      %62 = vector.load %arg4[%c0_26, %c0_27] : memref<8x128xf32, #tpu.memory_space<vmem>>, vector<1x128xf32>
      %63 = arith.addf %62, %52 : vector<1x128xf32>
      %c0_28 = arith.constant 0 : index
      %c0_29 = arith.constant 0 : index
      %64 = vector.load %arg4[%c0_28, %c0_29] : memref<8x128xf32, #tpu.memory_space<vmem>>, vector<1x128xf32>
      tpu.vector_store %arg4[%c0_28, %c0_29], %63 {strides = array<i32>} : memref<8x128xf32, #tpu.memory_space<vmem>>, vector<1x128xf32>,
      %c1 = arith.constant 1 : index
      %c0_30 = arith.constant 0 : index
      %65 = vector.load %arg4[%c1, %c0_30] : memref<8x128xf32, #tpu.memory_space<vmem>>, vector<1x128xf32>
      %66 = arith.addf %65, %55 : vector<1x128xf32>
      %c1_31 = arith.constant 1 : index
      %c0_32 = arith.constant 0 : index
      %67 = vector.load %arg4[%c1_31, %c0_32] : memref<8x128xf32, #tpu.memory_space<vmem>>, vector<1x128xf32>
      tpu.vector_store %arg4[%c1_31, %c0_32], %66 {strides = array<i32>} : memref<8x128xf32, #tpu.memory_space<vmem>>, vector<1x128xf32>,
    } else {
    }
    return
  }
  func.func @transform_0(%arg0: i32, %arg1: i32) -> (i32, i32, i32, i32) {
    %c0_i32 = arith.constant 0 : i32
    %c0_i32_0 = arith.constant 0 : i32
    %c0_i32_1 = arith.constant 0 : i32
    %c0_i32_2 = arith.constant 0 : i32
    return %arg0, %c0_i32, %c0_i32_0, %c0_i32_1 : i32, i32, i32, i32
  }
  func.func @transform_1(%arg0: i32, %arg1: i32) -> (i32, i32) {
    %c0_i32 = arith.constant 0 : i32
    %c0_i32_0 = arith.constant 0 : i32
    %c0_i32_1 = arith.constant 0 : i32
    return %c0_i32, %c0_i32_0 : i32, i32
  }
  func.func @transform_2(%arg0: i32, %arg1: i32) -> (i32, i32) {
    %c0_i32 = arith.constant 0 : i32
    %c0_i32_0 = arith.constant 0 : i32
    return %arg0, %c0_i32 : i32, i32
  }
}

</mosaic_0001>

<bundles_post_ra>
// kernel: tpu_custom_call.1
= control target key start
LH: loop header
LB: loop body
LE: loop exit
PB: predicated region body
PF: predicated region fallthrough
CT: control target
= control target key end

     0   :  { %7 = vsyncpa [#allocation3], 0  ;;  %s3335_s0 = inlined_call_operand.vmem [shape: bf16[2,18,18,8], index: 0, kind: input, shape index: {}]   ;;  %s3336_s1 = inlined_call_operand.vmem [shape: bf16[72,128], index: 1, kind: input, shape index: {}]   ;;  %s3337_s2 = inlined_call_operand.hbm [shape: f32[16,128], index: 2, kind: output, shape index: {}]  }
   0x1   :  { %9 = vsyncpa [#allocation3 + $0x1], 0  ;;  %s2338_s9 = smov 0   ;;  %s2340_s10 = smov 0  }
   0x2   :  { %s2342_s11 = smov 0   ;;  %s2344_s12 = smov 0  }
   0x3   :  { %s2346_s13 = smov 0   ;;  %s2348_s14 = smov 0  }
   0x4 LB: > { %s1968_s15 = sadd.s32 4294967295, %s2312_s14   ;;  %s1969_s16 = sadd.s32 4294967294, %s2312_s14   ;;  %s2312_s14 = sphi %s2348_s14, %s15_s14   ;;  %s2308_s13 = sphi %s2346_s13, %s3348_s13   ;;  %s2304_s12 = sphi %s2344_s12, %s3347_s12   ;;  %s2300_s11 = sphi %s2342_s11, %s3346_s11   ;;  %s2296_s10 = sphi %s2340_s10, %s3345_s10   ;;  %s2292_s9 = sphi %s2338_s9, %s3344_s9  }
   0x5   : > { %s27_s17 = sadd.s32 1, %s2308_s13  ;;  %s81_s18 = sadd.s32 1, %s2300_s11 }
   0x6   : > { %p29_p0 = scmp.ge.s32.totalorder %s27_s17, 2  ;;  %p91_p1 = scmp.ne.s32.totalorder %s2300_s11, %s2296_s10 }
   0x7   : > { %p92_p2 = scmp.eq.s32.totalorder %s1968_s15, 1  ;;  %p97_p3 = scmp.ne.s32.totalorder %s2296_s10, %s2292_s9 }
   0x8   : > { %s3350_s17 = smov (%p29_p0, %s27_s17), 0  ;;  %p98_p5 = scmp.eq.s32.totalorder %s1969_s16, 1 }
   0x9   : > { %p2378_p4 = por %p92_p2, %p91_p1  ;;  %s78_s20 = ssub.s32 %s2308_s13, %s3350_s17 }
   0xa   : > { %p1972_p6 = scmp.ge.s32.totalorder %s2312_s14, 1  ;;  %p79_p7 = scmp.eq.s32.totalorder %s78_s20, 0 }
   0xb   : > { %p2385_p8 = por %p98_p5, %p97_p3  ;;  %p127_p9 = scmp.lt.s32.totalorder %s2312_s14, 3 }
   0xc   : > { %s2391_s22 = scalar_select %p79_p7, %s2300_s11, %s81_s18  }
   0xd   : > { %p128_p10 = pnand %p1972_p6, %p127_p9 }
   0xe   : > { %p149_p11 = scmp.lt.s32.totalorder (!%p128_p10), %s2304_s12, 1  ;;  %vm648_vm0 = vcmask (!%p128_p10), 1042432   ;;  %vm649_vm1 = vcmask (!%p128_p10), 1046532   ;;  %vm213_vm2 = vsmask.f32 (!%p128_p10), 3328  ;;  %s2314_s28 = smov (!%p128_p10), 24  }
   0xf   : > { %131 = sbr.rel (%p128_p10) target bundleno = 655 (0x28f), region = 28  ;;  %vm214_vm3 = vsmask.f32 (!%p128_p10), 7440  ;;  %vm2420_vm4 = vmor (!%p128_p10), %vm648_vm0, %vm649_vm1  ;;  %s2315_s29 = smov (!%p128_p10), 40   ;;  %v2221_v48 = vld [vmem:[%s3336_s1] sm:$0xff] (!%p128_p10)   ;;  %vm1598_vm6 = vcmask (!%p128_p10), 1043456  }
  0x10   : > { %vm2463_vm5 = vmor (!%p128_p10), %vm213_vm2, %vm214_vm3  ;;  %2093 = vmatprep.subr.bf16.mxu0 (!%p128_p10), %v2221_v48  ;;  %2135 = vmatprep.subr.bf16.mxu1 (!%p128_p10), %v2221_v48  ;;  %s2316_s4 = smov (!%p128_p10), 16   ;;  %s2317_s5 = smov (!%p128_p10), 8   ;;  %vm1249_vm7 = vcmask (!%p128_p10), 64512   ;;  %vm1298_vm8 = vcmask (!%p128_p10), 130048   ;;  %vm1331_vm9 = vcmask (!%p128_p10), 195584   ;;  %vm1364_vm10 = vcmask (!%p128_p10), 261120  }
  0x11   : > { %2094 = vmatpush3.bf16.msra.mxu0 (!%p128_p10), %v2221_v48  ;;  %2140 = vmatpush3.bf16.msra.mxu1 (!%p128_p10), %v2221_v48  ;;  %s2318_s20 = smov (!%p128_p10), 32   ;;  %s2321_s25 = smov (!%p128_p10), 64   ;;  %vm1397_vm11 = vcmask (!%p128_p10), 326656   ;;  %vm1430_vm12 = vcmask (!%p128_p10), 392192   ;;  %vm1463_vm13 = vcmask (!%p128_p10), 457728   ;;  %vm1496_vm14 = vcmask (!%p128_p10), 523264  }
  0x12   : > { %vm1565_vm15 = vcmask (!%p128_p10), 588800  }
  0x16   : > { %s150_s23 = scalar_select %p149_p11, %s2304_s12, 1 }
  0x18   : > { %s2147_s24 = smul.u32 216, %s150_s23  ;;  %s2319_s23 = smov 48  }
  0x1a   : > { %s2398_s27 = scalar_lea.vmem %s3335_s0, %s2147_s24  ;;  %s2320_s24 = smov 56  }
  0x1b   : > { %v2401_v0 = vld [vmem:[%s2398_s27 + $0x18] sm:$0xf]  ;;  %v2404_v1 = vld [vmem:[%s2398_s27 + $0x1c] sm:$0xf]  ;;  %v162_v2 = vld [vmem:[%s2398_s27 + $0xc] sm:$0xf] }
  0x1c   : > { %v278_v3 = vshrl.u32 %v2404_v1, 16  ;;  %v2410_v4 = vcombine.low %v2401_v0, %v2404_v1  ;;  %v265_v5 = vshrl.u32 %v2401_v0, 16  ;;  %v268_v6 = vshll.u32 %v2401_v0, 16  ;;  %v163_v7 = vld [vmem:[%s2398_s27 + $0x10] sm:$0xf] }
  0x1d   : > { %v250_v8 = vshll.u32 %v163_v7, 16  ;;  %v254_v9 = vshrl.u32 %v163_v7, 16  ;;  %v2415_v10 = vcombine.low %v162_v2, %v163_v7  ;;  %v241_v11 = vshrl.u32 %v162_v2, 16  ;;  %v164_v12 = vld [vmem:[%s2398_s27 + $0x14] sm:$0x1] }
  0x1e   : > { %1044 = vrot.lane.b32.xlu1 %v2410_v4, %s2314_s28  ;;  %v244_v14 = vshll.u32 %v162_v2, 16  ;;  %v1976_v15 = vrot.slane %v162_v2, 9  ;;  %v660_v16 = vrot.slane %v163_v7, 5  ;;  %v663_v17 = vrot.slane %v164_v12, 5  ;;  %v2427_v18 = vld [vmem:[%s2398_s27] sm:$0xf] }
  0x1f   : > { %v2429_v19 = vrot.slane %v254_v9, 4  ;;  %1042 = vrot.lane.b32.xlu0 %v2415_v10, %s2314_s28  ;;  %v243_v20 = vrot.slane %v241_v11, 4  ;;  %v2434_v21 = vld [vmem:[%s2398_s27 + $0x4] sm:$0xf]  ;;  %v161_v22 = vld [vmem:[%s2398_s27 + $0x8] sm:$0x1] }
  0x20   : > { %v246_v23 = vrot.slane %v244_v14, 5  ;;  %v661_v24 = vsel %vm2420_vm4, %v1976_v15, %v660_v16  ;;  %v662_v25 = vrot.slane %v660_v16, 4  ;;  %v1975_v26 = vrot.slane %v2427_v18, 9  ;;  %v2448_v35 = vld [vmem:[%s2398_s27 + $0x20] sm:$0x1] }
  0x21   : > { %v653_v27 = vrot.slane %v2434_v21, 5  ;;  %v656_v28 = vrot.slane %v161_v22, 5  ;;  %v217_v29 = vshrl.u32 %v2427_v18, 16  ;;  %v220_v30 = vshll.u32 %v2427_v18, 16  ;;  %v2489_v14 = vld [vmem:[%s2398_s27 + $0x28] sm:$0xf] }
  0x22   : > { %v664_v31 = vsel %vm2420_vm4, %v662_v25, %v663_v17  ;;  %v226_v32 = vshll.u32 %v2434_v21, 16  ;;  %v230_v33 = vshrl.u32 %v2434_v21, 16  ;;  %v236_v34 = vshll.u32 %v161_v22, 16 }
  0x23   : > { %v2026_v36 = vcombine.low %v661_v24, %v664_v31  ;;  %v654_v37 = vsel %vm2420_vm4, %v1975_v26, %v653_v27  ;;  %v655_v38 = vrot.slane %v653_v27, 4  ;;  %v219_v39 = vrot.slane %v217_v29, 4  ;;  %v170_v27 = vld [vmem:[%s2398_s27 + $0x2c] sm:$0x1]  ;;  %v2223_v29 = vld [vmem:[%s3336_s1 + $0x10] sm:$0xff]  }
  0x24   : > { %v222_v40 = vrot.slane %v220_v30, 5  ;;  %v228_v41 = vrot.slane %v226_v32, 5  ;;  %v232_v42 = vrot.slane %v230_v33, 4  ;;  %v238_v43 = vrot.slane %v236_v34, 5 }
  0x25   : > { %1112 = vrot.lane.b32.xlu0 %v2026_v36, %s2315_s29  ;;  %v657_v44 = vsel %vm2420_vm4, %v655_v38, %v656_v28  ;;  %v1977_v45 = vrot.slane %v2401_v0, 9  ;;  %v667_v46 = vrot.slane %v2404_v1, 5  ;;  %v670_v47 = vrot.slane %v2448_v35, 5 }
  0x26   : > { %v2025_v49 = vcombine.low %v654_v37, %v657_v44  ;;  %v223_v50 = vor.u32 %v222_v40, %v219_v39  ;;  %v233_v51 = vor.u32 %v232_v42, %v228_v41  ;;  %v247_v52 = vor.u32 %v246_v23, %v243_v20  ;;  %v2225_v40 = vld [vmem:[%s3336_s1 + $0x18] sm:$0xff]  }
  0x27   : > { %v668_v54 = vsel %vm2420_vm4, %v1977_v45, %v667_v46  ;;  %v669_v55 = vrot.slane %v667_v46, 4  ;;  %v252_v56 = vrot.slane %v250_v8, 5  ;;  %v260_v57 = vshll.u32 %v164_v12, 16  ;;  %v2478_v8 = vld [vmem:[%s2398_s27 + $0x24] sm:$0xf] }
  0x28   : > { %1007 = vrot.lane.b32.xlu1 %v2025_v49, %s2316_s4  ;;  %v224_v58 = vrot.slane %v223_v50, 4  ;;  %v234_v59 = vrot.slane %v233_v51, 4  ;;  %v248_v60 = vrot.slane %v247_v52, 4  ;;  %v267_v61 = vrot.slane %v265_v5, 4  ;;  %v171_v51 = vld [vmem:[%s2398_s27 + $0x30] sm:$0xf] }
  0x29   : > { %v671_v62 = vsel %vm2420_vm4, %v669_v55, %v670_v47  ;;  %v257_v63 = vor.u32 %v2429_v19, %v252_v56  ;;  %v262_v2 = vrot.slane %v260_v57, 5  ;;  %v270_v7 = vrot.slane %v268_v6, 5  ;;  %v172_v52 = vld [vmem:[%s2398_s27 + $0x34] sm:$0xf] }
  0x2a   : > { %v229_v9 = vsel %vm2463_vm5, %v224_v58, %v228_v41  ;;  %v239_v11 = vsel %vm2463_vm5, %v234_v59, %v238_v43  ;;  %v2484_v5 = vcombine.low %v668_v54, %v671_v62  ;;  %v253_v12 = vsel %vm2463_vm5, %v248_v60, %v252_v56 }
  0x2b   : > { %v2009_v15 = vcombine.low %v229_v9, %v239_v11  ;;  %v258_v0 = vrot.slane %v257_v63, 4  ;;  %v271_v6 = vor.u32 %v270_v7, %v267_v61  ;;  %v274_v16 = vshll.u32 %v2404_v1, 16  ;;  %v2222_v1 = vld [vmem:[%s3336_s1 + $0x8] sm:$0xff]  }
  0x2c   : > { %1009 = vrot.lane.b32.xlu1 %v2026_v36, %s2316_s4  ;;  %v280_v17 = vrot.slane %v278_v3, 4  ;;  %v284_v19 = vshll.u32 %v2448_v35, 16  ;;  %v289_v20 = vshrl.u32 %v2478_v8, 16  ;;  %v292_v22 = vshll.u32 %v2478_v8, 16  ;;  %2095 = vmatprep.subr.bf16.mxu0 %v2222_v1 }
  0x2d   : > { %927 = vrot.lane.b32.xlu0 %v2009_v15, %s2317_s5  ;;  %v263_v23 = vsel %vm2463_vm5, %v258_v0, %v262_v2  ;;  %v272_v24 = vrot.slane %v271_v6, 4  ;;  %v276_v25 = vrot.slane %v274_v16, 5  ;;  %v302_v26 = vshrl.u32 %v2489_v14, 16  ;;  %2136 = vmatprep.subr.bf16.mxu1 %v2222_v1  ;;  %v173_v2 = vld [vmem:[%s2398_s27 + $0x38] sm:$0x1] }
  0x2e   : > { %v2010_v3 = vcombine.low %v253_v12, %v263_v23  ;;  %v291_v28 = vrot.slane %v289_v20, 4  ;;  %v286_v31 = vrot.slane %v284_v19, 5  ;;  %v294_v32 = vrot.slane %v292_v22, 5  ;;  %2096 = vmatpush3.bf16.msra.mxu0 %v2222_v1  ;;  %2141 = vmatpush3.bf16.msra.mxu1 %v2222_v1  ;;  %v2549_v6 = vld [vmem:[%s2398_s27 + $0x3c] sm:$0xf] }
  0x2f   : > { %v281_v30 = vor.u32 %v280_v17, %v276_v25  ;;  %v298_v33 = vshll.u32 %v2489_v14, 16  ;;  %v304_v34 = vrot.slane %v302_v26, 4  ;;  %v308_v35 = vshll.u32 %v170_v27, 16  ;;  %2097 = vmatprep.subr.bf16.mxu0 %v2223_v29  ;;  %2137 = vmatprep.subr.bf16.mxu1 %v2223_v29  ;;  %v175_v16 = vld [vmem:[%s2398_s27 + $0x40] sm:$0xf] }
  0x30   : > { %1114 = vrot.lane.b32.xlu1 %v2484_v5, %s2315_s29  ;;  %v277_v36 = vsel %vm2463_vm5, %v272_v24, %v276_v25  ;;  %v295_v38 = vor.u32 %v294_v32, %v291_v28  ;;  %v2524_v47 = vcombine.low %v2478_v8, %v2489_v14  ;;  %v674_v48 = vrot.slane %v2489_v14, 5 }
  0x31   : > { %929 = vrot.lane.b32.xlu0 %v2010_v3, %s2317_s5  ;;  %v282_v37 = vrot.slane %v281_v30, 4  ;;  %v300_v39 = vrot.slane %v298_v33, 5  ;;  %v310_v44 = vrot.slane %v308_v35, 5  ;;  %v1978_v55 = vrot.slane %v2478_v8, 9  ;;  %v176_v35 = vld [vmem:[%s2398_s27 + $0x44] sm:$0x1] }
  0x32   : > { %v296_v42 = vrot.slane %v295_v38, 4  ;;  %2098 = vmatpush3.bf16.msra.mxu0 %v2223_v29  ;;  %2142 = vmatpush3.bf16.msra.mxu1 %v2223_v29  ;;  %v676_v56 = vrot.slane %v674_v48, 4  ;;  %v677_v57 = vrot.slane %v170_v27, 5  ;;  %v313_v58 = vshrl.u32 %v171_v51, 16 }
  0x33   : > { %v287_v41 = vsel %vm2463_vm5, %v282_v37, %v286_v31  ;;  %v305_v43 = vor.u32 %v304_v34, %v300_v39  ;;  %2099 = vmatprep.subr.bf16.mxu0 %v2225_v40  ;;  %2138 = vmatprep.subr.bf16.mxu1 %v2225_v40  ;;  %v316_v59 = vshll.u32 %v171_v51, 16  ;;  %v326_v60 = vshrl.u32 %v172_v52, 16 }
  0x34   : > { %v2011_v45 = vcombine.low %v277_v36, %v287_v41  ;;  %v301_v49 = vsel %vm2463_vm5, %v296_v42, %v300_v39  ;;  %v322_v61 = vshll.u32 %v172_v52, 16  ;;  %v675_v62 = vsel %vm2420_vm4, %v1978_v55, %v674_v48 }
  0x35   : > { %1077 = vrot.lane.b32.xlu0 %v2010_v3, %s2318_s20  ;;  %v306_v46 = vrot.slane %v305_v43, 4  ;;  %v678_v63 = vsel %vm2420_vm4, %v676_v56, %v677_v57  ;;  %v315_v7 = vrot.slane %v313_v58, 4  ;;  %v318_v8 = vrot.slane %v316_v59, 5 }
  0x36   : > { %1079 = vrot.lane.b32.xlu1 %v2011_v45, %s2318_s20  ;;  %2100 = vmatpush3.bf16.msra.mxu0 %v2225_v40  ;;  %v324_v9 = vrot.slane %v322_v61, 5  ;;  %v328_v11 = vrot.slane %v326_v60, 4  ;;  %v2028_v12 = vcombine.low %v675_v62, %v678_v63  ;;  %v332_v14 = vshll.u32 %v173_v2, 16  ;;  %v2226_v62 = vld [vmem:[%s3336_s1 + $0x20] ss:$0 sps:$4 sm:$0xff]  }
  0x37   : > { %v311_v50 = vsel %vm2463_vm5, %v306_v46, %v310_v44  ;;  %2143 = vmatpush3.bf16.msra.mxu1 %v2225_v40  ;;  %v319_v15 = vor.u32 %v318_v8, %v315_v7  ;;  %v681_v19 = vrot.slane %v172_v52, 5  ;;  %v337_v20 = vshrl.u32 %v2549_v6, 16  ;;  %v179_v8 = vld [vmem:[%s2398_s27 + $0x50] sm:$0x1]  ;;  %2145 = vmatprep.subr.msk.bf16.mxu0 %vm1598_vm6, %v2226_v62 }
  0x38   : > { %v2012_v54 = vcombine.low %v301_v49, %v311_v50  ;;  %v329_v0 = vor.u32 %v328_v11, %v324_v9  ;;  %v334_v17 = vrot.slane %v332_v14, 5  ;;  %v340_v22 = vshll.u32 %v2549_v6, 16  ;;  %2146 = vmatprep.subr.msk.bf16.mxu1 %vm1598_vm6, %v2226_v62 }
  0x39   : > { %1147 = vrot.lane.b32.xlu0 %v2410_v4, %s2319_s23  ;;  %v320_v23 = vrot.slane %v319_v15, 4  ;;  %v350_v25 = vshrl.u32 %v175_v16, 16  ;;  %v346_v26 = vshll.u32 %v175_v16, 16  ;;  %v2558_v27 = vcombine.low %v171_v51, %v172_v52  ;;  %v2591_v52 = vld [vmem:[%s2398_s27 + $0x4c] sm:$0xf] }
  0x3a   : > { %1149 = vrot.lane.b32.xlu1 %v2524_v47, %s2319_s23  ;;  %v330_v24 = vrot.slane %v329_v0, 4  ;;  %v1979_v1 = vrot.slane %v171_v51, 9  ;;  %v683_v3 = vrot.slane %v681_v19, 4  ;;  %v684_v28 = vrot.slane %v173_v2, 5  ;;  %v2588_v51 = vld [vmem:[%s2398_s27 + $0x48] sm:$0xf] }
  0x3b   : > { %v339_v29 = vrot.slane %v337_v20, 4  ;;  %v342_v30 = vrot.slane %v340_v22, 5  ;;  %v325_v31 = vsel %vm2463_vm5, %v320_v23, %v324_v9  ;;  %v348_v33 = vrot.slane %v346_v26, 5 }
  0x3c   : > { %v335_v32 = vsel %vm2463_vm5, %v330_v24, %v334_v17  ;;  %v352_v34 = vrot.slane %v350_v25, 4  ;;  %v682_v36 = vsel %vm2420_vm4, %v1979_v1, %v681_v19  ;;  %v685_v37 = vsel %vm2420_vm4, %v683_v3, %v684_v28  ;;  %v180_v17 = vld [vmem:[%s2398_s27 + $0x54] sm:$0xf]  ;;  %v181_v19 = vld [vmem:[%s2398_s27 + $0x58] sm:$0xf] }
  0x3d   : > { %1182 = vrot.lane.b32.xlu0 %v2011_v45, %s2320_s24  ;;  %v343_v38 = vor.u32 %v342_v30, %v339_v29  ;;  %v356_v40 = vshll.u32 %v176_v35, 16  ;;  %v2029_v41 = vcombine.low %v682_v36, %v685_v37  ;;  %v688_v46 = vrot.slane %v175_v16, 5  ;;  %v182_v37 = vld [vmem:[%s2398_s27 + $0x5c] sm:$0x1] }
  0x3e   : > { %1184 = vrot.lane.b32.xlu1 %v2012_v54, %s2320_s24  ;;  %v353_v39 = vor.u32 %v352_v34, %v348_v33  ;;  %v1993_v48 = vcombine.low %v2427_v18, %v2434_v21  ;;  %v691_v57 = vrot.slane %v176_v35, 5  ;;  %v361_v58 = vshrl.u32 %v2588_v51, 16 }
  0x3f   : > { %v344_v42 = vrot.slane %v343_v38, 4  ;;  %v358_v44 = vrot.slane %v356_v40, 5  ;;  %v690_v56 = vrot.slane %v688_v46, 4  ;;  %v364_v59 = vshll.u32 %v2588_v51, 16 }
  0x40   : > { %v354_v43 = vrot.slane %v353_v39, 4  ;;  %v374_v60 = vshrl.u32 %v2591_v52, 16  ;;  %v370_v61 = vshll.u32 %v2591_v52, 16  ;;  %v363_v7 = vrot.slane %v361_v58, 4 }
  0x41   : > { %1217 = vrot.lane.b32.xlu0 %v2484_v5, %s2321_s25  ;;  %v349_v49 = vsel %vm2463_vm5, %v344_v42, %v348_v33  ;;  %v692_v2 = vsel %vm2420_vm4, %v690_v56, %v691_v57  ;;  %v366_v9 = vrot.slane %v364_v59, 5  ;;  %v1600_v15 = vsel %vm1598_vm6, %v2226_v62, 0  ;;  %v184_v57 = vld [vmem:[%s2398_s27 + $0x64] sm:$0xf] }
  0x42   : > { %931 = vrot.lane.b32.xlu1 %v2011_v45, %s2317_s5  ;;  %v2579_v45 = vcombine.low %v2549_v6, %v175_v16  ;;  %v359_v50 = vsel %vm2463_vm5, %v354_v43, %v358_v44  ;;  %v372_v11 = vrot.slane %v370_v61, 5  ;;  %v380_v0 = vshll.u32 %v179_v8, 16  ;;  %2102 = vmatpush3.bf16.msra.mxu0 %v1600_v15 }
  0x43   : > { %v2014_v55 = vcombine.low %v349_v49, %v359_v50  ;;  %2144 = vmatpush3.bf16.msra.mxu1 %v1600_v15  ;;  %v695_v22 = vrot.slane %v2591_v52, 5  ;;  %v385_v23 = vshrl.u32 %v180_v17, 16  ;;  %v388_v24 = vshll.u32 %v180_v17, 16 }
  0x44   : > { %v382_v20 = vrot.slane %v380_v0, 5  ;;  %v398_v1 = vshrl.u32 %v181_v19, 16  ;;  %v394_v3 = vshll.u32 %v181_v19, 16  ;;  %v2622_v28 = vcombine.low %v2588_v51, %v2591_v52 }
  0x45   : > { %1219 = vrot.lane.b32.xlu0 %v2028_v12, %s2321_s25  ;;  %v1981_v29 = vrot.slane %v2588_v51, 9  ;;  %v697_v30 = vrot.slane %v695_v22, 4  ;;  %v390_v33 = vrot.slane %v388_v24, 5  ;;  %v404_v43 = vshll.u32 %v182_v37, 16 }
  0x46   : > { %933 = vrot.lane.b32.xlu1 %v2012_v54, %s2317_s5  ;;  %v400_v36 = vrot.slane %v398_v1, 4  ;;  %v2643_v51 = vcombine.low %v180_v17, %v181_v19  ;;  %v702_v52 = vrot.slane %v181_v19, 5  ;;  %v1982_v58 = vrot.slane %v180_v17, 9 }
  0x47   : > { %v696_v39 = vsel %vm2420_vm4, %v1981_v29, %v695_v22  ;;  %v406_v50 = vrot.slane %v404_v43, 5  ;;  %v705_v59 = vrot.slane %v182_v37, 5  ;;  %v2668_v22 = vld [vmem:[%s2398_s27 + $0x70] sm:$0xf] }
  0x48   : > { %v704_v61 = vrot.slane %v702_v52, 4  ;;  %v446_v29 = vshrl.u32 %v2668_v22, 16 }
  0x49   : > { %1011 = vrot.lane.b32.xlu0 %v2484_v5, %s2316_s4  ;;  %v2013_v5 = vcombine.low %v325_v31, %v335_v32  ;;  %v698_v31 = vrot.slane %v179_v8, 5  ;;  %v387_v32 = vrot.slane %v385_v23, 4  ;;  %v703_v8 = vsel %vm2420_vm4, %v1982_v58, %v702_v52 }
  0x4a   : > { %1013 = vrot.lane.b32.xlu1 %v2028_v12, %s2316_s4 }
  0x4b   : > { %v699_v40 = vsel %vm2420_vm4, %v697_v30, %v698_v31  ;;  %v442_v30 = vshll.u32 %v2668_v22, 16 }
  0x4c   : > { %v2031_v44 = vcombine.low %v696_v39, %v699_v40  ;;  %v448_v39 = vrot.slane %v446_v29, 4  ;;  %v188_v40 = vld [vmem:[%s2398_s27 + $0x74] sm:$0x1] }
  0x4d   : > { %1046 = vrot.lane.b32.xlu0 %v2524_v47, %s2314_s28 }
  0x4e   : > { %1048 = vrot.lane.b32.xlu1 %v2558_v27, %s2314_s28 }
  0x51   : > { %1081 = vrot.lane.b32.xlu0 %v2012_v54, %s2318_s20  ;;  %v1980_v54 = vrot.slane %v2549_v6, 9  ;;  %v367_v6 = vor.u32 %v366_v9, %v363_v7  ;;  %v418_v7 = vshll.u32 %v184_v57, 16  ;;  %v706_v9 = vsel %vm2420_vm4, %v704_v61, %v705_v59 }
  0x52   : > { %1083 = vrot.lane.b32.xlu1 %v2013_v5, %s2318_s20  ;;  %v716_v59 = vrot.slane %v2668_v22, 5 }
  0x53   : > { %v689_v63 = vsel %vm2420_vm4, %v1980_v54, %v688_v46  ;;  %v368_v25 = vrot.slane %v367_v6, 4  ;;  %v420_v15 = vrot.slane %v418_v7, 5  ;;  %v2032_v6 = vcombine.low %v703_v8, %v706_v9 }
  0x54   : > { %v2030_v14 = vcombine.low %v689_v63, %v692_v2  ;;  %v422_v2 = vshrl.u32 %v184_v57, 16  ;;  %v719_v8 = vrot.slane %v188_v40, 5 }
  0x55   : > { %1116 = vrot.lane.b32.xlu0 %v2028_v12, %s2315_s29  ;;  %v376_v12 = vrot.slane %v374_v60, 4  ;;  %v373_v34 = vsel %vm2463_vm5, %v368_v25, %v372_v11  ;;  %v709_v25 = vrot.slane %v184_v57, 5 }
  0x56   : > { %1118 = vrot.lane.b32.xlu1 %v2029_v41, %s2315_s29  ;;  %v424_v0 = vrot.slane %v422_v2, 4 }
  0x57   : > { %v377_v16 = vor.u32 %v376_v12, %v372_v11 }
  0x58   : > { %v425_v19 = vor.u32 %v424_v0, %v420_v15 }
  0x59   : > { %1151 = vrot.lane.b32.xlu0 %v2558_v27, %s2319_s23  ;;  %v378_v26 = vrot.slane %v377_v16, 4 }
  0x5a   : > { %1153 = vrot.lane.b32.xlu1 %v2579_v45, %s2319_s23  ;;  %v426_v1 = vrot.slane %v425_v19, 4 }
  0x5b   : > { %v383_v35 = vsel %vm2463_vm5, %v378_v26, %v382_v20  ;;  %v2665_v20 = vld [vmem:[%s2398_s27 + $0x6c] sm:$0xf] }
  0x5c   : > { %v2015_v38 = vcombine.low %v373_v34, %v383_v35  ;;  %v433_v26 = vshrl.u32 %v2665_v20, 16  ;;  %v711_v34 = vrot.slane %v709_v25, 4  ;;  %v2706_v58 = vcombine.low %v2665_v20, %v2668_v22 }
  0x5d   : > { %1186 = vrot.lane.b32.xlu0 %v2013_v5, %s2320_s24  ;;  %v1984_v7 = vrot.slane %v2665_v20, 9 }
  0x5e   : > { %1188 = vrot.lane.b32.xlu1 %v2014_v55, %s2320_s24 }
  0x61   : > { %1221 = vrot.lane.b32.xlu0 %v2029_v41, %s2321_s25 }
  0x62   : > { %935 = vrot.lane.b32.xlu1 %v2013_v5, %s2317_s5  ;;  %v396_v5 = vrot.slane %v394_v3, 5  ;;  %v436_v3 = vshll.u32 %v2665_v20, 16 }
  0x64   : > { %v401_v42 = vor.u32 %v400_v36, %v396_v5  ;;  %v438_v37 = vrot.slane %v436_v3, 5 }
  0x65   : > { %1223 = vrot.lane.b32.xlu0 %v2030_v14, %s2321_s25 }
  0x66   : > { %937 = vrot.lane.b32.xlu1 %v2014_v55, %s2317_s5  ;;  %v402_v49 = vrot.slane %v401_v42, 4 }
  0x68   : > { %v407_v56 = vsel %vm2463_vm5, %v402_v49, %v406_v50  ;;  %v452_v49 = vshll.u32 %v188_v40, 16 }
  0x69   : > { %1015 = vrot.lane.b32.xlu0 %v2029_v41, %s2316_s4  ;;  %v391_v41 = vor.u32 %v390_v33, %v387_v32 }
  0x6a   : > { %1017 = vrot.lane.b32.xlu1 %v2030_v14, %s2316_s4 }
  0x6b   : > { %v392_v46 = vrot.slane %v391_v41, 4 }
  0x6d   : > { %1050 = vrot.lane.b32.xlu0 %v2579_v45, %s2314_s28  ;;  %v397_v54 = vsel %vm2463_vm5, %v392_v46, %v396_v5  ;;  %v435_v5 = vrot.slane %v433_v26, 4 }
  0x6e   : > { %1052 = vrot.lane.b32.xlu1 %v2622_v28, %s2314_s28  ;;  %v2016_v60 = vcombine.low %v397_v54, %v407_v56 }
  0x71   : > { %1085 = vrot.lane.b32.xlu0 %v2014_v55, %s2318_s20  ;;  %v183_v55 = vld [vmem:[%s2398_s27 + $0x60] sm:$0xf] }
  0x72   : > { %1087 = vrot.lane.b32.xlu1 %v2015_v38, %s2318_s20  ;;  %v409_v62 = vshrl.u32 %v183_v55, 16  ;;  %v412_v63 = vshll.u32 %v183_v55, 16  ;;  %v2677_v31 = vcombine.low %v183_v55, %v184_v57  ;;  %v1983_v32 = vrot.slane %v183_v55, 9 }
  0x73   : > { %v454_v55 = vrot.slane %v452_v49, 5 }
  0x74   : > { %v411_v11 = vrot.slane %v409_v62, 4  ;;  %v414_v12 = vrot.slane %v412_v63, 5  ;;  %v710_v42 = vsel %vm2420_vm4, %v1983_v32, %v709_v25  ;;  %v2714_v62 = vld [vmem:[%s2398_s27 + $0x78] sm:$0xf]  ;;  %v2717_v63 = vld [vmem:[%s2398_s27 + $0x7c] sm:$0xf] }
  0x75   : > { %1120 = vrot.lane.b32.xlu0 %v2030_v14, %s2315_s29  ;;  %v185_v14 = vld [vmem:[%s2398_s27 + $0x68] sm:$0x1]  ;;  %v470_v0 = vshrl.u32 %v2717_v63, 16  ;;  %v2772_v18 = vcombine.low %v2714_v62, %v2717_v63  ;;  %v1985_v21 = vrot.slane %v2714_v62, 9 }
  0x76   : > { %1122 = vrot.lane.b32.xlu1 %v2031_v44, %s2315_s29  ;;  %v415_v16 = vor.u32 %v414_v12, %v411_v11  ;;  %v428_v17 = vshll.u32 %v185_v14, 16  ;;  %v712_v35 = vrot.slane %v185_v14, 5  ;;  %v718_v12 = vrot.slane %v716_v59, 4 }
  0x77   : > { %v457_v14 = vshrl.u32 %v2714_v62, 16  ;;  %v472_v26 = vrot.slane %v470_v0, 4 }
  0x78   : > { %v416_v23 = vrot.slane %v415_v16, 4  ;;  %v430_v24 = vrot.slane %v428_v17, 5  ;;  %v713_v43 = vsel %vm2420_vm4, %v711_v34, %v712_v35  ;;  %v717_v17 = vsel %vm2420_vm4, %v1984_v7, %v716_v59  ;;  %v2748_v34 = vld [vmem:[%s2398_s27 + $0x84] sm:$0xf]  ;;  %v2751_v35 = vld [vmem:[%s2398_s27 + $0x88] sm:$0xf] }
  0x79   : > { %1155 = vrot.lane.b32.xlu0 %v2622_v28, %s2319_s23  ;;  %v2695_v50 = vcombine.low %v710_v42, %v713_v43  ;;  %v720_v19 = vsel %vm2420_vm4, %v718_v12, %v719_v8  ;;  %v459_v20 = vrot.slane %v457_v14, 4  ;;  %v494_v43 = vshrl.u32 %v2751_v35, 16  ;;  %v2784_v8 = vld [vmem:[%s2398_s27 + $0x8c] sm:$0x1] }
  0x7a   : > { %1157 = vrot.lane.b32.xlu1 %v2643_v51, %s2319_s23  ;;  %v421_v33 = vsel %vm2463_vm5, %v416_v23, %v420_v15  ;;  %v431_v36 = vsel %vm2463_vm5, %v426_v1, %v430_v24  ;;  %v460_v15 = vshll.u32 %v2714_v62, 16  ;;  %v191_v24 = vld [vmem:[%s2398_s27 + $0x80] sm:$0x1]  ;;  %v2742_v1 = vcombine.low %v717_v17, %v720_v19 }
  0x7b   : > { %v2017_v41 = vcombine.low %v421_v33, %v431_v36  ;;  %v500_v19 = vshll.u32 %v2784_v8, 16 }
  0x7c   : > { %v462_v22 = vrot.slane %v460_v15, 5 }
  0x7d   : > { %1190 = vrot.lane.b32.xlu0 %v2015_v38, %s2320_s24 }
  0x7e   : > { %1192 = vrot.lane.b32.xlu1 %v2016_v60, %s2320_s24  ;;  %v463_v29 = vor.u32 %v462_v22, %v459_v20 }
  0x80   : > { %v464_v36 = vrot.slane %v463_v29, 4 }
  0x81   : > { %1225 = vrot.lane.b32.xlu0 %v2031_v44, %s2321_s25 }
  0x82   : > { %939 = vrot.lane.b32.xlu1 %v2015_v38, %s2317_s5  ;;  %v444_v38 = vrot.slane %v442_v30, 5  ;;  %v476_v30 = vshll.u32 %v191_v24, 16 }
  0x84   : > { %v449_v46 = vor.u32 %v448_v39, %v444_v38  ;;  %v484_v39 = vshll.u32 %v2748_v34, 16 }
  0x85   : > { %1227 = vrot.lane.b32.xlu0 %v2032_v6, %s2321_s25 }
  0x86   : > { %941 = vrot.lane.b32.xlu1 %v2016_v60, %s2317_s5  ;;  %v450_v56 = vrot.slane %v449_v46, 4 }
  0x88   : > { %v455_v61 = vsel %vm2463_vm5, %v450_v56, %v454_v55 }
  0x89   : > { %1019 = vrot.lane.b32.xlu0 %v2031_v44, %s2316_s4  ;;  %v439_v44 = vor.u32 %v438_v37, %v435_v5  ;;  %v723_v5 = vrot.slane %v2717_v63, 5  ;;  %v478_v37 = vrot.slane %v476_v30, 5  ;;  %v502_v30 = vrot.slane %v500_v19, 5 }
  0x8a   : > { %1021 = vrot.lane.b32.xlu1 %v2032_v6, %s2316_s4 }
  0x8b   : > { %v440_v54 = vrot.slane %v439_v44, 4  ;;  %v490_v44 = vshll.u32 %v2751_v35, 16  ;;  %v724_v15 = vsel %vm2420_vm4, %v1985_v21, %v723_v5 }
  0x8d   : > { %1054 = vrot.lane.b32.xlu0 %v2643_v51, %s2314_s28 }
  0x8e   : > { %1056 = vrot.lane.b32.xlu1 %v2677_v31, %s2314_s28 }
  0x90   : > { %v2699_v57 = vpop.permute.xlu1 %1044 }
  0x91   : > { %1089 = vrot.lane.b32.xlu0 %v2016_v60, %s2318_s20  ;;  %v2697_v52 = vpop.permute.xlu0 %1042  ;;  %v445_v60 = vsel %vm2463_vm5, %v440_v54, %v444_v38  ;;  %v481_v38 = vshrl.u32 %v2748_v34, 16 }
  0x92   : > { %1091 = vrot.lane.b32.xlu1 %v2017_v41, %s2318_s20  ;;  %v2726_v11 = vcombine.low %v445_v60, %v455_v61  ;;  %v486_v60 = vrot.slane %v484_v39, 5  ;;  %v492_v61 = vrot.slane %v490_v44, 5  ;;  %v733_v44 = vrot.slane %v2784_v8, 5 }
  0x93   : > { %v483_v55 = vrot.slane %v481_v38, 4 }
  0x95   : > { %1124 = vrot.lane.b32.xlu0 %v2032_v6, %s2315_s29  ;;  %v466_v6 = vshll.u32 %v2717_v63, 16  ;;  %v496_v63 = vrot.slane %v494_v43, 4  ;;  %v2841_v43 = vld [vmem:[%s2398_s27 + $0x94] sm:$0xf] }
  0x96   : > { %1126 = vrot.lane.b32.xlu1 %v2695_v50, %s2315_s29 }
  0x97   : > { %v2721_v2 = vpop.permute.xlu0 %1112  ;;  %v468_v25 = vrot.slane %v466_v6, 5  ;;  %v497_v17 = vor.u32 %v496_v63, %v492_v61  ;;  %v197_v63 = vld [vmem:[%s2398_s27 + $0x98] sm:$0x1] }
  0x99   : > { %1159 = vrot.lane.b32.xlu0 %v2677_v31, %s2319_s23  ;;  %v473_v33 = vor.u32 %v472_v26, %v468_v25  ;;  %v469_v56 = vsel %vm2463_vm5, %v464_v36, %v468_v25  ;;  %v2826_v36 = vcombine.low %v2748_v34, %v2751_v35 }
  0x9a   : > { %1161 = vrot.lane.b32.xlu1 %v2706_v58, %s2319_s23  ;;  %v1008_v9 = vpop.permute.xlu1 %1007 }
  0x9b   : > { %v474_v42 = vrot.slane %v473_v33, 4 }
  0x9d   : > { %1194 = vrot.lane.b32.xlu0 %v2017_v41, %s2320_s24 }
  0x9e   : > { %1196 = vrot.lane.b32.xlu1 %v2726_v11, %s2320_s24  ;;  %v1010_v16 = vpop.permute.xlu1 %1009 }
  0x9f   : > { %v928_v23 = vpop.permute.xlu0 %927 }
  0xa0   : > { %v1252_v40 = vsel %vm1249_vm7, %v1993_v48, %v928_v23  ;;  %v726_v48 = vrot.slane %v191_v24, 5 }
  0xa1   : > { %1229 = vrot.lane.b32.xlu0 %v2695_v50, %s2321_s25  ;;  %v1300_v54 = vsel %vm1298_vm8, %v1252_v40, %v1008_v9  ;;  %v2835_v40 = vld [vmem:[%s2398_s27 + $0x90] sm:$0xf] }
  0xa2   : > { %943 = vrot.lane.b32.xlu1 %v2017_v41, %s2317_s5  ;;  %v2745_v3 = vpop.permute.xlu1 %1114  ;;  %v1333_v9 = vsel %vm1331_vm9, %v1300_v54, %v2697_v52  ;;  %v505_v21 = vshrl.u32 %v2835_v40, 16 }
  0xa3   : > { %v930_v32 = vpop.permute.xlu0 %929 }
  0xa4   : > { %v1255_v49 = vsel %vm1249_vm7, %v2415_v10, %v930_v32  ;;  %v725_v10 = vrot.slane %v723_v5, 4 }
  0xa5   : > { %1231 = vrot.lane.b32.xlu0 %v2742_v1, %s2321_s25  ;;  %v1302_v62 = vsel %vm1298_vm8, %v1255_v49, %v1010_v16  ;;  %v487_v16 = vor.u32 %v486_v60, %v483_v55 }
  0xa6   : > { %945 = vrot.lane.b32.xlu1 %v2726_v11, %s2317_s5  ;;  %v727_v0 = vsel %vm2420_vm4, %v725_v10, %v726_v48  ;;  %v1335_v52 = vsel %vm1331_vm9, %v1302_v62, %v2699_v57  ;;  %v508_v48 = vshll.u32 %v2835_v40, 16  ;;  %v514_v10 = vshll.u32 %v2841_v43, 16 }
  0xa7   : > { %v1078_v41 = vpop.permute.xlu0 %1077  ;;  %v2810_v57 = vcombine.low %v724_v15, %v727_v0  ;;  %v488_v29 = vrot.slane %v487_v16, 4  ;;  %v524_v15 = vshll.u32 %v197_v63, 16 }
  0xa8   : > { %v1080_v46 = vpop.permute.xlu1 %1079  ;;  %v1366_v12 = vsel %vm1364_vm10, %v1333_v9, %v1078_v41  ;;  %v510_v60 = vrot.slane %v508_v48, 5  ;;  %v516_v62 = vrot.slane %v514_v10, 5 }
  0xa9   : > { %1023 = vrot.lane.b32.xlu0 %v2695_v50, %s2316_s4  ;;  %v479_v50 = vsel %vm2463_vm5, %v474_v42, %v478_v37  ;;  %v1399_v22 = vsel %vm1397_vm11, %v1366_v12, %v2721_v2  ;;  %v1368_v23 = vsel %vm1364_vm10, %v1335_v52, %v1080_v46  ;;  %v498_v2 = vrot.slane %v497_v17, 4  ;;  %v2877_v17 = vld [vmem:[%s2398_s27 + $0xa0] sm:$0xf] }
  0xaa   : > { %1025 = vrot.lane.b32.xlu1 %v2742_v1, %s2316_s4  ;;  %v2793_v14 = vcombine.low %v469_v56, %v479_v50  ;;  %v1401_v33 = vsel %vm1397_vm11, %v1368_v23, %v2745_v3  ;;  %v730_v37 = vrot.slane %v2751_v35, 5  ;;  %v493_v3 = vsel %vm2463_vm5, %v488_v29, %v492_v61 }
  0xab   : > { %v1148_v59 = vpop.permute.xlu0 %1147  ;;  %v1986_v35 = vrot.slane %v2748_v34, 9  ;;  %v518_v56 = vshrl.u32 %v2841_v43, 16  ;;  %v507_v50 = vrot.slane %v505_v21, 4  ;;  %v538_v29 = vshll.u32 %v2877_v17, 16 }
  0xac   : > { %v1150_v7 = vpop.permute.xlu1 %1149  ;;  %v1432_v24 = vsel %vm1430_vm12, %v1399_v22, %v1148_v59  ;;  %v732_v49 = vrot.slane %v730_v37, 4  ;;  %v737_v22 = vrot.slane %v2841_v43, 5 }
  0xad   : > { %1058 = vrot.lane.b32.xlu0 %v2706_v58, %s2314_s28  ;;  %v1434_v5 = vsel %vm1430_vm12, %v1401_v33, %v1150_v7  ;;  %v731_v34 = vsel %vm2420_vm4, %v1986_v35, %v730_v37  ;;  %v520_v7 = vrot.slane %v518_v56, 4  ;;  %v511_v12 = vor.u32 %v510_v60, %v507_v50 }
  0xae   : > { %1060 = vrot.lane.b32.xlu1 %v2772_v18, %s2314_s28  ;;  %v734_v59 = vsel %vm2420_vm4, %v732_v49, %v733_v44  ;;  %v740_v37 = vrot.slane %v197_v63, 5 }
  0xaf   : > { %v1183_v6 = vpop.permute.xlu0 %1182  ;;  %v2869_v9 = vcombine.low %v731_v34, %v734_v59  ;;  %v521_v52 = vor.u32 %v520_v7, %v516_v62  ;;  %v512_v19 = vrot.slane %v511_v12, 4 }
  0xb0   : > { %v1185_v20 = vpop.permute.xlu1 %1184  ;;  %v1465_v25 = vsel %vm1463_vm13, %v1432_v24, %v1183_v6  ;;  %v2874_v6 = vld [vmem:[%s2398_s27 + $0x9c] sm:$0xf] }
  0xb1   : > { %1093 = vrot.lane.b32.xlu0 %v2726_v11, %s2318_s20  ;;  %v1467_v38 = vsel %vm1463_vm13, %v1434_v5, %v1185_v20  ;;  %v526_v20 = vrot.slane %v524_v15, 5  ;;  %v522_v24 = vrot.slane %v521_v52, 4  ;;  %v517_v33 = vsel %vm2463_vm5, %v512_v19, %v516_v62 }
  0xb2   : > { %1095 = vrot.lane.b32.xlu1 %v2793_v14, %s2318_s20  ;;  %v739_v5 = vrot.slane %v737_v22, 4 }
  0xb3   : > { %v1218_v26 = vpop.permute.xlu0 %1217 }
  0xb4   : > { %v2813_v32 = vpop.permute.xlu1 %931  ;;  %v1498_v11 = vsel %vm1496_vm14, %v1465_v25, %v1218_v26  ;;  %v532_v25 = vshll.u32 %v2874_v6, 16  ;;  %v542_v26 = vshrl.u32 %v2877_v17, 16 }
  0xb5   : > { %1128 = vrot.lane.b32.xlu0 %v2742_v1, %s2315_s29  ;;  %2103 = vmatprep.mubr.msk.bf16.mxu0 %vm1565_vm15, %v1498_v11  ;;  %v503_v1 = vsel %vm2463_vm5, %v498_v2, %v502_v30  ;;  %v2892_v30 = vcombine.low %v2835_v40, %v2841_v43  ;;  %v1987_v11 = vrot.slane %v2835_v40, 9  ;;  %v1258_v40 = vsel %vm1249_vm7, %v2410_v4, %v2813_v32 }
  0xb6   : > { %1130 = vrot.lane.b32.xlu1 %v2810_v57, %s2315_s29  ;;  %v2850_v46 = vcombine.low %v493_v3, %v503_v1  ;;  %v527_v3 = vsel %vm2463_vm5, %v522_v24, %v526_v20  ;;  %v534_v1 = vrot.slane %v532_v25, 5  ;;  %v544_v43 = vrot.slane %v542_v26, 4  ;;  %v2958_v24 = vld [vmem:[%s2398_s27 + $0xa8] sm:$0xf] }
  0xb7   : > { %v1220_v39 = vpop.permute.xlu0 %1219  ;;  %v2912_v49 = vcombine.low %v517_v33, %v527_v3  ;;  %v738_v21 = vsel %vm2420_vm4, %v1987_v11, %v737_v22  ;;  %v741_v4 = vsel %vm2420_vm4, %v739_v5, %v740_v37  ;;  %v744_v20 = vrot.slane %v2877_v17, 5 }
  0xb8   : > { %v2837_v41 = vpop.permute.xlu1 %933  ;;  %v1500_v42 = vsel %vm1496_vm14, %v1467_v38, %v1220_v39  ;;  %v2932_v62 = vcombine.low %v738_v21, %v741_v4  ;;  %v553_v5 = vshrl.u32 %v2958_v24, 16  ;;  %v556_v37 = vshll.u32 %v2958_v24, 16 }
  0xb9   : > { %1163 = vrot.lane.b32.xlu0 %v2772_v18, %s2319_s23  ;;  %2104 = vmatmul.mubr.msk.bf16.vlgmr.msra.gmra.mrb[0].mxu0 %vm1565_vm15, %v1500_v42  ;;  %v540_v42 = vrot.slane %v538_v29, 5  ;;  %v1261_v50 = vsel %vm1249_vm7, %v2524_v47, %v2837_v41  ;;  %v2964_v29 = vld [vmem:[%s2398_s27 + $0xac] sm:$0xf]  ;;  %v746_v33 = vrot.slane %v744_v20, 4 }
  0xba   : > { %1165 = vrot.lane.b32.xlu1 %v2826_v36, %s2319_s23  ;;  %v562_v3 = vshll.u32 %v2964_v29, 16 }
  0xbb   : > { %v1012_v54 = vpop.permute.xlu0 %1011  ;;  %v545_v34 = vor.u32 %v544_v43, %v540_v42  ;;  %v558_v43 = vrot.slane %v556_v37, 5 }
  0xbc   : > { %v2856_v55 = vpop.permute.xlu1 %1013  ;;  %v1304_v44 = vsel %vm1298_vm8, %v1258_v40, %v1012_v54  ;;  %v203_v40 = vld [vmem:[%s2398_s27 + $0xb0] sm:$0x1] }
  0xbd   : > { %1198 = vrot.lane.b32.xlu0 %v2793_v14, %s2320_s24  ;;  %v572_v4 = vshll.u32 %v203_v40, 16 }
  0xbe   : > { %1200 = vrot.lane.b32.xlu1 %v2850_v46, %s2320_s24 }
  0xbf   : > { %v1047_v61 = vpop.permute.xlu0 %1046 }
  0xc0   : > { %v1049_v8 = vpop.permute.xlu1 %1048  ;;  %v1337_v56 = vsel %vm1331_vm9, %v1304_v44, %v1047_v61  ;;  %v1306_v61 = vsel %vm1298_vm8, %v1261_v50, %v2856_v55  ;;  %v564_v44 = vrot.slane %v562_v3, 5  ;;  %v3000_v50 = vld [vmem:[%s2398_s27 + $0xb8] sm:$0xf] }
  0xc1   : > { %1233 = vrot.lane.b32.xlu0 %v2810_v57, %s2321_s25  ;;  %v1339_v12 = vsel %vm1331_vm9, %v1306_v61, %v1049_v8  ;;  %v574_v61 = vrot.slane %v572_v4, 5 }
  0xc2   : > { %947 = vrot.lane.b32.xlu1 %v2793_v14, %s2317_s5  ;;  %v529_v14 = vshrl.u32 %v2874_v6, 16 }
  0xc3   : > { %v1082_v0 = vpop.permute.xlu0 %1081 }
  0xc4   : > { %v1084_v16 = vpop.permute.xlu1 %1083  ;;  %v531_v38 = vrot.slane %v529_v14, 4  ;;  %v1370_v54 = vsel %vm1364_vm10, %v1337_v56, %v1082_v0  ;;  %v546_v0 = vrot.slane %v545_v34, 4 }
  0xc5   : > { %1235 = vrot.lane.b32.xlu0 %v2869_v9, %s2321_s25 }
  0xc6   : > { %949 = vrot.lane.b32.xlu1 %v2850_v46, %s2317_s5  ;;  %v535_v32 = vor.u32 %v534_v1, %v531_v38 }
  0xc7   : > { %v1117_v23 = vpop.permute.xlu0 %1116 }
  0xc8   : > { %v1119_v2 = vpop.permute.xlu1 %1118  ;;  %v1403_v60 = vsel %vm1397_vm11, %v1370_v54, %v1117_v23  ;;  %v536_v15 = vrot.slane %v535_v32, 4  ;;  %v2997_v54 = vld [vmem:[%s2398_s27 + $0xb4] sm:$0xf] }
  0xc9   : > { %1027 = vrot.lane.b32.xlu0 %v2810_v57, %s2316_s4  ;;  %v2902_v57 = vld [vmem:[%s2398_s27 + $0xa4] sm:$0x1] }
  0xca   : > { %1029 = vrot.lane.b32.xlu1 %v2869_v9, %s2316_s4  ;;  %v548_v48 = vshll.u32 %v2902_v57, 16  ;;  %v541_v23 = vsel %vm2463_vm5, %v536_v15, %v540_v42  ;;  %v555_v42 = vrot.slane %v553_v5, 4  ;;  %v586_v15 = vshll.u32 %v3000_v50, 16 }
  0xcb   : > { %v1152_v39 = vpop.permute.xlu0 %1151 }
  0xcc   : > { %v1154_v35 = vpop.permute.xlu1 %1153  ;;  %v1436_v63 = vsel %vm1430_vm12, %v1403_v60, %v1152_v39  ;;  %v550_v7 = vrot.slane %v548_v48, 5  ;;  %v566_v39 = vshrl.u32 %v2964_v29, 16 }
  0xcd   : > { %1062 = vrot.lane.b32.xlu0 %v2826_v36, %s2314_s28 }
  0xce   : > { %1064 = vrot.lane.b32.xlu1 %v2892_v30, %s2314_s28  ;;  %v568_v21 = vrot.slane %v566_v39, 4 }
  0xcf   : > { %v1187_v10 = vpop.permute.xlu0 %1186 }
  0xd0   : > { %v1189_v59 = vpop.permute.xlu1 %1188  ;;  %v1469_v47 = vsel %vm1463_vm13, %v1436_v63, %v1187_v10  ;;  %v559_v10 = vor.u32 %v558_v43, %v555_v42  ;;  %v569_v34 = vor.u32 %v568_v21, %v564_v44  ;;  %v751_v63 = vrot.slane %v2964_v29, 5 }
  0xd1   : > { %1097 = vrot.lane.b32.xlu0 %v2850_v46, %s2318_s20  ;;  %v1372_v46 = vsel %vm1364_vm10, %v1339_v12, %v1084_v16  ;;  %v2949_v16 = vcombine.low %v2874_v6, %v2877_v17  ;;  %v1988_v17 = vrot.slane %v2874_v6, 9 }
  0xd2   : > { %1099 = vrot.lane.b32.xlu1 %v2912_v49, %s2318_s20  ;;  %v1405_v19 = vsel %vm1397_vm11, %v1372_v46, %v1119_v2  ;;  %v747_v2 = vrot.slane %v2902_v57, 5  ;;  %v560_v60 = vrot.slane %v559_v10, 4  ;;  %v570_v12 = vrot.slane %v569_v34, 4 }
  0xd3   : > { %v1222_v41 = vpop.permute.xlu0 %1221  ;;  %v1438_v8 = vsel %vm1430_vm12, %v1405_v19, %v1154_v35  ;;  %v745_v6 = vsel %vm2420_vm4, %v1988_v17, %v744_v20  ;;  %v3015_v46 = vcombine.low %v2958_v24, %v2964_v29  ;;  %v754_v20 = vrot.slane %v203_v40, 5 }
  0xd4   : > { %v2937_v52 = vpop.permute.xlu1 %935  ;;  %v1502_v55 = vsel %vm1496_vm14, %v1469_v47, %v1222_v41  ;;  %v1471_v22 = vsel %vm1463_vm13, %v1438_v8, %v1189_v59  ;;  %v748_v57 = vsel %vm2420_vm4, %v746_v33, %v747_v2  ;;  %v580_v47 = vshll.u32 %v2997_v54, 16 }
  0xd5   : > { %1132 = vrot.lane.b32.xlu0 %v2869_v9, %s2315_s29  ;;  %2107 = vmatprep.mubr.msk.bf16.mxu0 %vm1565_vm15, %v1502_v55  ;;  %v551_v9 = vsel %vm2463_vm5, %v546_v0, %v550_v7  ;;  %v2992_v56 = vcombine.low %v745_v6, %v748_v57  ;;  %v590_v41 = vshrl.u32 %v3000_v50, 16  ;;  %v1989_v55 = vrot.slane %v2958_v24, 9 }
  0xd6   : > { %1134 = vrot.lane.b32.xlu1 %v2932_v62, %s2315_s29  ;;  %v2973_v11 = vcombine.low %v541_v23, %v551_v9  ;;  %v565_v19 = vsel %vm2463_vm5, %v560_v60, %v564_v44  ;;  %v753_v8 = vrot.slane %v751_v63, 4  ;;  %v575_v23 = vsel %vm2463_vm5, %v570_v12, %v574_v61 }
  0xd7   : > { %v1224_v14 = vpop.permute.xlu0 %1223  ;;  %v582_v9 = vrot.slane %v580_v47, 5  ;;  %v592_v29 = vrot.slane %v590_v41, 4  ;;  %v1264_v24 = vsel %vm1249_vm7, %v2558_v27, %v2937_v52  ;;  %v3035_v33 = vcombine.low %v565_v19, %v575_v23 }
  0xd8   : > { %v2960_v25 = vpop.permute.xlu1 %937  ;;  %v1504_v26 = vsel %vm1496_vm14, %v1471_v22, %v1224_v14  ;;  %v752_v5 = vsel %vm2420_vm4, %v1989_v55, %v751_v63  ;;  %v755_v27 = vsel %vm2420_vm4, %v753_v8, %v754_v20  ;;  %v758_v63 = vrot.slane %v3000_v50, 5 }
  0xd9   : > { %1167 = vrot.lane.b32.xlu0 %v2892_v30, %s2319_s23  ;;  %2108 = vmatmul.mubr.msk.bf16.gmra.mrb[4].mxu0 %vm1565_vm15, %v1504_v26  ;;  %v588_v26 = vrot.slane %v586_v15, 5  ;;  %v1267_v42 = vsel %vm1249_vm7, %v2579_v45, %v2960_v25  ;;  %v3055_v44 = vcombine.low %v752_v5, %v755_v27  ;;  %v1990_v20 = vrot.slane %v2997_v54, 9 }
  0xda   : > { %1169 = vrot.lane.b32.xlu1 %v2949_v16, %s2319_s23 }
  0xdb   : > { %v1016_v38 = vpop.permute.xlu0 %1015  ;;  %v593_v6 = vor.u32 %v592_v29, %v588_v26 }
  0xdc   : > { %v2979_v1 = vpop.permute.xlu1 %1017  ;;  %v1308_v2 = vsel %vm1298_vm8, %v1264_v24, %v1016_v38 }
  0xdd   : > { %1202 = vrot.lane.b32.xlu0 %v2912_v49, %s2320_s24 }
  0xde   : > { %1204 = vrot.lane.b32.xlu1 %v2973_v11, %s2320_s24 }
  0xdf   : > { %v1051_v35 = vpop.permute.xlu0 %1050 }
  0xe0   : > { %v1053_v48 = vpop.permute.xlu1 %1052  ;;  %v1341_v39 = vsel %vm1331_vm9, %v1308_v2, %v1051_v35  ;;  %v1310_v35 = vsel %vm1298_vm8, %v1267_v42, %v2979_v1  ;;  %v209_v2 = vld [vmem:[%s2398_s27 + $0xc8] sm:$0x1] }
  0xe1   : > { %1237 = vrot.lane.b32.xlu0 %v2932_v62, %s2321_s25  ;;  %v1343_v10 = vsel %vm1331_vm9, %v1310_v35, %v1053_v48  ;;  %v3068_v48 = vld [vmem:[%s2398_s27 + $0xc0] sm:$0xf] }
  0xe2   : > { %951 = vrot.lane.b32.xlu1 %v2912_v49, %s2317_s5  ;;  %v577_v49 = vshrl.u32 %v2997_v54, 16  ;;  %v767_v55 = vshll.u32 %v3068_v48, 16 }
  0xe3   : > { %v1086_v32 = vpop.permute.xlu0 %1085 }
  0xe4   : > { %v1088_v59 = vpop.permute.xlu1 %1087  ;;  %v579_v22 = vrot.slane %v577_v49, 4  ;;  %v1374_v38 = vsel %vm1364_vm10, %v1341_v39, %v1086_v32  ;;  %v3079_v49 = vld [vmem:[%s2398_s27 + $0xc4] sm:$0xf]  ;;  %v769_v29 = vrot.slane %v767_v55, 5 }
  0xe5   : > { %1239 = vrot.lane.b32.xlu0 %v2992_v56, %s2321_s25  ;;  %v1376_v32 = vsel %vm1364_vm10, %v1343_v10, %v1088_v59  ;;  %v3075_v59 = vcombine.low %v2997_v54, %v3000_v50  ;;  %v777_v50 = vshrl.u32 %v3079_v49, 16  ;;  %v773_v19 = vshll.u32 %v3079_v49, 16 }
  0xe6   : > { %953 = vrot.lane.b32.xlu1 %v2973_v11, %s2317_s5  ;;  %v583_v52 = vor.u32 %v582_v9, %v579_v22  ;;  %v760_v22 = vrot.slane %v758_v63, 4  ;;  %v759_v54 = vsel %vm2420_vm4, %v1990_v20, %v758_v63 }
  0xe7   : > { %v1121_v7 = vpop.permute.xlu0 %1120  ;;  %v779_v24 = vrot.slane %v777_v50, 4 }
  0xe8   : > { %v1123_v0 = vpop.permute.xlu1 %1122  ;;  %v1407_v43 = vsel %vm1397_vm11, %v1374_v38, %v1121_v7  ;;  %v584_v4 = vrot.slane %v583_v52, 4  ;;  %v783_v52 = vshll.u32 %v209_v2, 16 }
  0xe9   : > { %1031 = vrot.lane.b32.xlu0 %v2932_v62, %s2316_s4  ;;  %v3025_v62 = vld [vmem:[%s2398_s27 + $0xbc] sm:$0x1]  ;;  %v1409_v60 = vsel %vm1397_vm11, %v1376_v32, %v1123_v0  ;;  %v764_v0 = vshrl.u32 %v3068_v48, 16  ;;  %v2041_v32 = vcombine.low %v3068_v48, %v3079_v49 }
  0xea   : > { %1033 = vrot.lane.b32.xlu1 %v2992_v56, %s2316_s4  ;;  %v596_v37 = vshll.u32 %v3025_v62, 16  ;;  %v589_v12 = vsel %vm2463_vm5, %v584_v4, %v588_v26 }
  0xeb   : > { %v1156_v14 = vpop.permute.xlu0 %1155  ;;  %v766_v26 = vrot.slane %v764_v0, 4  ;;  %v212_v0 = vld [vmem:[%s2398_s27 + $0xd4] sm:$0x1] }
  0xec   : > { %v1158_v17 = vpop.permute.xlu1 %1157  ;;  %v1440_v40 = vsel %vm1430_vm12, %v1407_v43, %v1156_v14  ;;  %v598_v21 = vrot.slane %v596_v37, 5  ;;  %v761_v14 = vrot.slane %v3025_v62, 5 }
  0xed   : > { %1066 = vrot.lane.b32.xlu0 %v2949_v16, %s2314_s28  ;;  %v1442_v61 = vsel %vm1430_vm12, %v1409_v60, %v1158_v17  ;;  %v775_v17 = vrot.slane %v773_v19, 5  ;;  %v770_v39 = vor.u32 %v769_v29, %v766_v26  ;;  %v817_v26 = vshll.u32 %v212_v0, 16 }
  0xee   : > { %1068 = vrot.lane.b32.xlu1 %v3015_v46, %s2314_s28  ;;  %v762_v62 = vsel %vm2420_vm4, %v760_v22, %v761_v14 }
  0xef   : > { %v1191_v3 = vpop.permute.xlu0 %1190  ;;  %v780_v27 = vor.u32 %v779_v24, %v775_v17  ;;  %v771_v43 = vrot.slane %v770_v39, 4 }
  0xf0   : > { %v1193_v57 = vpop.permute.xlu1 %1192  ;;  %v1473_v45 = vsel %vm1463_vm13, %v1440_v40, %v1191_v3  ;;  %v3117_v3 = vcombine.low %v759_v54, %v762_v62  ;;  %v785_v40 = vrot.slane %v783_v52, 5 }
  0xf1   : > { %1101 = vrot.lane.b32.xlu0 %v2973_v11, %s2318_s20  ;;  %v594_v11 = vrot.slane %v593_v6, 4  ;;  %v1475_v7 = vsel %vm1463_vm13, %v1442_v61, %v1193_v57  ;;  %v3122_v6 = vld [vmem:[%s2398_s27 + $0xcc] sm:$0xf]  ;;  %v3125_v57 = vld [vmem:[%s2398_s27 + $0xd0] sm:$0xf]  ;;  %v781_v35 = vrot.slane %v780_v27, 4 }
  0xf2   : > { %1103 = vrot.lane.b32.xlu1 %v3035_v33, %s2318_s20  ;;  %v801_v10 = vshll.u32 %v3122_v6, 16  ;;  %v1991_v61 = vrot.slane %v3068_v48, 9  ;;  %v819_v27 = vrot.slane %v817_v26, 5  ;;  %s146_s27 = sand.u32 1, %s2296_s10  }
  0xf3   : > { %v1226_v25 = vpop.permute.xlu0 %1225  ;;  %v599_v47 = vsel %vm2463_vm5, %v594_v11, %v598_v21  ;;  %v798_v21 = vshrl.u32 %v3122_v6, 16  ;;  %v786_v60 = vsel %vm2463_vm5, %v781_v35, %v785_v40  ;;  %s1886_s8 = scalar_lea.sflag [#allocation3], %s146_s27 }
  0xf4   : > { %v3060_v1 = vpop.permute.xlu1 %939  ;;  %v1506_v34 = vsel %vm1496_vm14, %v1473_v45, %v1226_v25  ;;  %v3098_v8 = vcombine.low %v589_v12, %v599_v47  ;;  %v811_v45 = vshrl.u32 %v3125_v57, 16  ;;  %v807_v25 = vshll.u32 %v3125_v57, 16 }
  0xf5   : > { %1136 = vrot.lane.b32.xlu0 %v2992_v56, %s2315_s29  ;;  %2111 = vmatprep.mubr.msk.bf16.mxu0 %vm1565_vm15, %v1506_v34  ;;  %v776_v34 = vsel %vm2463_vm5, %v771_v43, %v775_v17  ;;  %v800_v63 = vrot.slane %v798_v21, 4  ;;  %v795_v12 = vrot.slane %v209_v2, 5 }
  0xf6   : > { %1138 = vrot.lane.b32.xlu1 %v3055_v44, %s2315_s29  ;;  %v809_v47 = vrot.slane %v807_v25, 5  ;;  %v2042_v48 = vcombine.low %v776_v34, %v786_v60  ;;  %v829_v25 = vrot.slane %v212_v0, 5 }
  0xf7   : > { %v1228_v56 = vpop.permute.xlu0 %1227 }
  0xf8   : > { %v3086_v41 = vpop.permute.xlu1 %941  ;;  %v1508_v15 = vsel %vm1496_vm14, %v1475_v7, %v1228_v56  ;;  %v803_v7 = vrot.slane %v801_v10, 5 }
  0xf9   : > { %1171 = vrot.lane.b32.xlu0 %v3015_v46, %s2319_s23  ;;  %2112 = vmatmul.mubr.msk.bf16.gmra.mrb[8].mxu0 %vm1565_vm15, %v1508_v15  ;;  %v1273_v24 = vsel %vm1249_vm7, %v2643_v51, %v3086_v41 }
  0xfa   : > { %1173 = vrot.lane.b32.xlu1 %v3075_v59, %s2319_s23  ;;  %v804_v19 = vor.u32 %v803_v7, %v800_v63 }
  0xfb   : > { %v1020_v23 = vpop.permute.xlu0 %1019 }
  0xfc   : > { %v3102_v9 = vpop.permute.xlu1 %1021  ;;  %v805_v62 = vrot.slane %v804_v19, 4 }
  0xfd   : > { %1206 = vrot.lane.b32.xlu0 %v3035_v33, %s2320_s24  ;;  %v1314_v2 = vsel %vm1298_vm8, %v1273_v24, %v3102_v9 }
  0xfe   : > { %1208 = vrot.lane.b32.xlu1 %v3098_v8, %s2320_s24 }
  0xff   : > { %v1055_v5 = vpop.permute.xlu0 %1054 }
 0x100   : > { %v3113_v37 = vpop.permute.xlu1 %1056 }
 0x101   : > { %1241 = vrot.lane.b32.xlu0 %v3055_v44, %s2321_s25  ;;  %v1347_v52 = vsel %vm1331_vm9, %v1314_v2, %v3113_v37  ;;  %v2044_v37 = vcombine.low %v3122_v6, %v3125_v57 }
 0x102   : > { %955 = vrot.lane.b32.xlu1 %v3035_v33, %s2317_s5  ;;  %v792_v33 = vrot.slane %v3079_v49, 5  ;;  %v813_v49 = vrot.slane %v811_v45, 4 }
 0x103   : > { %v1090_v38 = vpop.permute.xlu0 %1089 }
 0x104   : > { %v1092_v42 = vpop.permute.xlu1 %1091  ;;  %v794_v56 = vrot.slane %v792_v33, 4  ;;  %v793_v50 = vsel %vm2420_vm4, %v1991_v61, %v792_v33  ;;  %v814_v14 = vor.u32 %v813_v49, %v809_v47 }
 0x105   : > { %1243 = vrot.lane.b32.xlu0 %v3117_v3, %s2321_s25 }
 0x106   : > { %957 = vrot.lane.b32.xlu1 %v3098_v8, %s2317_s5  ;;  %v796_v22 = vsel %vm2420_vm4, %v794_v56, %v795_v12  ;;  %v815_v39 = vrot.slane %v814_v14, 4 }
 0x107   : > { %v1125_v4 = vpop.permute.xlu0 %1124 }
 0x108   : > { %v1127_v11 = vpop.permute.xlu1 %1126  ;;  %v820_v21 = vsel %vm2463_vm5, %v815_v39, %v819_v27 }
 0x109   : > { %1035 = vrot.lane.b32.xlu0 %v3055_v44, %s2316_s4  ;;  %v1270_v44 = vsel %vm1249_vm7, %v2622_v28, %v3060_v1 }
 0x10a   : > { %1037 = vrot.lane.b32.xlu1 %v3117_v3, %s2316_s4  ;;  %v1312_v20 = vsel %vm1298_vm8, %v1270_v44, %v1020_v23  ;;  %v2043_v23 = vcombine.low %v793_v50, %v796_v22 }
 0x10b   : > { %v1160_v15 = vpop.permute.xlu0 %1159  ;;  %v1345_v29 = vsel %vm1331_vm9, %v1312_v20, %v1055_v5 }
 0x10c   : > { %v1162_v55 = vpop.permute.xlu1 %1161  ;;  %v1378_v1 = vsel %vm1364_vm10, %v1345_v29, %v1090_v38  ;;  %v826_v38 = vrot.slane %v3125_v57, 5 }
 0x10d   : > { %1070 = vrot.lane.b32.xlu0 %v3075_v59, %s2314_s28  ;;  %v1411_v54 = vsel %vm1397_vm11, %v1378_v1, %v1125_v4 }
 0x10e   : > { %1072 = vrot.lane.b32.xlu1 %v2041_v32, %s2314_s28  ;;  %v1444_v5 = vsel %vm1430_vm12, %v1411_v54, %v1160_v15  ;;  %v828_v45 = vrot.slane %v826_v38, 4  ;;  %s1973_s28 = sshll.u32 %s146_s27, 3 }
 0x10f   : > { %v1195_v28 = vpop.permute.xlu0 %1194  ;;  %s148_s3 = scalar_lea.vmem [#allocation2], %s1973_s28 }
 0x110   : > { %v1197_v17 = vpop.permute.xlu1 %1196  ;;  %v1477_v51 = vsel %vm1463_vm13, %v1444_v5, %v1195_v28  ;;  %v830_v60 = vsel %vm2420_vm4, %v828_v45, %v829_v25  ;;  %s1899_s4 = sshll.u32 %s148_s3, 4  ;;  %s3290_s4 = int_to_ptr.vmem [resolvable:$true] %s1899_s4 }
 0x111   : > { %1105 = vrot.lane.b32.xlu0 %v3098_v8, %s2318_s20  ;;  %v1380_v8 = vsel %vm1364_vm10, %v1347_v52, %v1092_v42  ;;  %v810_v42 = vsel %vm2463_vm5, %v805_v62, %v809_v47  ;;  %s2234_s15 = scalar_lea.vmem %s3290_s4, 128 }
 0x112   : > { %1107 = vrot.lane.b32.xlu1 %v2042_v48, %s2318_s20  ;;  %v1413_v9 = vsel %vm1397_vm11, %v1380_v8, %v1127_v11  ;;  %v2045_v57 = vcombine.low %v810_v42, %v820_v21  ;;  %p2235_p12 = scmp.ne.s32.totalorder %s3290_s4, %s2234_s15 }
 0x113   : > { %v1230_v41 = vpop.permute.xlu0 %1229  ;;  %v1446_v40 = vsel %vm1430_vm12, %v1413_v9, %v1162_v55 }
 0x114   : > { %v944_v43 = vpop.permute.xlu1 %943  ;;  %v1510_v35 = vsel %vm1496_vm14, %v1477_v51, %v1230_v41  ;;  %v1479_v10 = vsel %vm1463_vm13, %v1446_v40, %v1197_v17  ;;  %p2236_p13 = pnand %p2235_p12, %p2378_p4 }
 0x115   : > { %1140 = vrot.lane.b32.xlu0 %v3117_v3, %s2315_s29  ;;  %2115 = vmatprep.mubr.msk.bf16.mxu0 %vm1565_vm15, %v1510_v35  ;;  %v1992_v3 = vrot.slane %v3122_v6, 9  ;;  %v1276_v13 = vsel %vm1249_vm7, %v2677_v31, %v944_v43 }
 0x116   : > { %1142 = vrot.lane.b32.xlu1 %v2043_v23, %s2315_s29  ;;  %s2069_s29 = sshll.u32 %s2304_s12, 7  ;;  %p2237_p0 = pneg %p2236_p13 }
 0x117   : > { %v1232_v33 = vpop.permute.xlu0 %1231  ;;  %v827_v53 = vsel %vm2420_vm4, %v1992_v3, %v826_v38  ;;  %s3288_s7 = scalar_lea.hbm %s3337_s2, %s2069_s29  ;;  %s2322_s12 = smov [#allocation2]  }
 0x118   : > { %v946_v4 = vpop.permute.xlu1 %945  ;;  %v1512_v11 = vsel %vm1496_vm14, %v1479_v10, %v1232_v33  ;;  %v2046_v61 = vcombine.low %v827_v53, %v830_v60  ;;  %s2238_s16 = sshll.u32 %s2322_s12, 4  ;;  %s2239_s16 = int_to_ptr.vmem [resolvable:$false] %s2238_s16 }
 0x119   : > { %1175 = vrot.lane.b32.xlu0 %v2041_v32, %s2319_s23  ;;  %2116 = vmatmul.mubr.msk.bf16.gmra.mrb[12].mxu0 %vm1565_vm15, %v1512_v11  ;;  %v1279_v19 = vsel %vm1249_vm7, %v2706_v58, %v946_v4  ;;  %s2240_s18 = scalar_lea.vmem %s2239_s16, 256  ;;  %p2241_p1 = scmp.lt.s32.totalorder %s3290_s4, %s2239_s16 }
 0x11a   : > { %1177 = vrot.lane.b32.xlu1 %v2044_v37, %s2319_s23  ;;  %p2242_p2 = scmp.lt.s32.totalorder %s2240_s18, %s2234_s15 }
 0x11b   : > { %v1024_v34 = vpop.permute.xlu0 %1023 }
 0x11c   : > { %v1026_v6 = vpop.permute.xlu1 %1025  ;;  %v1316_v0 = vsel %vm1298_vm8, %v1276_v13, %v1024_v34  ;;  %p2243_p3 = por %p2242_p2, %p2241_p1 }
 0x11d   : > { %1210 = vrot.lane.b32.xlu0 %v2042_v48, %s2320_s24  ;;  %v1318_v22 = vsel %vm1298_vm8, %v1279_v19, %v1026_v6 }
 0x11e   : > { %1212 = vrot.lane.b32.xlu1 %v2045_v57, %s2320_s24  ;;  %p2244_p5 = pnand %p2243_p3, %p2237_p0 }
 0x11f   : > { %v1059_v63 = vpop.permute.xlu0 %1058 }
 0x120   : > { %v1061_v32 = vpop.permute.xlu1 %1060  ;;  %v1349_v55 = vsel %vm1331_vm9, %v1316_v0, %v1059_v63 }
 0x121   : > { %1245 = vrot.lane.b32.xlu0 %v2043_v23, %s2321_s25  ;;  %v1351_v26 = vsel %vm1331_vm9, %v1318_v22, %v1061_v32 }
 0x122   : > { %1247 = vrot.lane.b32.xlu1 %v2046_v61, %s2321_s25 }
 0x123   : > { %v1094_v7 = vpop.permute.xlu0 %1093 }
 0x124   : > { %v1096_v56 = vpop.permute.xlu1 %1095  ;;  %v1382_v48 = vsel %vm1364_vm10, %v1349_v55, %v1094_v7 }
 0x125   : > { %v1384_v28 = vsel %vm1364_vm10, %v1351_v26, %v1096_v56 }
 0x127   : > { %v1129_v12 = vpop.permute.xlu0 %1128 }
 0x128   : > { %v1131_v47 = vpop.permute.xlu1 %1130  ;;  %v1415_v20 = vsel %vm1397_vm11, %v1382_v48, %v1129_v12 }
 0x129   : > { %v1417_v24 = vsel %vm1397_vm11, %v1384_v28, %v1131_v47 }
 0x12b   : > { %v1164_v49 = vpop.permute.xlu0 %1163 }
 0x12c   : > { %v1166_v15 = vpop.permute.xlu1 %1165  ;;  %v1448_v14 = vsel %vm1430_vm12, %v1415_v20, %v1164_v49 }
 0x12d   : > { %v1450_v58 = vsel %vm1430_vm12, %v1417_v24, %v1166_v15 }
 0x12f   : > { %v1199_v44 = vpop.permute.xlu0 %1198 }
 0x130   : > { %v1201_v50 = vpop.permute.xlu1 %1200  ;;  %v1481_v31 = vsel %vm1463_vm13, %v1448_v14, %v1199_v44 }
 0x131   : > { %v1483_v54 = vsel %vm1463_vm13, %v1450_v58, %v1201_v50 }
 0x133   : > { %v1234_v29 = vpop.permute.xlu0 %1233 }
 0x134   : > { %v948_v1 = vpop.permute.xlu1 %947  ;;  %v1514_v17 = vsel %vm1496_vm14, %v1481_v31, %v1234_v29 }
 0x135   : > { %2119 = vmatprep.mubr.msk.bf16.mxu1 %vm1565_vm15, %v1514_v17  ;;  %v1282_v9 = vsel %vm1249_vm7, %v2772_v18, %v948_v1 }
 0x137   : > { %v1236_v23 = vpop.permute.xlu0 %1235 }
 0x138   : > { %v950_v62 = vpop.permute.xlu1 %949  ;;  %v1516_v2 = vsel %vm1496_vm14, %v1483_v54, %v1236_v23 }
 0x139   : > { %2120 = vmatmul.mubr.msk.bf16.vlgmr.msra.gmra.mrb[0].mxu1 %vm1565_vm15, %v1516_v2  ;;  %v1285_v33 = vsel %vm1249_vm7, %v2826_v36, %v950_v62 }
 0x13b   : > { %v1028_v5 = vpop.permute.xlu0 %1027 }
 0x13c   : > { %v1030_v39 = vpop.permute.xlu1 %1029  ;;  %v1320_v40 = vsel %vm1298_vm8, %v1282_v9, %v1028_v5 }
 0x13d   : > { %v1322_v45 = vsel %vm1298_vm8, %v1285_v33, %v1030_v39 }
 0x13f   : > { %v1063_v27 = vpop.permute.xlu0 %1062 }
 0x140   : > { %v1065_v52 = vpop.permute.xlu1 %1064  ;;  %v1353_v37 = vsel %vm1331_vm9, %v1320_v40, %v1063_v27 }
 0x141   : > { %v1355_v4 = vsel %vm1331_vm9, %v1322_v45, %v1065_v52 }
 0x143   : > { %v1098_v51 = vpop.permute.xlu0 %1097 }
 0x144   : > { %v1100_v41 = vpop.permute.xlu1 %1099  ;;  %v1386_v21 = vsel %vm1364_vm10, %v1353_v37, %v1098_v51 }
 0x145   : > { %v1388_v57 = vsel %vm1364_vm10, %v1355_v4, %v1100_v41 }
 0x147   : > { %v1133_v38 = vpop.permute.xlu0 %1132 }
 0x148   : > { %v1135_v8 = vpop.permute.xlu1 %1134  ;;  %v1419_v3 = vsel %vm1397_vm11, %v1386_v21, %v1133_v38 }
 0x149   : > { %v1421_v60 = vsel %vm1397_vm11, %v1388_v57, %v1135_v8 }
 0x14b   : > { %v1168_v43 = vpop.permute.xlu0 %1167 }
 0x14c   : > { %v1170_v35 = vpop.permute.xlu1 %1169  ;;  %v1452_v25 = vsel %vm1430_vm12, %v1419_v3, %v1168_v43 }
 0x14d   : > { %v1454_v36 = vsel %vm1430_vm12, %v1421_v60, %v1170_v35 }
 0x14f   : > { %v1203_v42 = vpop.permute.xlu0 %1202 }
 0x150   : > { %v1205_v10 = vpop.permute.xlu1 %1204  ;;  %v1485_v18 = vsel %vm1463_vm13, %v1452_v25, %v1203_v42 }
 0x151   : > { %v1487_v6 = vsel %vm1463_vm13, %v1454_v36, %v1205_v10 }
 0x153   : > { %v1238_v11 = vpop.permute.xlu0 %1237 }
 0x154   : > { %v952_v34 = vpop.permute.xlu1 %951  ;;  %v1518_v53 = vsel %vm1496_vm14, %v1485_v18, %v1238_v11 }
 0x155   : > { %2123 = vmatprep.mubr.msk.bf16.mxu1 %vm1565_vm15, %v1518_v53  ;;  %v1288_v48 = vsel %vm1249_vm7, %v2892_v30, %v952_v34 }
 0x157   : > { %v1240_v61 = vpop.permute.xlu0 %1239 }
 0x158   : > { %v954_v63 = vpop.permute.xlu1 %953  ;;  %v1520_v32 = vsel %vm1496_vm14, %v1487_v6, %v1240_v61 }
 0x159   : > { %2124 = vmatmul.mubr.msk.bf16.gmra.mrb[4].mxu1 %vm1565_vm15, %v1520_v32  ;;  %v1291_v26 = vsel %vm1249_vm7, %v2949_v16, %v954_v63 }
 0x15b   : > { %v1032_v7 = vpop.permute.xlu0 %1031 }
 0x15c   : > { %v1034_v56 = vpop.permute.xlu1 %1033  ;;  %v1324_v50 = vsel %vm1298_vm8, %v1288_v48, %v1032_v7 }
 0x15d   : > { %v1326_v29 = vsel %vm1298_vm8, %v1291_v26, %v1034_v56 }
 0x15f   : > { %v1067_v12 = vpop.permute.xlu0 %1066 }
 0x160   : > { %v1069_v47 = vpop.permute.xlu1 %1068  ;;  %v1357_v19 = vsel %vm1331_vm9, %v1324_v50, %v1067_v12 }
 0x161   : > { %v1359_v1 = vsel %vm1331_vm9, %v1326_v29, %v1069_v47 }
 0x163   : > { %v1102_v49 = vpop.permute.xlu0 %1101 }
 0x164   : > { %v1104_v15 = vpop.permute.xlu1 %1103  ;;  %v1390_v22 = vsel %vm1364_vm10, %v1357_v19, %v1102_v49 }
 0x165   : > { %v1392_v24 = vsel %vm1364_vm10, %v1359_v1, %v1104_v15 }
 0x167   : > { %v1137_v13 = vpop.permute.xlu0 %1136 }
 0x168   : > { %v1139_v0 = vpop.permute.xlu1 %1138  ;;  %v1423_v31 = vsel %vm1397_vm11, %v1390_v22, %v1137_v13 }
 0x169   : > { %v1425_v23 = vsel %vm1397_vm11, %v1392_v24, %v1139_v0 }
 0x16b   : > { %v1172_v55 = vpop.permute.xlu0 %1171 }
 0x16c   : > { %v1174_v44 = vpop.permute.xlu1 %1173  ;;  %v1456_v28 = vsel %vm1430_vm12, %v1423_v31, %v1172_v55 }
 0x16d   : > { %v1458_v16 = vsel %vm1430_vm12, %v1425_v23, %v1174_v44 }
 0x16f   : > { %v1207_v20 = vpop.permute.xlu0 %1206 }
 0x170   : > { %v1209_v14 = vpop.permute.xlu1 %1208  ;;  %v1489_v30 = vsel %vm1463_vm13, %v1456_v28, %v1207_v20 }
 0x171   : > { %v1491_v62 = vsel %vm1463_vm13, %v1458_v16, %v1209_v14 }
 0x173   : > { %v1242_v17 = vpop.permute.xlu0 %1241 }
 0x174   : > { %v956_v58 = vpop.permute.xlu1 %955  ;;  %v1522_v54 = vsel %vm1496_vm14, %v1489_v30, %v1242_v17 }
 0x175   : > { %2127 = vmatprep.mubr.msk.bf16.mxu1 %vm1565_vm15, %v1522_v54  ;;  %v1294_v40 = vsel %vm1249_vm7, %v3015_v46, %v956_v58 }
 0x177   : > { %v1244_v2 = vpop.permute.xlu0 %1243 }
 0x178   : > { %v958_v5 = vpop.permute.xlu1 %957  ;;  %v1524_v39 = vsel %vm1496_vm14, %v1491_v62, %v1244_v2 }
 0x179   : > { %2128 = vmatmul.mubr.msk.bf16.gmra.mrb[8].mxu1 %vm1565_vm15, %v1524_v39  ;;  %v1297_v21 = vsel %vm1249_vm7, %v3075_v59, %v958_v5 }
 0x17b   : > { %v1036_v27 = vpop.permute.xlu0 %1035 }
 0x17c   : > { %v1038_v52 = vpop.permute.xlu1 %1037  ;;  %v1328_v10 = vsel %vm1298_vm8, %v1294_v40, %v1036_v27 }
 0x17d   : > { %v1330_v3 = vsel %vm1298_vm8, %v1297_v21, %v1038_v52 }
 0x17f   : > { %v1071_v51 = vpop.permute.xlu0 %1070 }
 0x180   : > { %v1073_v41 = vpop.permute.xlu1 %1072  ;;  %v1361_v45 = vsel %vm1331_vm9, %v1328_v10, %v1071_v51 }
 0x181   : > { %v1363_v4 = vsel %vm1331_vm9, %v1330_v3, %v1073_v41 }
 0x183   : > { %v1106_v38 = vpop.permute.xlu0 %1105 }
 0x184   : > { %v1108_v8 = vpop.permute.xlu1 %1107  ;;  %v1394_v18 = vsel %vm1364_vm10, %v1361_v45, %v1106_v38 }
 0x185   : > { %v1396_v46 = vsel %vm1364_vm10, %v1363_v4, %v1108_v8 }
 0x187   : > { %v1141_v43 = vpop.permute.xlu0 %1140 }
 0x188   : > { %v1143_v35 = vpop.permute.xlu1 %1142  ;;  %v1427_v6 = vsel %vm1397_vm11, %v1394_v18, %v1141_v43 }
 0x189   : > { %v1429_v36 = vsel %vm1397_vm11, %v1396_v46, %v1143_v35 }
 0x18b   : > { %v1176_v9 = vpop.permute.xlu0 %1175 }
 0x18c   : > { %v1178_v37 = vpop.permute.xlu1 %1177  ;;  %v2105_v42 = vpop.f32.mrb[0].mxu0  ;;  %v1460_v61 = vsel %vm1430_vm12, %v1427_v6, %v1176_v9 }
 0x18d   : > { %v1636_v33 = vpop.f32.mrb[1].mxu0  ;;  %v1802_v63 = vmul.f32 %v2105_v42, %v2105_v42  ;;  %v1462_v56 = vsel %vm1430_vm12, %v1429_v36, %v1178_v37 }
 0x18e   : > { %v2106_v25 = vpop.f32.mrb[2].mxu0  ;;  %v1800_v34 = vmul.f32 %v1636_v33, %v1636_v33 }
 0x18f   : > { %v1639_v11 = vpop.f32.mrb[3].mxu0  ;;  %v1211_v57 = vpop.permute.xlu0 %1210  ;;  %v1803_v12 = vmul.f32 %v2106_v25, %v2106_v25 }
 0x190   : > { %v1213_v53 = vpop.permute.xlu1 %1212  ;;  %v1763_v60 = vadd.f32 %v1639_v11, %v1636_v33  ;;  %v1801_v59 = vmul.f32 %v1639_v11, %v1639_v11  ;;  %v1493_v47 = vsel %vm1463_vm13, %v1460_v61, %v1211_v57 }
 0x191   : > { %v1495_v15 = vsel %vm1463_vm13, %v1462_v56, %v1213_v53 }
 0x192   : > { %v1764_v32 = vadd.f32 %v2105_v42, %v1763_v60  ;;  %v1832_v7 = vadd.f32 %v1801_v59, %v1800_v34 }
 0x193   : > { %v1246_v49 = vpop.permute.xlu0 %1245 }
 0x194   : > { %v1833_v13 = vadd.f32 %v1832_v7, %v1802_v63  ;;  %v1248_v0 = vpop.permute.xlu1 %1247  ;;  %v1526_v55 = vsel %vm1496_vm14, %v1493_v47, %v1246_v49  ;;  %v1765_v44 = vadd.f32 %v2106_v25, %v1764_v32 }
 0x195   : > { %v1528_v48 = vsel %vm1496_vm14, %v1495_v15, %v1248_v0  ;;  %2131 = vmatprep.mubr.msk.bf16.mxu1 %vm1565_vm15, %v1526_v55 }
 0x196   : > { %2132 = vmatmul.mubr.msk.bf16.gmra.mrb[12].mxu1 %vm1565_vm15, %v1528_v48  ;;  %v1834_v50 = vadd.f32 %v1833_v13, %v1803_v12 }
 0x1ac   : > { %v2109_v19 = vpop.f32.mrb[4].mxu0 }
 0x1ad   : > { %v1652_v20 = vpop.f32.mrb[5].mxu0  ;;  %v1806_v30 = vmul.f32 %v2109_v19, %v2109_v19 }
 0x1ae   : > { %v1766_v22 = vadd.f32 %v1765_v44, %v1652_v20  ;;  %v1804_v14 = vmul.f32 %v1652_v20, %v1652_v20  ;;  %v2110_v26 = vpop.f32.mrb[6].mxu0 }
 0x1af   : > { %v1655_v31 = vpop.f32.mrb[7].mxu0  ;;  %v1807_v58 = vmul.f32 %v2110_v26, %v2110_v26 }
 0x1b0   : > { %v1835_v29 = vadd.f32 %v1834_v50, %v1804_v14  ;;  %v1767_v28 = vadd.f32 %v1766_v22, %v1655_v31  ;;  %v1805_v1 = vmul.f32 %v1655_v31, %v1655_v31 }
 0x1b2   : > { %v1768_v17 = vadd.f32 %v2109_v19, %v1767_v28  ;;  %v1836_v24 = vadd.f32 %v1835_v29, %v1805_v1 }
 0x1b4   : > { %v1837_v54 = vadd.f32 %v1836_v24, %v1806_v30  ;;  %v1769_v23 = vadd.f32 %v2110_v26, %v1768_v17 }
 0x1b6   : > { %v1838_v16 = vadd.f32 %v1837_v54, %v1807_v58 }
 0x1cc   : > { %v2113_v62 = vpop.f32.mrb[8].mxu0 }
 0x1cd   : > { %v1668_v2 = vpop.f32.mrb[9].mxu0  ;;  %v1810_v8 = vmul.f32 %v2113_v62, %v2113_v62 }
 0x1ce   : > { %v1770_v5 = vadd.f32 %v1769_v23, %v1668_v2  ;;  %v1808_v39 = vmul.f32 %v1668_v2, %v1668_v2  ;;  %v2114_v27 = vpop.f32.mrb[10].mxu0 }
 0x1cf   : > { %v1671_v52 = vpop.f32.mrb[11].mxu0  ;;  %v1811_v9 = vmul.f32 %v2114_v27, %v2114_v27 }
 0x1d0   : > { %v1839_v51 = vadd.f32 %v1838_v16, %v1808_v39  ;;  %v1771_v41 = vadd.f32 %v1770_v5, %v1671_v52  ;;  %v1809_v38 = vmul.f32 %v1671_v52, %v1671_v52 }
 0x1d2   : > { %v1772_v43 = vadd.f32 %v2113_v62, %v1771_v41  ;;  %v1840_v35 = vadd.f32 %v1839_v51, %v1809_v38 }
 0x1d4   : > { %v1841_v40 = vadd.f32 %v1840_v35, %v1810_v8  ;;  %v1773_v37 = vadd.f32 %v2114_v27, %v1772_v43 }
 0x1d6   : > { %v1842_v42 = vadd.f32 %v1841_v40, %v1811_v9 }
 0x1ec   : > { %v2117_v21 = vpop.f32.mrb[12].mxu0 }
 0x1ed   : > { %v1684_v10 = vpop.f32.mrb[13].mxu0  ;;  %v1814_v57 = vmul.f32 %v2117_v21, %v2117_v21 }
 0x1ee   : > { %v1774_v33 = vadd.f32 %v1773_v37, %v1684_v10  ;;  %v1812_v3 = vmul.f32 %v1684_v10, %v1684_v10  ;;  %v2118_v45 = vpop.f32.mrb[14].mxu0 }
 0x1ef   : > { %v1687_v25 = vpop.f32.mrb[15].mxu0  ;;  %v1815_v53 = vmul.f32 %v2118_v45, %v2118_v45 }
 0x1f0   : > { %v1843_v4 = vadd.f32 %v1842_v42, %v1812_v3  ;;  %v1775_v18 = vadd.f32 %v1774_v33, %v1687_v25  ;;  %v1813_v11 = vmul.f32 %v1687_v25, %v1687_v25 }
 0x1f2   : > { %v1776_v46 = vadd.f32 %v2117_v21, %v1775_v18  ;;  %v1844_v34 = vadd.f32 %v1843_v4, %v1813_v11 }
 0x1f4   : > { %v1845_v60 = vadd.f32 %v1844_v34, %v1814_v57  ;;  %v1777_v59 = vadd.f32 %v2118_v45, %v1776_v46 }
 0x1f6   : > { %v1846_v36 = vadd.f32 %v1845_v60, %v1815_v53 }
 0x20c   : > { %v2121_v6 = vpop.f32.mrb[0].mxu1 }
 0x20d   : > { %v1700_v61 = vpop.f32.mrb[1].mxu1  ;;  %v1818_v15 = vmul.f32 %v2121_v6, %v2121_v6 }
 0x20e   : > { %v1778_v63 = vadd.f32 %v1777_v59, %v1700_v61  ;;  %v1816_v32 = vmul.f32 %v1700_v61, %v1700_v61  ;;  %v2122_v7 = vpop.f32.mrb[2].mxu1 }
 0x20f   : > { %v1703_v56 = vpop.f32.mrb[3].mxu1  ;;  %v1819_v55 = vmul.f32 %v2122_v7, %v2122_v7 }
 0x210   : > { %v1847_v12 = vadd.f32 %v1846_v36, %v1816_v32  ;;  %v1779_v47 = vadd.f32 %v1778_v63, %v1703_v56  ;;  %v1817_v49 = vmul.f32 %v1703_v56, %v1703_v56 }
 0x212   : > { %v1780_v13 = vadd.f32 %v2121_v6, %v1779_v47  ;;  %v1848_v0 = vadd.f32 %v1847_v12, %v1817_v49 }
 0x214   : > { %v1849_v44 = vadd.f32 %v1848_v0, %v1818_v15  ;;  %v1781_v48 = vadd.f32 %v2122_v7, %v1780_v13 }
 0x216   : > { %v1850_v50 = vadd.f32 %v1849_v44, %v1819_v55 }
 0x22c   : > { %v2125_v19 = vpop.f32.mrb[4].mxu1 }
 0x22d   : > { %v1716_v20 = vpop.f32.mrb[5].mxu1  ;;  %v1822_v30 = vmul.f32 %v2125_v19, %v2125_v19 }
 0x22e   : > { %v1782_v22 = vadd.f32 %v1781_v48, %v1716_v20  ;;  %v1820_v14 = vmul.f32 %v1716_v20, %v1716_v20  ;;  %v2126_v26 = vpop.f32.mrb[6].mxu1 }
 0x22f   : > { %v1719_v31 = vpop.f32.mrb[7].mxu1  ;;  %v1823_v58 = vmul.f32 %v2126_v26, %v2126_v26 }
 0x230   : > { %v1851_v29 = vadd.f32 %v1850_v50, %v1820_v14  ;;  %v1783_v28 = vadd.f32 %v1782_v22, %v1719_v31  ;;  %v1821_v1 = vmul.f32 %v1719_v31, %v1719_v31 }
 0x232   : > { %v1784_v17 = vadd.f32 %v2125_v19, %v1783_v28  ;;  %v1852_v24 = vadd.f32 %v1851_v29, %v1821_v1 }
 0x234   : > { %v1853_v54 = vadd.f32 %v1852_v24, %v1822_v30  ;;  %v1785_v23 = vadd.f32 %v2126_v26, %v1784_v17 }
 0x236   : > { %v1854_v16 = vadd.f32 %v1853_v54, %v1823_v58 }
 0x24c   : > { %v2129_v62 = vpop.f32.mrb[8].mxu1 }
 0x24d   : > { %v1732_v2 = vpop.f32.mrb[9].mxu1  ;;  %v1826_v8 = vmul.f32 %v2129_v62, %v2129_v62 }
 0x24e   : > { %v1786_v5 = vadd.f32 %v1785_v23, %v1732_v2  ;;  %v1824_v39 = vmul.f32 %v1732_v2, %v1732_v2  ;;  %v2130_v27 = vpop.f32.mrb[10].mxu1 }
 0x24f   : > { %v1735_v52 = vpop.f32.mrb[11].mxu1  ;;  %v1827_v9 = vmul.f32 %v2130_v27, %v2130_v27 }
 0x250   : > { %v1855_v51 = vadd.f32 %v1854_v16, %v1824_v39  ;;  %v1787_v41 = vadd.f32 %v1786_v5, %v1735_v52  ;;  %v1825_v38 = vmul.f32 %v1735_v52, %v1735_v52 }
 0x252   : > { %v1788_v43 = vadd.f32 %v2129_v62, %v1787_v41  ;;  %v1856_v35 = vadd.f32 %v1855_v51, %v1825_v38 }
 0x254   : > { %v1857_v40 = vadd.f32 %v1856_v35, %v1826_v8  ;;  %v1789_v37 = vadd.f32 %v2130_v27, %v1788_v43 }
 0x256   : > { %v1858_v42 = vadd.f32 %v1857_v40, %v1827_v9 }
 0x269   : > { %v2133_v21 = vpop.f32.mrb[12].mxu1 }
 0x26a   : > { %v1748_v10 = vpop.f32.mrb[13].mxu1  ;;  %v1830_v57 = vmul.f32 %v2133_v21, %v2133_v21 }
 0x26b   : > { %v1790_v33 = vadd.f32 %v1789_v37, %v1748_v10  ;;  %v1828_v3 = vmul.f32 %v1748_v10, %v1748_v10  ;;  %v2134_v45 = vpop.f32.mrb[14].mxu1 }
 0x26c   : > { %v1751_v25 = vpop.f32.mrb[15].mxu1  ;;  %v1831_v53 = vmul.f32 %v2134_v45, %v2134_v45 }
 0x26d   : > { %v1859_v4 = vadd.f32 %v1858_v42, %v1828_v3  ;;  %v1791_v18 = vadd.f32 %v1790_v33, %v1751_v25  ;;  %v1829_v11 = vmul.f32 %v1751_v25, %v1751_v25 }
 0x26f   : > { %v1792_v46 = vadd.f32 %v2133_v21, %v1791_v18  ;;  %v1860_v34 = vadd.f32 %v1859_v4, %v1829_v11 }
 0x271   : > { %v1793_v60 = vadd.f32 %v2134_v45, %v1792_v46  ;;  %v1861_v59 = vadd.f32 %v1860_v34, %v1830_v57 }
 0x273   : > { %v1794_v36 = vrot.slane %v1793_v60, 4  ;;  %v1862_v6 = vadd.f32 %v1861_v59, %v1831_v53 }
 0x275   : > { %v1795_v61 = vadd.f32 %v1794_v36, %v1793_v60  ;;  %v1863_v63 = vrot.slane %v1862_v6, 4 }
 0x277   : > { %v1796_v32 = vrot.slane %v1795_v61, 2  ;;  %v1864_v7 = vadd.f32 %v1863_v63, %v1862_v6 }
 0x279   : > { %v1797_v56 = vadd.f32 %v1796_v32, %v1795_v61  ;;  %v1865_v12 = vrot.slane %v1864_v7, 2 }
 0x27b   : > { %v1798_v47 = vrot.slane %v1797_v56, 1  ;;  %v1866_v49 = vadd.f32 %v1865_v12, %v1864_v7 }
 0x27d   : > { %v1799_v15 = vadd.f32 %v1798_v47, %v1797_v56  ;;  %v1867_v13 = vrot.slane %v1866_v49, 1 }
 0x27f   : > { %v1868_v0 = vadd.f32 %v1867_v13, %v1866_v49  ;;  %1873 = vst [vmem:[%s148_s3] sm:$0x1] %v1799_v15 }
 0x281   : > { %1874 = vst [vmem:[%s148_s3 + $0x1] sm:$0x1] %v1868_v0 }
 0x282   : > { %2247 = shalt.err (!%p2244_p5)
}
 0x283   : > { %s2248_s20 = scalar_lea.hbm %s3288_s7, 128  ;;  %s2252_s25 = scalar_lea.hbm %s3337_s2, 256 }
 0x284   : > { %p2249_p6 = scmp.ne.s32.totalorder %s3288_s7, %s2248_s20  ;;  %p2253_p10 = scmp.lt.u32.totalorder %s3288_s7, %s3337_s2 }
 0x285   : > { %p2254_p11 = scmp.lt.u32.totalorder %s2252_s25, %s2248_s20  ;;  %p2256_p13 = scmp.lt.u32.totalorder %s2248_s20, %s3288_s7 }
 0x286   : > { %p2250_p7 = pnand %p2249_p6, %p2378_p4 }
 0x287   : > { %p2255_p12 = por %p2254_p11, %p2253_p10 }
 0x288   : > { %p2251_p9 = pneg %p2250_p7 }
 0x289   : > { %p2257_p0 = por %p2256_p13, %p2255_p12 }
 0x28b   : > { %p2258_p1 = pnand %p2257_p0, %p2251_p9 }
 0x28d   : > { %2261 = shalt.err (!%p2258_p1)
}
 0x28e   : > { %2148 = dma.vmem_to_hbm [thread:$0]  (%p2378_p4), %s3290_s4, 128, %s3288_s7, %s1886_s8  }
 0x28f PF: > { %p2154_p2 = scmp.ge.s32.totalorder %s2312_s14, 2  ;;  %s1911_s27 = sand.u32 1, %s2292_s9  }
 0x290   : > { %s1912_s28 = scalar_lea.sflag [#allocation3], %s1911_s27 }
 0x291   : > { %p2151_p3 = pnand %p2154_p2, %p2385_p8 }
 0x293   : > { %2287 = dma.done.wait (!%p2151_p3), %s1912_s28, 128  }
 0x294   : > { %2289 = vsyncadd (!%p2151_p3), %s1912_s28, 4294967168  ;;  %s15_s14 = sadd.s32 1, %s2312_s14   ;;  %s3344_s9 = smov %s2296_s10 }
 0x295   : > { %p12_p5 = scmp.ge.s32.totalorder %s15_s14, 4   ;;  %s3345_s10 = smov %s2300_s11 }
 0x296   : > { %s3346_s11 = smov %s2391_s22  ;;  %s3347_s12 = smov %s2308_s13 }
 0x297   : > { %s3348_s13 = smov %s3350_s17  ;;  %14 = sbr.rel (!%p12_p5) target bundleno = 4 (0x4), region = 72 }
 0x29e   :  { %1917 = vsyncpa [#allocation3], 1 }
 0x29f   :  { %1919 = vsyncpa [#allocation3 + $0x1], 1 }

// kernel: tpu_custom_call.1
= control target key start
LH: loop header
LB: loop body
LE: loop exit
PB: predicated region body
PF: predicated region fallthrough
CT: control target
= control target key end

     0   :  { %7 = vsyncpa [#allocation3], 0  ;;  %s5266_s0 = inlined_call_operand.vmem [shape: bf16[2,18,18,8], index: 0, kind: input, shape index: {}]   ;;  %s5267_s1 = inlined_call_operand.vmem [shape: bf16[72,128], index: 1, kind: input, shape index: {}]   ;;  %s5268_s2 = inlined_call_operand.hbm [shape: f32[16,128], index: 2, kind: output, shape index: {}]  }
   0x1   :  { %9 = vsyncpa [#allocation3 + $0x1], 0  ;;  %s4199_s9 = smov 0   ;;  %s4201_s10 = smov 0  }
   0x2   :  { %s4203_s11 = smov 0   ;;  %s4205_s12 = smov 0  }
   0x3   :  { %s4207_s13 = smov 0   ;;  %s4209_s14 = smov 0  }
   0x4 LB: > { %s3071_s15 = sadd.s32 4294967295, %s4181_s14   ;;  %s3072_s16 = sadd.s32 4294967294, %s4181_s14   ;;  %s4181_s14 = sphi %s4209_s14, %s15_s14   ;;  %s4177_s13 = sphi %s4207_s13, %s5352_s13   ;;  %s4173_s12 = sphi %s4205_s12, %s5351_s12   ;;  %s4169_s11 = sphi %s4203_s11, %s5350_s11   ;;  %s4165_s10 = sphi %s4201_s10, %s5349_s10   ;;  %s4161_s9 = sphi %s4199_s9, %s5348_s9  }
   0x5   : > { %s27_s17 = sadd.s32 1, %s4177_s13  ;;  %s81_s18 = sadd.s32 1, %s4169_s11 }
   0x6   : > { %p29_p0 = scmp.ge.s32.totalorder %s27_s17, 2  ;;  %p91_p1 = scmp.ne.s32.totalorder %s4169_s11, %s4165_s10 }
   0x7   : > { %p92_p2 = scmp.eq.s32.totalorder %s3071_s15, 1  ;;  %p97_p3 = scmp.ne.s32.totalorder %s4165_s10, %s4161_s9 }
   0x8   : > { %s5354_s17 = smov (%p29_p0, %s27_s17), 0  ;;  %p98_p5 = scmp.eq.s32.totalorder %s3072_s16, 1 }
   0x9   : > { %p4239_p4 = por %p92_p2, %p91_p1  ;;  %s78_s20 = ssub.s32 %s4177_s13, %s5354_s17 }
   0xa   : > { %p3075_p6 = scmp.ge.s32.totalorder %s4181_s14, 1  ;;  %p79_p7 = scmp.eq.s32.totalorder %s78_s20, 0 }
   0xb   : > { %p4246_p8 = por %p98_p5, %p97_p3  ;;  %p127_p9 = scmp.lt.s32.totalorder %s4181_s14, 3 }
   0xc   : > { %s4252_s22 = scalar_select %p79_p7, %s4169_s11, %s81_s18  }
   0xd   : > { %p128_p10 = pnand %p3075_p6, %p127_p9 }
   0xf   : > { %131 = sbr.rel (%p128_p10) target bundleno = 592 (0x250), region = 28 }
  0x16   : > { %v832_v0 = vld [vmem:[%s5267_s1 + $0x4] sm:$0xf]  ;;  %vm930_vm0 = vcmask 1043456   ;;  %v1851_v1 = vld [vmem:[%s5267_s1 + $0x10] sm:$0xf]  ;;  %p149_p11 = scmp.lt.s32.totalorder %s4173_s12, 1 }
  0x17   : > { %4015 = vmatprep.subr.msk.bf16.mxu1 %vm930_vm0, %v832_v0  ;;  %4019 = vmatprep.subr.msk.bf16.mxu0 %vm930_vm0, %v1851_v1  ;;  %v932_v2 = vsel %vm930_vm0, %v832_v0, 0  ;;  %v4265_v3 = vsel %vm930_vm0, %v1851_v1, 0  ;;  %v831_v4 = vld [vmem:[%s5267_s1] sm:$0xf]  ;;  %v2054_v5 = vld [vmem:[%s5267_s1 + $0x14] sm:$0xf] }
  0x18   : > { %5302 = vst [vmem:[#allocation5_spill] sm:$0xff] %v4265_v3  ;;  %3452 = vmatpush3.bf16.msra.mxu1 %v932_v2  ;;  %3588 = vmatpush3.bf16.msra.mxu0 %v4265_v3  ;;  %s150_s27 = scalar_select %p149_p11, %s4173_s12, 1  ;;  %vm213_vm1 = vsmask.f32 3328  ;;  %vm214_vm2 = vsmask.f32 7440 }
  0x19   : > { %4016 = vmatprep.subr.msk.bf16.mxu1 %vm930_vm0, %v831_v4  ;;  %4021 = vmatprep.subr.msk.bf16.mxu0 %vm930_vm0, %v2054_v5  ;;  %v4283_v6 = vsel %vm930_vm0, %v831_v4, 0  ;;  %v4286_v7 = vsel %vm930_vm0, %v2054_v5, 0  ;;  %v4291_v8 = vld [vmem:[%s5267_s1 + $0x18] sm:$0xf]  ;;  %vm881_vm3 = vcmask 64512   ;;  %vm4327_vm4 = vmor %vm213_vm1, %vm214_vm2  ;;  %vm648_vm5 = vcmask 1042432  }
  0x1a   : > { %s4025_s4 = smul.u32 216, %s150_s27  ;;  %v4315_v20 = vsel %vm930_vm0, %v4291_v8, 0  ;;  %vm649_vm6 = vcmask 1046532   ;;  %s146_s30 = sand.u32 1, %s4165_s10  }
  0x1b   : > { %vm4508_vm7 = vmor %vm648_vm5, %vm649_vm6  ;;  %s3076_s3 = sshll.u32 %s146_s30, 3  ;;  %s2989_s16 = scalar_lea.sflag [#allocation3], %s146_s30 }
  0x1c   : > { %s4280_s7 = scalar_lea.vmem %s5266_s0, %s4025_s4  ;;  %s3295_s4 = sshll.u32 %s4173_s12, 7 }
  0x1d   : > { %v4294_v9 = vld [vmem:[%s4280_s7] sm:$0xf]  ;;  %v4297_v10 = vld [vmem:[%s4280_s7 + $0x4] sm:$0xf]  ;;  %v161_v11 = vld [vmem:[%s4280_s7 + $0x8] sm:$0x1]  ;;  %s5219_s15 = scalar_lea.hbm %s5268_s2, %s3295_s4 }
  0x1e   : > { %v217_v12 = vshrl.u32 %v4294_v9, 16  ;;  %v220_v13 = vshll.u32 %v4294_v9, 16  ;;  %v226_v14 = vshll.u32 %v4297_v10, 16  ;;  %v230_v15 = vshrl.u32 %v4297_v10, 16  ;;  %v4305_v16 = vld [vmem:[%s4280_s7 + $0xc] sm:$0xf] }
  0x1f   : > { %v236_v17 = vshll.u32 %v161_v11, 16  ;;  %v4308_v18 = vld [vmem:[%s4280_s7 + $0x10] sm:$0xf]  ;;  %v4311_v19 = vld [vmem:[%s4280_s7 + $0x14] sm:$0x1]  ;;  %v241_v26 = vshrl.u32 %v4305_v16, 16 }
  0x20   : > { %v219_v21 = vrot.slane %v217_v12, 4  ;;  %v222_v22 = vrot.slane %v220_v13, 5  ;;  %v228_v23 = vrot.slane %v226_v14, 5  ;;  %v232_v24 = vrot.slane %v230_v15, 4  ;;  %v4323_v33 = vld [vmem:[%s4280_s7 + $0x18] sm:$0xf] }
  0x21   : > { %v238_v25 = vrot.slane %v236_v17, 5  ;;  %v244_v27 = vshll.u32 %v4305_v16, 16  ;;  %v250_v28 = vshll.u32 %v4308_v18, 16  ;;  %v254_v31 = vshrl.u32 %v4308_v18, 16  ;;  %v4333_v39 = vld [vmem:[%s4280_s7 + $0x1c] sm:$0xf] }
  0x22   : > { %v223_v29 = vor.u32 %v222_v22, %v219_v21  ;;  %v233_v30 = vor.u32 %v232_v24, %v228_v23  ;;  %v260_v32 = vshll.u32 %v4311_v19, 16  ;;  %v243_v35 = vrot.slane %v241_v26, 4  ;;  %v4340_v46 = vld [vmem:[%s4280_s7 + $0x20] sm:$0x1]  ;;  %v4350_v57 = vld [vmem:[%s4280_s7 + $0x24] sm:$0xf] }
  0x23   : > { %v246_v36 = vrot.slane %v244_v27, 5  ;;  %v252_v37 = vrot.slane %v250_v28, 5  ;;  %v663_v38 = vrot.slane %v4311_v19, 5  ;;  %v256_v42 = vrot.slane %v254_v31, 4  ;;  %v4355_v62 = vld [vmem:[%s4280_s7 + $0x28] sm:$0xf] }
  0x24   : > { %v224_v40 = vrot.slane %v223_v29, 4  ;;  %v234_v41 = vrot.slane %v233_v30, 4  ;;  %v262_v43 = vrot.slane %v260_v32, 5  ;;  %v4337_v45 = vcombine.low %v4305_v16, %v4308_v18  ;;  %v4363_v4 = vld [vmem:[%s4280_s7 + $0x2c] sm:$0x1]  ;;  %s148_s5 = scalar_lea.vmem [#allocation2], %s3076_s3 }
  0x25   : > { %v247_v44 = vor.u32 %v246_v36, %v243_v35  ;;  %v265_v47 = vshrl.u32 %v4323_v33, 16  ;;  %v268_v48 = vshll.u32 %v4323_v33, 16  ;;  %v257_v51 = vor.u32 %v256_v42, %v252_v37  ;;  %v4369_v14 = vld [vmem:[%s4280_s7 + $0x30] sm:$0xf]  ;;  %v4381_v28 = vld [vmem:[%s4280_s7 + $0x34] sm:$0xf] }
  0x26   : > { %v229_v49 = vsel %vm4327_vm4, %v224_v40, %v228_v23  ;;  %v239_v50 = vsel %vm4327_vm4, %v234_v41, %v238_v25  ;;  %v274_v52 = vshll.u32 %v4333_v39, 16  ;;  %v278_v60 = vshrl.u32 %v4333_v39, 16  ;;  %v4376_v23 = vld [vmem:[%s5267_s1 + $0x8] sm:$0xf]  ;;  %v4388_v32 = vld [vmem:[%s4280_s7 + $0x38] sm:$0x1] }
  0x27   : > { %v3096_v53 = vcombine.low %v229_v49, %v239_v50  ;;  %v248_v54 = vrot.slane %v247_v44, 4  ;;  %v267_v55 = vrot.slane %v265_v47, 4  ;;  %v270_v56 = vrot.slane %v268_v48, 5  ;;  %v4396_v48 = vld [vmem:[%s4280_s7 + $0x3c] sm:$0xf]  ;;  %s3002_s6 = sshll.u32 %s148_s5, 4  ;;  %s5221_s6 = int_to_ptr.vmem [resolvable:$true] %s3002_s6 }
  0x28   : > { %v258_v58 = vrot.slane %v257_v51, 4  ;;  %v276_v59 = vrot.slane %v274_v52, 5  ;;  %v284_v61 = vshll.u32 %v4340_v46, 16  ;;  %v667_v1 = vrot.slane %v4333_v39, 5  ;;  %v4404_v52 = vld [vmem:[%s4280_s7 + $0x40] sm:$0xf] }
  0x29   : > { %3453 = vmatprep.mubr.msk.bf16.mxu1 %vm881_vm3, %v3096_v53  ;;  %v253_v63 = vsel %vm4327_vm4, %v248_v54, %v252_v37  ;;  %v271_v0 = vor.u32 %v270_v56, %v267_v55  ;;  %v670_v2 = vrot.slane %v4340_v46, 5  ;;  %v280_v11 = vrot.slane %v278_v60, 4  ;;  %s4103_s18 = scalar_lea.vmem %s5221_s6, 128  ;;  %s4183_s12 = smov [#allocation2]  }
  0x2a   : > { %v263_v5 = vsel %vm4327_vm4, %v258_v58, %v262_v43  ;;  %v286_v12 = vrot.slane %v284_v61, 5  ;;  %v289_v13 = vshrl.u32 %v4350_v57, 16  ;;  %v292_v21 = vshll.u32 %v4350_v57, 16  ;;  %p4104_p12 = scmp.ne.s32.totalorder %s5221_s6, %s4103_s18  ;;  %s4107_s20 = sshll.u32 %s4183_s12, 4  ;;  %s4108_s20 = int_to_ptr.vmem [resolvable:$false] %s4107_s20 }
  0x2b   : > { %v3097_v15 = vcombine.low %v253_v63, %v263_v5  ;;  %v272_v17 = vrot.slane %v271_v0, 4  ;;  %v298_v22 = vshll.u32 %v4355_v62, 16  ;;  %v281_v24 = vor.u32 %v280_v11, %v276_v59  ;;  %v4416_v5 = vld [vmem:[%s4280_s7 + $0x44] sm:$0x1]  ;;  %s4109_s23 = scalar_lea.vmem %s4108_s20, 256  ;;  %p4110_p1 = scmp.lt.s32.totalorder %s5221_s6, %s4108_s20 }
  0x2c   : > { %v291_v25 = vrot.slane %v289_v13, 4  ;;  %v302_v26 = vshrl.u32 %v4355_v62, 16  ;;  %v308_v27 = vshll.u32 %v4363_v4, 16  ;;  %v294_v30 = vrot.slane %v292_v21, 5  ;;  %v4421_v13 = vld [vmem:[%s4280_s7 + $0x48] sm:$0xf]  ;;  %p4105_p13 = pnand %p4104_p12, %p4239_p4  ;;  %p4111_p2 = scmp.lt.s32.totalorder %s4109_s23, %s4103_s18 }
  0x2d   : > { %3589 = vmatprep.mubr.msk.bf16.mxu0 %vm881_vm3, %v3097_v15  ;;  %3454 = vmatmul.mubr.msk.bf16.vlgmr.msra.gmra.mrb[0].mxu1 %vm881_vm3, %v3097_v15  ;;  %v277_v29 = vsel %vm4327_vm4, %v272_v17, %v276_v59  ;;  %v300_v31 = vrot.slane %v298_v22, 5  ;;  %v313_v35 = vshrl.u32 %v4369_v14, 16  ;;  %v282_v36 = vrot.slane %v281_v24, 4  ;;  %v4428_v24 = vld [vmem:[%s4280_s7 + $0x4c] sm:$0xf] }
  0x2e   : > { %3486 = vmatpush3.bf16.msra.mxu1 %v4283_v6  ;;  %v304_v37 = vrot.slane %v302_v26, 4  ;;  %v310_v40 = vrot.slane %v308_v27, 5  ;;  %v316_v41 = vshll.u32 %v4369_v14, 16  ;;  %v295_v42 = vor.u32 %v294_v30, %v291_v25  ;;  %p4106_p0 = pneg %p4105_p13  ;;  %p4112_p3 = por %p4111_p2, %p4110_p1 }
  0x2f   : > { %v315_v43 = vrot.slane %v313_v35, 4  ;;  %v322_v44 = vshll.u32 %v4381_v28, 16  ;;  %v326_v47 = vshrl.u32 %v4381_v28, 16  ;;  %4017 = vmatprep.subr.msk.bf16.mxu1 %vm930_vm0, %v4376_v23  ;;  %v287_v49 = vsel %vm4327_vm4, %v282_v36, %v286_v12 }
  0x30   : > { %v305_v6 = vor.u32 %v304_v37, %v300_v31  ;;  %v318_v50 = vrot.slane %v316_v41, 5  ;;  %v332_v51 = vshll.u32 %v4388_v32, 16  ;;  %v4406_v53 = vcombine.low %v277_v29, %v287_v49  ;;  %p4113_p5 = pnand %p4112_p3, %p4106_p0 }
  0x31   : > { %v296_v54 = vrot.slane %v295_v42, 4  ;;  %v324_v55 = vrot.slane %v322_v44, 5  ;;  %v328_v56 = vrot.slane %v326_v47, 4  ;;  %v337_v61 = vshrl.u32 %v4396_v48, 16  ;;  %v4450_v42 = vld [vmem:[%s4280_s7 + $0x54] sm:$0xf] }
  0x32   : > { %5305 = vst [vmem:[#allocation6_spill] sm:$0xff] %v4406_v53  ;;  %v306_v58 = vrot.slane %v305_v6, 4  ;;  %v319_v59 = vor.u32 %v318_v50, %v315_v43  ;;  %v334_v60 = vrot.slane %v332_v51, 5  ;;  %3590 = vmatmul.mubr.msk.bf16.vlgmr.msra.gmra.mrb[0].mxu0 %vm881_vm3, %v4406_v53  ;;  %3457 = vmatprep.mubr.msk.bf16.mxu1 %vm881_vm3, %v4406_v53  ;;  %v340_v11 = vshll.u32 %v4396_v48, 16  ;;  %5307 = vst [vmem:[#allocation8_spill] sm:$0xff] %v4450_v42 }
  0x33   : > { %v301_v63 = vsel %vm4327_vm4, %v296_v54, %v300_v31  ;;  %v329_v0 = vor.u32 %v328_v56, %v324_v55  ;;  %v346_v12 = vshll.u32 %v4404_v52, 16  ;;  %3622 = vmatpush3.bf16.msra.mxu0 %v4286_v7  ;;  %v339_v21 = vrot.slane %v337_v61, 4  ;;  %v4455_v6 = vld [vmem:[%s4280_s7 + $0x58] sm:$0xf] }
  0x34   : > { %v311_v15 = vsel %vm4327_vm4, %v306_v58, %v310_v40  ;;  %v320_v17 = vrot.slane %v319_v59, 4  ;;  %v350_v22 = vshrl.u32 %v4404_v52, 16  ;;  %v342_v27 = vrot.slane %v340_v11, 5  ;;  %4022 = vmatprep.subr.msk.bf16.mxu0 %vm930_vm0, %v4291_v8  ;;  %v4445_v8 = vld [vmem:[%s4280_s7 + $0x50] sm:$0x1] }
  0x35   : > { %v4430_v25 = vcombine.low %v301_v63, %v311_v15  ;;  %v330_v26 = vrot.slane %v329_v0, 4  ;;  %v348_v29 = vrot.slane %v346_v12, 5  ;;  %v356_v31 = vshll.u32 %v4416_v5, 16  ;;  %v4468_v11 = vld [vmem:[%s4280_s7 + $0x5c] sm:$0x1] }
  0x36   : > { %v325_v7 = vsel %vm4327_vm4, %v320_v17, %v324_v55  ;;  %v352_v30 = vrot.slane %v350_v22, 4  ;;  %v361_v35 = vshrl.u32 %v4421_v13, 16  ;;  %v343_v37 = vor.u32 %v342_v27, %v339_v21  ;;  %v4472_v15 = vld [vmem:[%s4280_s7 + $0x60] sm:$0xf]  ;;  %v4477_v27 = vld [vmem:[%s4280_s7 + $0x64] sm:$0xf] }
  0x37   : > { %5306 = vst [vmem:[#allocation7_spill] sm:$0xff] %v4430_v25  ;;  %3593 = vmatprep.mubr.msk.bf16.mxu0 %vm881_vm3, %v4430_v25  ;;  %3458 = vmatmul.mubr.msk.bf16.gmra.mrb[4].mxu1 %vm881_vm3, %v4430_v25  ;;  %v335_v36 = vsel %vm4327_vm4, %v330_v26, %v334_v60  ;;  %v364_v40 = vshll.u32 %v4421_v13, 16  ;;  %v370_v41 = vshll.u32 %v4428_v24, 16  ;;  %v358_v47 = vrot.slane %v356_v31, 5  ;;  %v4689_v25 = vld [vmem:[%s4280_s7 + $0xa8] sm:$0xf] }
  0x38   : > { %v4452_v43 = vcombine.low %v325_v7, %v335_v36  ;;  %v353_v44 = vor.u32 %v352_v30, %v348_v29  ;;  %v363_v49 = vrot.slane %v361_v35, 4  ;;  %v344_v50 = vrot.slane %v343_v37, 4 }
  0x39   : > { %v366_v51 = vrot.slane %v364_v40, 5  ;;  %v372_v54 = vrot.slane %v370_v41, 5  ;;  %v374_v55 = vshrl.u32 %v4428_v24, 16  ;;  %v380_v58 = vshll.u32 %v4445_v8, 16 }
  0x3a   : > { %5308 = vst [vmem:[#allocation9_spill] sm:$0xff] %v4452_v43  ;;  %3461 = vmatprep.mubr.msk.bf16.mxu1 %vm881_vm3, %v4452_v43  ;;  %v354_v56 = vrot.slane %v353_v44, 4  ;;  %v385_v59 = vshrl.u32 %v4450_v42, 16  ;;  %v388_v60 = vshll.u32 %v4450_v42, 16  ;;  %3594 = vmatmul.mubr.msk.bf16.gmra.mrb[4].mxu0 %vm881_vm3, %v4452_v43  ;;  %v349_v61 = vsel %vm4327_vm4, %v344_v50, %v348_v29 }
  0x3b   : > { %v367_v63 = vor.u32 %v366_v51, %v363_v49  ;;  %v376_v0 = vrot.slane %v374_v55, 4  ;;  %v394_v12 = vshll.u32 %v4455_v6, 16  ;;  %v382_v21 = vrot.slane %v380_v58, 5 }
  0x3c   : > { %v359_v17 = vsel %vm4327_vm4, %v354_v56, %v358_v47  ;;  %v387_v22 = vrot.slane %v385_v59, 4  ;;  %v390_v26 = vrot.slane %v388_v60, 5  ;;  %v398_v36 = vshrl.u32 %v4455_v6, 16  ;;  %v4491_v47 = vld [vmem:[%s4280_s7 + $0x68] sm:$0x1] }
  0x3d   : > { %v4479_v7 = vcombine.low %v349_v61, %v359_v17  ;;  %v368_v29 = vrot.slane %v367_v63, 4  ;;  %v377_v30 = vor.u32 %v376_v0, %v372_v54  ;;  %v396_v31 = vrot.slane %v394_v12, 5 }
  0x3e   : > { %v391_v35 = vor.u32 %v390_v26, %v387_v22  ;;  %v404_v37 = vshll.u32 %v4468_v11, 16  ;;  %v409_v40 = vshrl.u32 %v4472_v15, 16  ;;  %v412_v49 = vshll.u32 %v4472_v15, 16 }
  0x3f   : > { %5309 = vst [vmem:[#allocation10_spill] sm:$0xff] %v4479_v7  ;;  %3597 = vmatprep.mubr.msk.bf16.mxu0 %vm881_vm3, %v4479_v7  ;;  %3462 = vmatmul.mubr.msk.bf16.gmra.mrb[8].mxu1 %vm881_vm3, %v4479_v7  ;;  %v373_v41 = vsel %vm4327_vm4, %v368_v29, %v372_v54  ;;  %v378_v44 = vrot.slane %v377_v30, 4  ;;  %v418_v50 = vshll.u32 %v4477_v27, 16  ;;  %v400_v55 = vrot.slane %v398_v36, 4  ;;  %v4499_v54 = vld [vmem:[%s4280_s7 + $0x6c] sm:$0xf] }
  0x40   : > { %v392_v51 = vrot.slane %v391_v35, 4  ;;  %v406_v56 = vrot.slane %v404_v37, 5  ;;  %v411_v58 = vrot.slane %v409_v40, 4  ;;  %v414_v60 = vrot.slane %v412_v49, 5  ;;  %v4515_v36 = vld [vmem:[%s4280_s7 + $0x70] sm:$0xf] }
  0x41   : > { %v383_v59 = vsel %vm4327_vm4, %v378_v44, %v382_v21  ;;  %v420_v61 = vrot.slane %v418_v50, 5  ;;  %v422_v63 = vshrl.u32 %v4477_v27, 16  ;;  %v401_v17 = vor.u32 %v400_v55, %v396_v31  ;;  %v4666_v7 = vld [vmem:[%s4280_s7 + $0xa0] sm:$0xf] }
  0x42   : > { %v4501_v0 = vcombine.low %v373_v41, %v383_v59  ;;  %v397_v12 = vsel %vm4327_vm4, %v392_v51, %v396_v31  ;;  %v428_v22 = vshll.u32 %v4491_v47, 16  ;;  %v415_v21 = vor.u32 %v414_v60, %v411_v58  ;;  %v4528_v51 = vld [vmem:[%s4280_s7 + $0x74] sm:$0x1] }
  0x43   : > { %v424_v29 = vrot.slane %v422_v63, 4  ;;  %v3079_v30 = vrot.slane %v4305_v16, 9  ;;  %v660_v35 = vrot.slane %v4308_v18, 5  ;;  %v402_v31 = vrot.slane %v401_v17, 4 }
  0x44   : > { %5310 = vst [vmem:[#allocation11_spill] sm:$0xff] %v4501_v0  ;;  %3598 = vmatmul.mubr.msk.bf16.gmra.mrb[8].mxu0 %vm881_vm3, %v4501_v0  ;;  %3465 = vmatprep.mubr.msk.bf16.mxu1 %vm881_vm3, %v4501_v0  ;;  %v430_v37 = vrot.slane %v428_v22, 5  ;;  %v433_v40 = vshrl.u32 %v4499_v54, 16  ;;  %v436_v41 = vshll.u32 %v4499_v54, 16  ;;  %v416_v44 = vrot.slane %v415_v21, 4 }
  0x45   : > { %v425_v49 = vor.u32 %v424_v29, %v420_v61  ;;  %v661_v16 = vsel %vm4508_vm7, %v3079_v30, %v660_v35  ;;  %v662_v18 = vrot.slane %v660_v35, 4  ;;  %v407_v50 = vsel %vm4327_vm4, %v402_v31, %v406_v56  ;;  %v4540_v56 = vld [vmem:[%s4280_s7 + $0x78] sm:$0xf]  ;;  %v4556_v31 = vld [vmem:[%s4280_s7 + $0x7c] sm:$0xf] }
  0x46   : > { %v435_v55 = vrot.slane %v433_v40, 4  ;;  %v438_v58 = vrot.slane %v436_v41, 5  ;;  %v442_v59 = vshll.u32 %v4515_v36, 16  ;;  %v4531_v60 = vcombine.low %v397_v12, %v407_v50 }
  0x47   : > { %v421_v63 = vsel %vm4327_vm4, %v416_v44, %v420_v61  ;;  %v426_v17 = vrot.slane %v425_v49, 4  ;;  %v664_v22 = vsel %vm4508_vm7, %v662_v18, %v663_v38  ;;  %v446_v35 = vshrl.u32 %v4515_v36, 16  ;;  %v4561_v49 = vld [vmem:[%s4280_s7 + $0x80] sm:$0x1] }
  0x48   : > { %5313 = vst [vmem:[#allocation12_spill] sm:$0xff] %v4531_v60  ;;  %v4542_v21 = vcombine.low %v661_v16, %v664_v22  ;;  %v439_v29 = vor.u32 %v438_v58, %v435_v55  ;;  %v444_v30 = vrot.slane %v442_v59, 5  ;;  %3601 = vmatprep.mubr.msk.bf16.mxu0 %vm881_vm3, %v4531_v60  ;;  %3466 = vmatmul.mubr.msk.bf16.gmra.mrb[12].mxu1 %vm881_vm3, %v4531_v60  ;;  %v452_v38 = vshll.u32 %v4528_v51, 16  ;;  %v4659_v60 = vld [vmem:[%s4280_s7 + $0x9c] sm:$0xf] }
  0x49   : > { %v431_v19 = vsel %vm4327_vm4, %v426_v17, %v430_v37  ;;  %v3080_v61 = vrot.slane %v4323_v33, 9  ;;  %v669_v12 = vrot.slane %v667_v1, 4  ;;  %v448_v44 = vrot.slane %v446_v35, 4 }
  0x4a   : > { %5314 = vst [vmem:[#allocation13_spill] sm:$0xff] %v4542_v21  ;;  %v4558_v40 = vcombine.low %v421_v63, %v431_v19  ;;  %v440_v41 = vrot.slane %v439_v29, 4  ;;  %v457_v16 = vshrl.u32 %v4540_v56, 16  ;;  %v454_v18 = vrot.slane %v452_v38, 5  ;;  %v4587_v29 = vld [vmem:[%s4280_s7 + $0x84] sm:$0xf] }
  0x4b   : > { %v668_v37 = vsel %vm4508_vm7, %v3080_v61, %v667_v1  ;;  %v671_v50 = vsel %vm4508_vm7, %v669_v12, %v670_v2  ;;  %v460_v55 = vshll.u32 %v4540_v56, 16  ;;  %v449_v59 = vor.u32 %v448_v44, %v444_v30 }
  0x4c   : > { %5315 = vst [vmem:[#allocation14_spill] sm:$0xff] %v4558_v40  ;;  %3602 = vmatmul.mubr.msk.bf16.gmra.mrb[12].mxu0 %vm881_vm3, %v4558_v40  ;;  %3469 = vmatprep.mubr.msk.bf16.mxu1 %vm881_vm3, %v4558_v40  ;;  %v445_v58 = vsel %vm4327_vm4, %v440_v41, %v444_v30  ;;  %v4579_v63 = vcombine.low %v668_v37, %v671_v50  ;;  %v459_v1 = vrot.slane %v457_v16, 4  ;;  %v466_v2 = vshll.u32 %v4556_v31, 16  ;;  %v4593_v16 = vld [vmem:[%s4280_s7 + $0x88] sm:$0xf] }
  0x4d   : > { %3623 = vmatprep.mubr.msk.bf16.mxu0 %vm881_vm3, %v4542_v21  ;;  %v462_v46 = vrot.slane %v460_v55, 5  ;;  %v470_v17 = vshrl.u32 %v4556_v31, 16  ;;  %v476_v22 = vshll.u32 %v4561_v49, 16  ;;  %v450_v35 = vrot.slane %v449_v59, 4 }
  0x4e   : > { %5316 = vst [vmem:[#allocation15_spill] sm:$0xff] %v4579_v63  ;;  %v3081_v30 = vrot.slane %v4350_v57, 9  ;;  %v674_v19 = vrot.slane %v4355_v62, 5  ;;  %v677_v38 = vrot.slane %v4363_v4, 5  ;;  %v468_v12 = vrot.slane %v466_v2, 5 }
  0x4f   : > { %v463_v61 = vor.u32 %v462_v46, %v459_v1  ;;  %v472_v41 = vrot.slane %v470_v17, 4  ;;  %v478_v44 = vrot.slane %v476_v22, 5  ;;  %v455_v37 = vsel %vm4327_vm4, %v450_v35, %v454_v18  ;;  %v4603_v1 = vld [vmem:[%s4280_s7 + $0x8c] sm:$0x1] }
  0x50   : > { %v675_v50 = vsel %vm4508_vm7, %v3081_v30, %v674_v19  ;;  %v676_v55 = vrot.slane %v674_v19, 4  ;;  %v481_v59 = vshrl.u32 %v4587_v29, 16  ;;  %v4600_v3 = vcombine.low %v445_v58, %v455_v37 }
  0x51   : > { %v464_v40 = vrot.slane %v463_v61, 4  ;;  %v473_v4 = vor.u32 %v472_v41, %v468_v12  ;;  %v484_v46 = vshll.u32 %v4587_v29, 16  ;;  %v490_v18 = vshll.u32 %v4593_v16, 16  ;;  %v4617_v61 = vld [vmem:[%s4280_s7 + $0x90] sm:$0xf] }
  0x52   : > { %5317 = vst [vmem:[#allocation16_spill] sm:$0xff] %v4600_v3  ;;  %v678_v2 = vsel %vm4508_vm7, %v676_v55, %v677_v38  ;;  %v483_v17 = vrot.slane %v481_v59, 4  ;;  %v494_v22 = vshrl.u32 %v4593_v16, 16  ;;  %3470 = vmatmul.mubr.msk.bf16.gmra.mrb[16].mxu1 %vm881_vm3, %v4600_v3  ;;  %v4622_v38 = vld [vmem:[%s5267_s1 + $0x1c] sm:$0xf]  ;;  %v681_v59 = vrot.slane %v4381_v28, 5 }
  0x53   : > { %v469_v58 = vsel %vm4327_vm4, %v464_v40, %v468_v12  ;;  %v474_v35 = vrot.slane %v473_v4, 4  ;;  %v4614_v30 = vcombine.low %v675_v50, %v678_v2  ;;  %v486_v19 = vrot.slane %v484_v46, 5  ;;  %5319 = vst [vmem:[#allocation18_spill] sm:$0xff] %v4622_v38  ;;  %v4636_v46 = vld [vmem:[%s4280_s7 + $0x94] sm:$0xf] }
  0x54   : > { %3624 = vmatmul.mubr.msk.bf16.vlgmr.msra.gmra.mrb[0].mxu0 %vm881_vm3, %v4579_v63  ;;  %v492_v41 = vrot.slane %v490_v18, 5  ;;  %v496_v37 = vrot.slane %v494_v22, 4  ;;  %v500_v40 = vshll.u32 %v4603_v1, 16  ;;  %v3082_v12 = vrot.slane %v4369_v14, 9  ;;  %v4641_v3 = vld [vmem:[%s4280_s7 + $0x98] sm:$0x1] }
  0x55   : > { %5318 = vst [vmem:[#allocation17_spill] sm:$0xff] %v4614_v30  ;;  %3656 = vmatpush3.bf16.msra.mxu0 %v4315_v20  ;;  %v479_v50 = vsel %vm4327_vm4, %v474_v35, %v478_v44  ;;  %3627 = vmatprep.mubr.msk.bf16.mxu0 %vm881_vm3, %v4614_v30  ;;  %v487_v55 = vor.u32 %v486_v19, %v483_v17  ;;  %v684_v4 = vrot.slane %v4388_v32, 5  ;;  %v505_v20 = vshrl.u32 %v4617_v61, 16 }
  0x56   : > { %v4638_v2 = vcombine.low %v469_v58, %v479_v50  ;;  %v497_v18 = vor.u32 %v496_v37, %v492_v41  ;;  %v502_v22 = vrot.slane %v500_v40, 5  ;;  %4023 = vmatprep.subr.msk.bf16.mxu0 %vm930_vm0, %v4622_v38  ;;  %v682_v17 = vsel %vm4508_vm7, %v3082_v12, %v681_v59 }
  0x57   : > { %v488_v44 = vrot.slane %v487_v55, 4  ;;  %v683_v35 = vrot.slane %v681_v59, 4  ;;  %v508_v32 = vshll.u32 %v4617_v61, 16  ;;  %v507_v19 = vrot.slane %v505_v20, 4 }
  0x58   : > { %5320 = vst [vmem:[#allocation19_spill] sm:$0xff] %v4638_v2  ;;  %3473 = vmatprep.mubr.msk.bf16.mxu1 %vm881_vm3, %v4638_v2  ;;  %v498_v58 = vrot.slane %v497_v18, 4  ;;  %v514_v37 = vshll.u32 %v4636_v46, 16  ;;  %v518_v40 = vshrl.u32 %v4636_v46, 16  ;;  %v524_v59 = vshll.u32 %v4641_v3, 16 }
  0x59   : > { %v493_v50 = vsel %vm4327_vm4, %v488_v44, %v492_v41  ;;  %v685_v55 = vsel %vm4508_vm7, %v683_v35, %v684_v4  ;;  %v510_v12 = vrot.slane %v508_v32, 5  ;;  %v3083_v4 = vrot.slane %v4396_v48, 9 }
  0x5a   : > { %v503_v2 = vsel %vm4327_vm4, %v498_v58, %v502_v22  ;;  %v4663_v18 = vcombine.low %v682_v17, %v685_v55  ;;  %v516_v20 = vrot.slane %v514_v37, 5  ;;  %v520_v0 = vrot.slane %v518_v40, 4  ;;  %v4679_v58 = vld [vmem:[%s4280_s7 + $0xa4] sm:$0x1] }
  0x5b   : > { %v4668_v43 = vcombine.low %v493_v50, %v503_v2  ;;  %v511_v41 = vor.u32 %v510_v12, %v507_v19  ;;  %v526_v44 = vrot.slane %v524_v59, 5  ;;  %v688_v32 = vrot.slane %v4404_v52, 5 }
  0x5c   : > { %5321 = vst [vmem:[#allocation20_spill] sm:$0xff] %v4663_v18  ;;  %3628 = vmatmul.mubr.msk.bf16.gmra.mrb[4].mxu0 %vm881_vm3, %v4663_v18  ;;  %v521_v35 = vor.u32 %v520_v0, %v516_v20  ;;  %v691_v22 = vrot.slane %v4416_v5, 5  ;;  %v529_v17 = vshrl.u32 %v4659_v60, 16  ;;  %v532_v19 = vshll.u32 %v4659_v60, 16 }
  0x5d   : > { %5322 = vst [vmem:[#allocation21_spill] sm:$0xff] %v4668_v43  ;;  %3474 = vmatmul.mubr.msk.bf16.gmra.mrb[20].mxu1 %vm881_vm3, %v4668_v43  ;;  %v512_v2 = vrot.slane %v511_v41, 4  ;;  %v538_v37 = vshll.u32 %v4666_v7, 16  ;;  %v542_v0 = vshrl.u32 %v4666_v7, 16  ;;  %v689_v5 = vsel %vm4508_vm7, %v3083_v4, %v688_v32 }
  0x5e   : > { %v522_v40 = vrot.slane %v521_v35, 4  ;;  %v690_v50 = vrot.slane %v688_v32, 4  ;;  %v531_v55 = vrot.slane %v529_v17, 4  ;;  %v534_v59 = vrot.slane %v532_v19, 5  ;;  %v4698_v32 = vld [vmem:[%s4280_s7 + $0xac] sm:$0xf] }
  0x5f   : > { %v517_v12 = vsel %vm4327_vm4, %v512_v2, %v516_v20  ;;  %v540_v41 = vrot.slane %v538_v37, 5  ;;  %v544_v43 = vrot.slane %v542_v0, 4  ;;  %v548_v35 = vshll.u32 %v4679_v58, 16 }
  0x60   : > { %v527_v53 = vsel %vm4327_vm4, %v522_v40, %v526_v44  ;;  %v692_v18 = vsel %vm4508_vm7, %v690_v50, %v691_v22  ;;  %v3084_v4 = vrot.slane %v4421_v13, 9  ;;  %v535_v2 = vor.u32 %v534_v59, %v531_v55 }
  0x61   : > { %v4700_v17 = vcombine.low %v517_v12, %v527_v53  ;;  %v4702_v20 = vcombine.low %v689_v5, %v692_v18  ;;  %v545_v19 = vor.u32 %v544_v43, %v540_v41  ;;  %v550_v37 = vrot.slane %v548_v35, 5  ;;  %v4712_v18 = vld [vmem:[%s4280_s7 + $0xb0] sm:$0x1] }
  0x62   : > { %v695_v0 = vrot.slane %v4428_v24, 5  ;;  %v698_v44 = vrot.slane %v4445_v8, 5  ;;  %v553_v22 = vshrl.u32 %v4689_v25, 16  ;;  %v536_v53 = vrot.slane %v535_v2, 4 }
  0x63   : > { %5323 = vst [vmem:[#allocation22_spill] sm:$0xff] %v4700_v17  ;;  %5324 = vst [vmem:[#allocation23_spill] sm:$0xff] %v4702_v20  ;;  %3477 = vmatprep.mubr.msk.bf16.mxu1 %vm881_vm3, %v4700_v17  ;;  %3631 = vmatprep.mubr.msk.bf16.mxu0 %vm881_vm3, %v4702_v20  ;;  %v546_v40 = vrot.slane %v545_v19, 4  ;;  %v556_v43 = vshll.u32 %v4689_v25, 16  ;;  %v562_v5 = vshll.u32 %v4698_v32, 16  ;;  %v566_v12 = vshrl.u32 %v4698_v32, 16 }
  0x64   : > { %v696_v8 = vsel %vm4508_vm7, %v3084_v4, %v695_v0  ;;  %v697_v50 = vrot.slane %v695_v0, 4  ;;  %v555_v55 = vrot.slane %v553_v22, 4  ;;  %v541_v59 = vsel %vm4327_vm4, %v536_v53, %v540_v41  ;;  %v4724_v17 = vld [vmem:[%s4280_s7 + $0xb4] sm:$0xf]  ;;  %v4736_v53 = vld [vmem:[%s4280_s7 + $0xb8] sm:$0xf] }
  0x65   : > { %v551_v35 = vsel %vm4327_vm4, %v546_v40, %v550_v37  ;;  %v558_v2 = vrot.slane %v556_v43, 5  ;;  %v564_v19 = vrot.slane %v562_v5, 5  ;;  %v568_v0 = vrot.slane %v566_v12, 4 }
  0x66   : > { %v4726_v20 = vcombine.low %v541_v59, %v551_v35  ;;  %v699_v4 = vsel %vm4508_vm7, %v697_v50, %v698_v44  ;;  %v572_v22 = vshll.u32 %v4712_v18, 16  ;;  %v3085_v41 = vrot.slane %v4450_v42, 9  ;;  %v4742_v44 = vld [vmem:[%s4280_s7 + $0xbc] sm:$0x1] }
  0x67   : > { %v4731_v30 = vcombine.low %v696_v8, %v699_v4  ;;  %v559_v63 = vor.u32 %v558_v2, %v555_v55  ;;  %v702_v37 = vrot.slane %v4455_v6, 5  ;;  %v569_v40 = vor.u32 %v568_v0, %v564_v19 }
  0x68   : > { %5325 = vst [vmem:[#allocation24_spill] sm:$0xff] %v4726_v20  ;;  %3478 = vmatmul.mubr.msk.bf16.gmra.mrb[24].mxu1 %vm881_vm3, %v4726_v20  ;;  %v574_v43 = vrot.slane %v572_v22, 5  ;;  %v705_v5 = vrot.slane %v4468_v11, 5  ;;  %v577_v50 = vshrl.u32 %v4724_v17, 16  ;;  %v580_v59 = vshll.u32 %v4724_v17, 16 }
  0x69   : > { %5326 = vst [vmem:[#allocation25_spill] sm:$0xff] %v4731_v30  ;;  %3632 = vmatmul.mubr.msk.bf16.gmra.mrb[8].mxu0 %vm881_vm3, %v4731_v30  ;;  %v560_v8 = vrot.slane %v559_v63, 4  ;;  %v703_v55 = vsel %vm4508_vm7, %v3085_v41, %v702_v37  ;;  %v704_v12 = vrot.slane %v702_v37, 4  ;;  %v570_v35 = vrot.slane %v569_v40, 4 }
  0x6a   : > { %v579_v2 = vrot.slane %v577_v50, 4  ;;  %v586_v4 = vshll.u32 %v4736_v53, 16  ;;  %v590_v11 = vshrl.u32 %v4736_v53, 16  ;;  %v582_v20 = vrot.slane %v580_v59, 5 }
  0x6b   : > { %v565_v0 = vsel %vm4327_vm4, %v560_v8, %v564_v19  ;;  %v706_v22 = vsel %vm4508_vm7, %v704_v12, %v705_v5  ;;  %v596_v63 = vshll.u32 %v4742_v44, 16  ;;  %v575_v41 = vsel %vm4327_vm4, %v570_v35, %v574_v43 }
  0x6c   : > { %v4759_v37 = vcombine.low %v703_v55, %v706_v22  ;;  %v588_v40 = vrot.slane %v586_v4, 5  ;;  %v592_v50 = vrot.slane %v590_v11, 4  ;;  %v4761_v30 = vcombine.low %v565_v0, %v575_v41 }
  0x6d   : > { %v583_v21 = vor.u32 %v582_v20, %v579_v2  ;;  %v598_v38 = vrot.slane %v596_v63, 5  ;;  %v3086_v42 = vrot.slane %v4472_v15, 9  ;;  %v709_v5 = vrot.slane %v4477_v27, 5 }
  0x6e   : > { %3635 = vmatprep.mubr.msk.bf16.mxu0 %vm881_vm3, %v4759_v37  ;;  %v593_v19 = vor.u32 %v592_v50, %v588_v40  ;;  %v712_v8 = vrot.slane %v4491_v47, 5  ;;  %v3087_v43 = vrot.slane %v4499_v54, 9  ;;  %3481 = vmatprep.mubr.msk.bf16.mxu1 %vm881_vm3, %v4761_v30  ;;  %v3128_v20 = vcombine.low %v4294_v9, %v4297_v10 }
  0x6f   : > { %v584_v55 = vrot.slane %v583_v21, 4  ;;  %v716_v12 = vrot.slane %v4515_v36, 5  ;;  %v719_v59 = vrot.slane %v4528_v51, 5  ;;  %v710_v2 = vsel %vm4508_vm7, %v3086_v42, %v709_v5 }
  0x70   : > { %v594_v35 = vrot.slane %v593_v19, 4  ;;  %v711_v4 = vrot.slane %v709_v5, 4  ;;  %v723_v47 = vrot.slane %v4556_v31, 5  ;;  %v3088_v9 = vrot.slane %v4540_v56, 9 }
  0x71   : > { %v589_v11 = vsel %vm4327_vm4, %v584_v55, %v588_v40  ;;  %v717_v21 = vsel %vm4508_vm7, %v3087_v43, %v716_v12  ;;  %v718_v0 = vrot.slane %v716_v12, 4  ;;  %v726_v42 = vrot.slane %v4561_v49, 5 }
  0x72   : > { %v599_v10 = vsel %vm4327_vm4, %v594_v35, %v598_v38  ;;  %v713_v51 = vsel %vm4508_vm7, %v711_v4, %v712_v8  ;;  %v725_v22 = vrot.slane %v723_v47, 4  ;;  %v3089_v19 = vrot.slane %v4587_v29, 9 }
  0x73   : > { %v4788_v63 = vcombine.low %v589_v11, %v599_v10  ;;  %v4790_v41 = vcombine.low %v710_v2, %v713_v51  ;;  %v720_v40 = vsel %vm4508_vm7, %v718_v0, %v719_v59  ;;  %v730_v5 = vrot.slane %v4593_v16, 5 }
  0x74   : > { %v4794_v50 = vcombine.low %v717_v21, %v720_v40  ;;  %v733_v49 = vrot.slane %v4603_v1, 5  ;;  %v724_v38 = vsel %vm4508_vm7, %v3088_v9, %v723_v47  ;;  %v727_v8 = vsel %vm4508_vm7, %v725_v22, %v726_v42 }
  0x75   : > { %3482 = vmatmul.mubr.msk.bf16.gmra.mrb[28].mxu1 %vm881_vm3, %v4788_v63  ;;  %3636 = vmatmul.mubr.msk.bf16.gmra.mrb[12].mxu0 %vm881_vm3, %v4790_v41  ;;  %v732_v43 = vrot.slane %v730_v5, 4  ;;  %v737_v55 = vrot.slane %v4636_v46, 5  ;;  %v744_v12 = vrot.slane %v4666_v7, 5  ;;  %v731_v59 = vsel %vm4508_vm7, %v3089_v19, %v730_v5 }
  0x76   : > { %3487 = vmatprep.mubr.msk.bf16.mxu1 %vm881_vm3, %v3128_v20  ;;  %3639 = vmatprep.mubr.msk.bf16.mxu0 %vm881_vm3, %v4794_v50  ;;  %v4816_v20 = vcombine.low %v724_v38, %v727_v8  ;;  %v3090_v35 = vrot.slane %v4617_v61, 9  ;;  %v740_v4 = vrot.slane %v4641_v3, 5  ;;  %v4822_v47 = vcombine.low %v4323_v33, %v4333_v39  ;;  %v4834_v3 = vld [vmem:[%s5267_s1 + $0xc] sm:$0xf] }
  0x77   : > { %v734_v1 = vsel %vm4508_vm7, %v732_v43, %v733_v49  ;;  %v739_v2 = vrot.slane %v737_v55, 4  ;;  %v3091_v11 = vrot.slane %v4659_v60, 9  ;;  %v1453_v21 = vsel %vm930_vm0, %v4376_v23, 0 }
  0x78   : > { %v4827_v0 = vcombine.low %v731_v59, %v734_v1  ;;  %v746_v9 = vrot.slane %v744_v12, 4  ;;  %v747_v10 = vrot.slane %v4679_v58, 5  ;;  %v751_v51 = vrot.slane %v4698_v32, 5 }
  0x79   : > { %v738_v33 = vsel %vm4508_vm7, %v3090_v35, %v737_v55  ;;  %v741_v39 = vsel %vm4508_vm7, %v739_v2, %v740_v4  ;;  %v4848_v23 = vcombine.low %v4350_v57, %v4355_v62  ;;  %v745_v58 = vsel %vm4508_vm7, %v3091_v11, %v744_v12 }
  0x7a   : > { %v4854_v22 = vcombine.low %v4472_v15, %v4477_v27  ;;  %v748_v42 = vsel %vm4508_vm7, %v746_v9, %v747_v10  ;;  %v3092_v40 = vrot.slane %v4689_v25, 9  ;;  %v758_v19 = vrot.slane %v4736_v53, 5 }
  0x7b   : > { %v4864_v57 = vcombine.low %v4499_v54, %v4515_v36  ;;  %v4868_v62 = vcombine.low %v738_v33, %v741_v39  ;;  %v753_v15 = vrot.slane %v751_v51, 4  ;;  %v754_v27 = vrot.slane %v4712_v18, 5  ;;  %v209_v18 = vld [vmem:[%s4280_s7 + $0xc8] sm:$0x1] }
  0x7c   : > { %v4873_v5 = vcombine.low %v4540_v56, %v4556_v31  ;;  %v4877_v49 = vcombine.low %v4587_v29, %v4593_v16  ;;  %v4881_v54 = vcombine.low %v4617_v61, %v4636_v46  ;;  %v4885_v36 = vcombine.low %v4659_v60, %v4666_v7  ;;  %v4904_v61 = vld [vmem:[%s4280_s7 + $0xc4] sm:$0xf] }
  0x7d   : > { %3488 = vmatmul.mubr.msk.bf16.vlgmr.msra.gmra.mrb[0].mxu1 %vm881_vm3, %v4337_v45  ;;  %3640 = vmatmul.mubr.msk.bf16.gmra.mrb[16].mxu0 %vm881_vm3, %v4816_v20  ;;  %v4889_v38 = vcombine.low %v4689_v25, %v4698_v32  ;;  %v4893_v56 = vcombine.low %v4369_v14, %v4381_v28  ;;  %v4895_v31 = vcombine.low %v745_v58, %v748_v42  ;;  %v3093_v16 = vrot.slane %v4724_v17, 9  ;;  %v5327_v42 = vld [vmem:[#allocation8_spill] sm:$0xff] }
  0x7e   : > { %3520 = vmatpush3.bf16.msra.mxu1 %v1453_v21  ;;  %3491 = vmatprep.mubr.msk.bf16.mxu1 %vm881_vm3, %v4822_v47  ;;  %v4899_v29 = vcombine.low %v4724_v17, %v4736_v53  ;;  %v760_v7 = vrot.slane %v758_v19, 4  ;;  %v761_v60 = vrot.slane %v4742_v44, 5  ;;  %v752_v14 = vsel %vm4508_vm7, %v3092_v40, %v751_v51  ;;  %v4924_v17 = vld [vmem:[%s4280_s7 + $0xc0] sm:$0xf] }
  0x7f   : > { %3643 = vmatprep.mubr.msk.bf16.mxu0 %vm881_vm3, %v4827_v0  ;;  %4018 = vmatprep.subr.msk.bf16.mxu1 %vm930_vm0, %v4834_v3  ;;  %v755_v28 = vsel %vm4508_vm7, %v753_v15, %v754_v27  ;;  %v792_v25 = vrot.slane %v4904_v61, 5  ;;  %v759_v46 = vsel %vm4508_vm7, %v3093_v16, %v758_v19  ;;  %v4929_v53 = vcombine.low %v4396_v48, %v4404_v52 }
  0x80   : > { %v762_v32 = vsel %vm4508_vm7, %v760_v7, %v761_v60  ;;  %v4931_v44 = vcombine.low %v752_v14, %v755_v28  ;;  %v4935_v8 = vcombine.low %v4421_v13, %v4428_v24  ;;  %v764_v43 = vshrl.u32 %v4924_v17, 16  ;;  %v2663_v60 = vld [vmem:[%s5267_s1 + $0x20] sm:$0xf]  ;;  %v4099_v14 = vld [vmem:[%s4280_s7 + $0x4] sm:$0xf] }
  0x81   : > { %v767_v55 = vshll.u32 %v4924_v17, 16  ;;  %v773_v12 = vshll.u32 %v4904_v61, 16  ;;  %v777_v59 = vshrl.u32 %v4904_v61, 16  ;;  %v4941_v1 = vcombine.low %v759_v46, %v762_v32  ;;  %v4101_v32 = vld [vmem:[%s4280_s7] sm:$0xf] }
  0x82   : > { %v3094_v35 = vrot.slane %v4924_v17, 9  ;;  %v794_v48 = vrot.slane %v792_v25, 4  ;;  %v795_v52 = vrot.slane %v209_v18, 5  ;;  %v766_v2 = vrot.slane %v764_v43, 4 }
  0x83   : > { %v769_v4 = vrot.slane %v767_v55, 5  ;;  %v775_v11 = vrot.slane %v773_v12, 5  ;;  %v779_v21 = vrot.slane %v777_v59, 4  ;;  %v783_v9 = vshll.u32 %v209_v18, 16 }
  0x84   : > { %v793_v10 = vsel %vm4508_vm7, %v3094_v35, %v792_v25  ;;  %v796_v51 = vsel %vm4508_vm7, %v794_v48, %v795_v52  ;;  %v4958_v40 = vcombine.low %v5327_v42, %v4455_v6  ;;  %v5328_v6 = vld [vmem:[#allocation18_spill] sm:$0xff]  ;;  %v653_v28 = vrot.slane %v4099_v14, 5  ;;  %v4100_v25 = vld [vmem:[%s4280_s7 + $0x8] sm:$0x1]  ;;  %v5329_v48 = vld [vmem:[#allocation13_spill] sm:$0xff] }
  0x85   : > { %3492 = vmatmul.mubr.msk.bf16.gmra.mrb[4].mxu1 %vm881_vm3, %v4848_v23  ;;  %3644 = vmatmul.mubr.msk.bf16.gmra.mrb[20].mxu0 %vm881_vm3, %v4868_v62  ;;  %v770_v13 = vor.u32 %v769_v4, %v766_v2  ;;  %v780_v24 = vor.u32 %v779_v21, %v775_v11  ;;  %v785_v58 = vrot.slane %v783_v9, 5  ;;  %v4960_v19 = vcombine.low %v793_v10, %v796_v51  ;;  %v5330_v52 = vld [vmem:[#allocation15_spill] sm:$0xff]  ;;  %v4102_v2 = vld [vmem:[%s5267_s1 + $0x10] sm:$0xf]  ;;  %v5332_v4 = vld [vmem:[#allocation20_spill] sm:$0xff] }
  0x86   : > { %3495 = vmatprep.mubr.msk.bf16.mxu1 %vm881_vm3, %v4893_v56  ;;  %3647 = vmatprep.mubr.msk.bf16.mxu0 %vm881_vm3, %v4895_v31  ;;  %v2468_v7 = vsel %vm930_vm0, %v5328_v6, 0  ;;  %v656_v46 = vrot.slane %v4100_v25, 5  ;;  %v3078_v18 = vrot.slane %v4101_v32, 9  ;;  %v655_v43 = vrot.slane %v653_v28, 4  ;;  %v5333_v21 = vld [vmem:[#allocation23_spill] sm:$0xff]  ;;  %v5340_v42 = vld [vmem:[#allocation12_spill] sm:$0xff] }
  0x87   : > { %v771_v33 = vrot.slane %v770_v13, 4  ;;  %v781_v39 = vrot.slane %v780_v24, 4  ;;  %v1656_v35 = vsel %vm930_vm0, %v4834_v3, 0  ;;  %v5331_v3 = vld [vmem:[#allocation17_spill] sm:$0xff]  ;;  %v5055_v24 = vld [vmem:[%s4280_s7 + $0xcc] sm:$0xf] }
  0x88   : > { %v654_v55 = vsel %vm4508_vm7, %v3078_v18, %v653_v28  ;;  %v657_v12 = vsel %vm4508_vm7, %v655_v43, %v656_v46  ;;  %v5334_v13 = vld [vmem:[#allocation25_spill] sm:$0xff]  ;;  %v2671_v10 = vsel %vm930_vm0, %v2663_v60, 0  ;;  %v5336_v51 = vld [vmem:[#allocation7_spill] sm:$0xff]  ;;  %v801_v14 = vshll.u32 %v5055_v24, 16  ;;  %v5346_v46 = vld [vmem:[#allocation22_spill] sm:$0xff] }
  0x89   : > { %v776_v15 = vsel %vm4327_vm4, %v771_v33, %v775_v11  ;;  %v786_v27 = vsel %vm4327_vm4, %v781_v39, %v785_v58  ;;  %v3160_v59 = vcombine.low %v654_v55, %v657_v12  ;;  %v5044_v11 = vcombine.low %v4924_v17, %v4904_v61  ;;  %v5058_v9 = vld [vmem:[%s4280_s7 + $0xd0] sm:$0xf]  ;;  %v5335_v17 = vld [vmem:[#allocation6_spill] sm:$0xff]  ;;  %v5339_v58 = vld [vmem:[#allocation11_spill] sm:$0xff] }
  0x8a   : > { %v4966_v16 = vcombine.low %v776_v15, %v786_v27  ;;  %v3243_v61 = vcombine.low %v5055_v24, %v5058_v9  ;;  %v5337_v33 = vld [vmem:[#allocation9_spill] sm:$0xff]  ;;  %v5338_v39 = vld [vmem:[#allocation10_spill] sm:$0xff]  ;;  %v5342_v27 = vld [vmem:[#allocation16_spill] sm:$0xff]  ;;  %v811_v28 = vshrl.u32 %v5058_v9, 16  ;;  %v803_v32 = vrot.slane %v801_v14, 5 }
  0x8b   : > { %v5341_v15 = vld [vmem:[#allocation14_spill] sm:$0xff]  ;;  %v5343_v6 = vld [vmem:[#allocation19_spill] sm:$0xff]  ;;  %v5345_v25 = vld [vmem:[#allocation5_spill] sm:$0xff]  ;;  %v826_v34 = vrot.slane %v5058_v9, 5 }
  0x8c   : > { %v813_v43 = vrot.slane %v811_v28, 4  ;;  %v212_v55 = vld [vmem:[%s4280_s7 + $0xd4] sm:$0x1]  ;;  %v5347_v12 = vld [vmem:[#allocation24_spill] sm:$0xff] }
  0x8d   : > { %3496 = vmatmul.mubr.msk.bf16.gmra.mrb[8].mxu1 %vm881_vm3, %v4929_v53  ;;  %3648 = vmatmul.mubr.msk.bf16.gmra.mrb[24].mxu0 %vm881_vm3, %v4931_v44 }
  0x8e   : > { %3499 = vmatprep.mubr.msk.bf16.mxu1 %vm881_vm3, %v4935_v8  ;;  %3651 = vmatprep.mubr.msk.bf16.mxu0 %vm881_vm3, %v4941_v1 }
  0x95   : > { %3500 = vmatmul.mubr.msk.bf16.gmra.mrb[12].mxu1 %vm881_vm3, %v4958_v40  ;;  %3652 = vmatmul.mubr.msk.bf16.gmra.mrb[28].mxu0 %vm881_vm3, %v4960_v19 }
  0x96   : > { %3503 = vmatprep.mubr.msk.bf16.mxu1 %vm881_vm3, %v4854_v22  ;;  %3657 = vmatprep.mubr.msk.bf16.mxu0 %vm881_vm3, %v4822_v47 }
  0x9d   : > { %3504 = vmatmul.mubr.msk.bf16.gmra.mrb[16].mxu1 %vm881_vm3, %v4864_v57  ;;  %3658 = vmatmul.mubr.msk.bf16.vlgmr.msra.gmra.mrb[0].mxu0 %vm881_vm3, %v4848_v23 }
  0x9e   : > { %3690 = vmatpush3.bf16.msra.mxu0 %v2468_v7  ;;  %3507 = vmatprep.mubr.msk.bf16.mxu1 %vm881_vm3, %v4873_v5  ;;  %v5344_v7 = vld [vmem:[#allocation21_spill] sm:$0xff] }
  0x9f   : > { %3661 = vmatprep.mubr.msk.bf16.mxu0 %vm881_vm3, %v4893_v56  ;;  %4024 = vmatprep.subr.msk.bf16.mxu0 %vm930_vm0, %v2663_v60  ;;  %v798_v60 = vshrl.u32 %v5055_v24, 16 }
  0xa5   : > { %3508 = vmatmul.mubr.msk.bf16.gmra.mrb[20].mxu1 %vm881_vm3, %v4877_v49  ;;  %3662 = vmatmul.mubr.msk.bf16.gmra.mrb[4].mxu0 %vm881_vm3, %v4929_v53 }
  0xa6   : > { %3511 = vmatprep.mubr.msk.bf16.mxu1 %vm881_vm3, %v4881_v54  ;;  %3665 = vmatprep.mubr.msk.bf16.mxu0 %vm881_vm3, %v4935_v8 }
  0xad   : > { %3512 = vmatmul.mubr.msk.bf16.gmra.mrb[24].mxu1 %vm881_vm3, %v4885_v36  ;;  %3666 = vmatmul.mubr.msk.bf16.gmra.mrb[8].mxu0 %vm881_vm3, %v4958_v40 }
  0xae   : > { %3515 = vmatprep.mubr.msk.bf16.mxu1 %vm881_vm3, %v4889_v38  ;;  %3669 = vmatprep.mubr.msk.bf16.mxu0 %vm881_vm3, %v4854_v22 }
  0xb5   : > { %3516 = vmatmul.mubr.msk.bf16.gmra.mrb[28].mxu1 %vm881_vm3, %v4899_v29  ;;  %3670 = vmatmul.mubr.msk.bf16.gmra.mrb[12].mxu0 %vm881_vm3, %v4864_v57 }
  0xb6   : > { %3521 = vmatprep.mubr.msk.bf16.mxu1 %vm881_vm3, %v3160_v59  ;;  %3673 = vmatprep.mubr.msk.bf16.mxu0 %vm881_vm3, %v4873_v5 }
  0xbd   : > { %3522 = vmatmul.mubr.msk.bf16.vlgmr.msra.gmra.mrb[0].mxu1 %vm881_vm3, %v5329_v48  ;;  %3674 = vmatmul.mubr.msk.bf16.gmra.mrb[16].mxu0 %vm881_vm3, %v4877_v49 }
  0xbe   : > { %3554 = vmatpush3.bf16.msra.mxu1 %v1656_v35  ;;  %3525 = vmatprep.mubr.msk.bf16.mxu1 %vm881_vm3, %v5330_v52  ;;  %v817_v35 = vshll.u32 %v212_v55, 16 }
  0xbf   : > { %3677 = vmatprep.mubr.msk.bf16.mxu0 %vm881_vm3, %v4881_v54  ;;  %4020 = vmatprep.subr.msk.bf16.mxu1 %vm930_vm0, %v4102_v2 }
  0xc5   : > { %3526 = vmatmul.mubr.msk.bf16.gmra.mrb[4].mxu1 %vm881_vm3, %v5331_v3  ;;  %3678 = vmatmul.mubr.msk.bf16.gmra.mrb[20].mxu0 %vm881_vm3, %v4885_v36 }
  0xc6   : > { %3529 = vmatprep.mubr.msk.bf16.mxu1 %vm881_vm3, %v5332_v4  ;;  %3681 = vmatprep.mubr.msk.bf16.mxu0 %vm881_vm3, %v4889_v38 }
  0xcd   : > { %3530 = vmatmul.mubr.msk.bf16.gmra.mrb[8].mxu1 %vm881_vm3, %v5333_v21  ;;  %3682 = vmatmul.mubr.msk.bf16.gmra.mrb[24].mxu0 %vm881_vm3, %v4899_v29 }
  0xce   : > { %3533 = vmatprep.mubr.msk.bf16.mxu1 %vm881_vm3, %v5334_v13  ;;  %3685 = vmatprep.mubr.msk.bf16.mxu0 %vm881_vm3, %v5044_v11 }
  0xd5   : > { %3534 = vmatmul.mubr.msk.bf16.gmra.mrb[12].mxu1 %vm881_vm3, %v4759_v37  ;;  %3686 = vmatmul.mubr.msk.bf16.gmra.mrb[28].mxu0 %vm881_vm3, %v3243_v61  ;;  %v819_v61 = vrot.slane %v817_v35, 5 }
  0xd6   : > { %3537 = vmatprep.mubr.msk.bf16.mxu1 %vm881_vm3, %v4790_v41  ;;  %3691 = vmatprep.mubr.msk.bf16.mxu0 %vm881_vm3, %v5335_v17 }
  0xdd   : > { %3538 = vmatmul.mubr.msk.bf16.gmra.mrb[16].mxu1 %vm881_vm3, %v4794_v50  ;;  %3692 = vmatmul.mubr.msk.bf16.vlgmr.msra.gmra.mrb[0].mxu0 %vm881_vm3, %v5336_v51 }
  0xde   : > { %3724 = vmatpush3.bf16.msra.mxu0 %v2671_v10  ;;  %3541 = vmatprep.mubr.msk.bf16.mxu1 %vm881_vm3, %v4816_v20 }
  0xdf   : > { %3695 = vmatprep.mubr.msk.bf16.mxu0 %vm881_vm3, %v5337_v33 }
  0xe5   : > { %3542 = vmatmul.mubr.msk.bf16.gmra.mrb[20].mxu1 %vm881_vm3, %v4827_v0  ;;  %3696 = vmatmul.mubr.msk.bf16.gmra.mrb[4].mxu0 %vm881_vm3, %v5338_v39 }
  0xe6   : > { %3545 = vmatprep.mubr.msk.bf16.mxu1 %vm881_vm3, %v4868_v62  ;;  %3699 = vmatprep.mubr.msk.bf16.mxu0 %vm881_vm3, %v5339_v58 }
  0xed   : > { %3546 = vmatmul.mubr.msk.bf16.gmra.mrb[24].mxu1 %vm881_vm3, %v4895_v31  ;;  %3700 = vmatmul.mubr.msk.bf16.gmra.mrb[8].mxu0 %vm881_vm3, %v5340_v42 }
  0xee   : > { %3549 = vmatprep.mubr.msk.bf16.mxu1 %vm881_vm3, %v4931_v44  ;;  %3703 = vmatprep.mubr.msk.bf16.mxu0 %vm881_vm3, %v5341_v15 }
  0xf5   : > { %3550 = vmatmul.mubr.msk.bf16.gmra.mrb[28].mxu1 %vm881_vm3, %v4941_v1  ;;  %3704 = vmatmul.mubr.msk.bf16.gmra.mrb[12].mxu0 %vm881_vm3, %v5342_v27 }
  0xf6   : > { %3555 = vmatprep.mubr.msk.bf16.mxu1 %vm881_vm3, %v4337_v45  ;;  %3707 = vmatprep.mubr.msk.bf16.mxu0 %vm881_vm3, %v5343_v6  ;;  %v807_v45 = vshll.u32 %v5058_v9, 16 }
  0xf8   : > { %v809_v18 = vrot.slane %v807_v45, 5 }
  0xfa   : > { %v814_v59 = vor.u32 %v813_v43, %v809_v18 }
  0xfc   : > { %v815_v2 = vrot.slane %v814_v59, 4 }
  0xfd   : > { %3556 = vmatmul.mubr.msk.bf16.vlgmr.msra.gmra.mrb[0].mxu1 %vm881_vm3, %v4822_v47  ;;  %3708 = vmatmul.mubr.msk.bf16.gmra.mrb[16].mxu0 %vm881_vm3, %v5344_v7  ;;  %v800_v47 = vrot.slane %v798_v60, 4 }
  0xfe   : > { %3758 = vmatpush3.bf16.msra.mxu1 %v5345_v25  ;;  %3559 = vmatprep.mubr.msk.bf16.mxu1 %vm881_vm3, %v4848_v23 }
  0xff   : > { %3711 = vmatprep.mubr.msk.bf16.mxu0 %vm881_vm3, %v5346_v46  ;;  %v804_v23 = vor.u32 %v803_v32, %v800_v47 }
 0x101   : > { %v805_v48 = vrot.slane %v804_v23, 4 }
 0x105   : > { %3560 = vmatmul.mubr.msk.bf16.gmra.mrb[4].mxu1 %vm881_vm3, %v4893_v56  ;;  %3712 = vmatmul.mubr.msk.bf16.gmra.mrb[20].mxu0 %vm881_vm3, %v5347_v12  ;;  %v810_v56 = vsel %vm4327_vm4, %v805_v48, %v809_v18 }
 0x106   : > { %3563 = vmatprep.mubr.msk.bf16.mxu1 %vm881_vm3, %v4929_v53  ;;  %3715 = vmatprep.mubr.msk.bf16.mxu0 %vm881_vm3, %v4761_v30  ;;  %v820_v53 = vsel %vm4327_vm4, %v815_v2, %v819_v61 }
 0x107   : > { %v3260_v17 = vcombine.low %v810_v56, %v820_v53 }
 0x10d   : > { %3564 = vmatmul.mubr.msk.bf16.gmra.mrb[8].mxu1 %vm881_vm3, %v4935_v8  ;;  %3716 = vmatmul.mubr.msk.bf16.gmra.mrb[24].mxu0 %vm881_vm3, %v4788_v63 }
 0x10e   : > { %3567 = vmatprep.mubr.msk.bf16.mxu1 %vm881_vm3, %v4958_v40  ;;  %3719 = vmatprep.mubr.msk.bf16.mxu0 %vm881_vm3, %v4966_v16 }
 0x115   : > { %3568 = vmatmul.mubr.msk.bf16.gmra.mrb[12].mxu1 %vm881_vm3, %v4854_v22  ;;  %3720 = vmatmul.mubr.msk.bf16.gmra.mrb[28].mxu0 %vm881_vm3, %v3260_v17 }
 0x116   : > { %3571 = vmatprep.mubr.msk.bf16.mxu1 %vm881_vm3, %v4864_v57  ;;  %3725 = vmatprep.mubr.msk.bf16.mxu0 %vm881_vm3, %v5330_v52 }
 0x11d   : > { %3572 = vmatmul.mubr.msk.bf16.gmra.mrb[16].mxu1 %vm881_vm3, %v4873_v5  ;;  %3726 = vmatmul.mubr.msk.bf16.vlgmr.msra.gmra.mrb[0].mxu0 %vm881_vm3, %v5331_v3 }
 0x11e   : > { %3575 = vmatprep.mubr.msk.bf16.mxu1 %vm881_vm3, %v4877_v49  ;;  %3729 = vmatprep.mubr.msk.bf16.mxu0 %vm881_vm3, %v5332_v4 }
 0x125   : > { %3576 = vmatmul.mubr.msk.bf16.gmra.mrb[20].mxu1 %vm881_vm3, %v4881_v54  ;;  %3730 = vmatmul.mubr.msk.bf16.gmra.mrb[4].mxu0 %vm881_vm3, %v5333_v21 }
 0x126   : > { %3579 = vmatprep.mubr.msk.bf16.mxu1 %vm881_vm3, %v4885_v36  ;;  %3733 = vmatprep.mubr.msk.bf16.mxu0 %vm881_vm3, %v5334_v13 }
 0x12d   : > { %3580 = vmatmul.mubr.msk.bf16.gmra.mrb[24].mxu1 %vm881_vm3, %v4889_v38  ;;  %3734 = vmatmul.mubr.msk.bf16.gmra.mrb[8].mxu0 %vm881_vm3, %v4759_v37  ;;  %v3095_v37 = vrot.slane %v5055_v24, 9 }
 0x12e   : > { %3583 = vmatprep.mubr.msk.bf16.mxu1 %vm881_vm3, %v4899_v29  ;;  %3737 = vmatprep.mubr.msk.bf16.mxu0 %vm881_vm3, %v4790_v41  ;;  %v828_v41 = vrot.slane %v826_v34, 4 }
 0x135   : > { %3584 = vmatmul.mubr.msk.bf16.gmra.mrb[28].mxu1 %vm881_vm3, %v5044_v11  ;;  %3738 = vmatmul.mubr.msk.bf16.gmra.mrb[12].mxu0 %vm881_vm3, %v4794_v50  ;;  %v829_v50 = vrot.slane %v212_v55, 5 }
 0x136   : > { %3605 = vmatprep.mubr.msk.bf16.mxu1 %vm881_vm3, %v5342_v27  ;;  %3741 = vmatprep.mubr.msk.bf16.mxu0 %vm881_vm3, %v4816_v20  ;;  %v827_v20 = vsel %vm4508_vm7, %v3095_v37, %v826_v34 }
 0x13d   : > { %3606 = vmatmul.mubr.msk.bf16.vlgmr.msra.gmra.mrb[16].mxu1 %vm881_vm3, %v5343_v6  ;;  %3742 = vmatmul.mubr.msk.bf16.gmra.mrb[16].mxu0 %vm881_vm3, %v4827_v0  ;;  %v830_v0 = vsel %vm4508_vm7, %v828_v41, %v829_v50 }
 0x13e   : > { %3609 = vmatprep.mubr.msk.bf16.mxu1 %vm881_vm3, %v5344_v7  ;;  %3745 = vmatprep.mubr.msk.bf16.mxu0 %vm881_vm3, %v4868_v62  ;;  %v3277_v22 = vcombine.low %v827_v20, %v830_v0 }
 0x145   : > { %3610 = vmatmul.mubr.msk.bf16.gmra.mrb[20].mxu1 %vm881_vm3, %v5346_v46  ;;  %3746 = vmatmul.mubr.msk.bf16.gmra.mrb[20].mxu0 %vm881_vm3, %v4895_v31 }
 0x146   : > { %3613 = vmatprep.mubr.msk.bf16.mxu1 %vm881_vm3, %v5347_v12  ;;  %3749 = vmatprep.mubr.msk.bf16.mxu0 %vm881_vm3, %v4931_v44 }
 0x14d   : > { %3614 = vmatmul.mubr.msk.bf16.gmra.mrb[24].mxu1 %vm881_vm3, %v4761_v30  ;;  %3750 = vmatmul.mubr.msk.bf16.gmra.mrb[24].mxu0 %vm881_vm3, %v4941_v1 }
 0x14e   : > { %3617 = vmatprep.mubr.msk.bf16.mxu1 %vm881_vm3, %v4788_v63  ;;  %3753 = vmatprep.mubr.msk.bf16.mxu0 %vm881_vm3, %v4960_v19 }
 0x155   : > { %3618 = vmatmul.mubr.msk.bf16.gmra.mrb[28].mxu1 %vm881_vm3, %v4966_v16  ;;  %3754 = vmatmul.mubr.msk.bf16.gmra.mrb[28].mxu0 %vm881_vm3, %v3277_v22 }
 0x1d0   : > { %v3557_v30 = vpop.f32.mrb[0].mxu1 }
 0x1d1   : > { %v1692_v57 = vpop.f32.mrb[1].mxu1 }
 0x1d2   : > { %v3558_v62 = vpop.f32.mrb[2].mxu1 }
 0x1d3   : > { %v1695_v5 = vpop.f32.mrb[3].mxu1 }
 0x1d8   : > { %v3561_v63 = vpop.f32.mrb[4].mxu1 }
 0x1d9   : > { %v1708_v49 = vpop.f32.mrb[5].mxu1 }
 0x1da   : > { %v3562_v54 = vpop.f32.mrb[6].mxu1 }
 0x1db   : > { %v1711_v36 = vpop.f32.mrb[7].mxu1 }
 0x1e0   : > { %v3565_v38 = vpop.f32.mrb[8].mxu1 }
 0x1e1   : > { %v1724_v31 = vpop.f32.mrb[9].mxu1 }
 0x1e2   : > { %v3566_v29 = vpop.f32.mrb[10].mxu1 }
 0x1e3   : > { %v1727_v44 = vpop.f32.mrb[11].mxu1 }
 0x1e8   : > { %v3569_v26 = vpop.f32.mrb[12].mxu1 }
 0x1e9   : > { %v1740_v8 = vpop.f32.mrb[13].mxu1 }
 0x1ea   : > { %v5208_v1 = vpop.f32.mrb[14].mxu1 }
 0x1eb   : > { %v5210_v40 = vpop.f32.mrb[15].mxu1 }
 0x1f0   : > { %v3727_v19 = vpop.f32.mrb[0].mxu0 }
 0x1f1   : > { %v3759_v16 = vadd.f32 %v3727_v19, %v3557_v30  ;;  %v2707_v52 = vpop.f32.mrb[1].mxu0 }
 0x1f2   : > { %v3760_v3 = vadd.f32 %v2707_v52, %v1692_v57  ;;  %v3728_v4 = vpop.f32.mrb[2].mxu0 }
 0x1f3   : > { %v3761_v11 = vadd.f32 %v3728_v4, %v3558_v62  ;;  %v2710_v21 = vpop.f32.mrb[3].mxu0  ;;  %v2905_v51 = vmul.f32 %v3759_v16, %v3759_v16 }
 0x1f4   : > { %v3762_v13 = vadd.f32 %v2710_v21, %v1695_v5  ;;  %v2903_v24 = vmul.f32 %v3760_v3, %v3760_v3 }
 0x1f5   : > { %v2906_v27 = vmul.f32 %v3761_v11, %v3761_v11 }
 0x1f6   : > { %v2866_v9 = vadd.f32 %v3762_v13, %v3760_v3  ;;  %v2904_v10 = vmul.f32 %v3762_v13, %v3762_v13 }
 0x1f8   : > { %v2867_v33 = vadd.f32 %v3759_v16, %v2866_v9  ;;  %v2935_v39 = vadd.f32 %v2904_v10, %v2903_v24  ;;  %v3731_v58 = vpop.f32.mrb[4].mxu0 }
 0x1f9   : > { %v3763_v42 = vadd.f32 %v3731_v58, %v3561_v63  ;;  %v2723_v15 = vpop.f32.mrb[5].mxu0 }
 0x1fa   : > { %v2936_v6 = vadd.f32 %v2935_v39, %v2905_v51  ;;  %v3764_v7 = vadd.f32 %v2723_v15, %v1708_v49  ;;  %v2868_v60 = vadd.f32 %v3761_v11, %v2867_v33  ;;  %v3732_v14 = vpop.f32.mrb[6].mxu0 }
 0x1fb   : > { %v3765_v28 = vadd.f32 %v3732_v14, %v3562_v54  ;;  %v2726_v25 = vpop.f32.mrb[7].mxu0  ;;  %v2909_v12 = vmul.f32 %v3763_v42, %v3763_v42 }
 0x1fc   : > { %v2869_v45 = vadd.f32 %v3764_v7, %v2868_v60  ;;  %v2907_v46 = vmul.f32 %v3764_v7, %v3764_v7  ;;  %v2937_v47 = vadd.f32 %v2936_v6, %v2906_v27  ;;  %v3766_v32 = vadd.f32 %v2726_v25, %v1711_v36 }
 0x1fd   : > { %v2910_v61 = vmul.f32 %v3765_v28, %v3765_v28 }
 0x1fe   : > { %v2938_v18 = vadd.f32 %v2937_v47, %v2907_v46  ;;  %v2870_v43 = vadd.f32 %v3766_v32, %v2869_v45  ;;  %v2908_v55 = vmul.f32 %v3766_v32, %v3766_v32 }
 0x200   : > { %v2871_v23 = vadd.f32 %v3763_v42, %v2870_v43  ;;  %v2939_v59 = vadd.f32 %v2938_v18, %v2908_v55  ;;  %v3735_v35 = vpop.f32.mrb[8].mxu0 }
 0x201   : > { %v3767_v48 = vadd.f32 %v3735_v35, %v3565_v38  ;;  %v2739_v2 = vpop.f32.mrb[9].mxu0 }
 0x202   : > { %v2940_v56 = vadd.f32 %v2939_v59, %v2909_v12  ;;  %v3768_v53 = vadd.f32 %v2739_v2, %v1724_v31  ;;  %v2872_v17 = vadd.f32 %v3765_v28, %v2871_v23  ;;  %v3736_v34 = vpop.f32.mrb[10].mxu0 }
 0x203   : > { %v3769_v37 = vadd.f32 %v3736_v34, %v3566_v29  ;;  %v2742_v41 = vpop.f32.mrb[11].mxu0  ;;  %v2913_v5 = vmul.f32 %v3767_v48, %v3767_v48 }
 0x204   : > { %v2873_v50 = vadd.f32 %v3768_v53, %v2872_v17  ;;  %v2911_v20 = vmul.f32 %v3768_v53, %v3768_v53  ;;  %v2941_v0 = vadd.f32 %v2940_v56, %v2910_v61  ;;  %v3770_v22 = vadd.f32 %v2742_v41, %v1727_v44 }
 0x205   : > { %v2914_v19 = vmul.f32 %v3769_v37, %v3769_v37 }
 0x206   : > { %v2942_v30 = vadd.f32 %v2941_v0, %v2911_v20  ;;  %v2874_v57 = vadd.f32 %v3770_v22, %v2873_v50  ;;  %v2912_v62 = vmul.f32 %v3770_v22, %v3770_v22 }
 0x208   : > { %v2875_v63 = vadd.f32 %v3767_v48, %v2874_v57  ;;  %v2943_v49 = vadd.f32 %v2942_v30, %v2912_v62  ;;  %v3739_v54 = vpop.f32.mrb[12].mxu0 }
 0x209   : > { %v3771_v36 = vadd.f32 %v3739_v54, %v3569_v26  ;;  %v2755_v38 = vpop.f32.mrb[13].mxu0 }
 0x20a   : > { %v2944_v16 = vadd.f32 %v2943_v49, %v2913_v5  ;;  %v3772_v31 = vadd.f32 %v2755_v38, %v1740_v8  ;;  %v2876_v52 = vadd.f32 %v3769_v37, %v2875_v63  ;;  %v3740_v3 = vpop.f32.mrb[14].mxu0 }
 0x20b   : > { %v3773_v29 = vadd.f32 %v3740_v3, %v5208_v1  ;;  %v2758_v4 = vpop.f32.mrb[15].mxu0  ;;  %v2917_v51 = vmul.f32 %v3771_v36, %v3771_v36 }
 0x20c   : > { %v2877_v11 = vadd.f32 %v3772_v31, %v2876_v52  ;;  %v2915_v21 = vmul.f32 %v3772_v31, %v3772_v31  ;;  %v2945_v44 = vadd.f32 %v2944_v16, %v2914_v19  ;;  %v3774_v13 = vadd.f32 %v2758_v4, %v5210_v40 }
 0x20d   : > { %v2918_v27 = vmul.f32 %v3773_v29, %v3773_v29 }
 0x20e   : > { %v2946_v24 = vadd.f32 %v2945_v44, %v2915_v21  ;;  %v2878_v9 = vadd.f32 %v3774_v13, %v2877_v11  ;;  %v2916_v10 = vmul.f32 %v3774_v13, %v3774_v13 }
 0x210   : > { %v2879_v33 = vadd.f32 %v3771_v36, %v2878_v9  ;;  %v2947_v26 = vadd.f32 %v2946_v24, %v2916_v10  ;;  %v3607_v39 = vpop.f32.mrb[16].mxu1  ;;  %v3743_v58 = vpop.f32.mrb[16].mxu0 }
 0x211   : > { %v3775_v42 = vadd.f32 %v3743_v58, %v3607_v39  ;;  %v1959_v8 = vpop.f32.mrb[17].mxu1  ;;  %v2771_v15 = vpop.f32.mrb[17].mxu0 }
 0x212   : > { %v2948_v6 = vadd.f32 %v2947_v26, %v2917_v51  ;;  %v3776_v1 = vadd.f32 %v2771_v15, %v1959_v8  ;;  %v2880_v7 = vadd.f32 %v3773_v29, %v2879_v33  ;;  %v3608_v60 = vpop.f32.mrb[18].mxu1  ;;  %v3744_v14 = vpop.f32.mrb[18].mxu0 }
 0x213   : > { %v3777_v28 = vadd.f32 %v3744_v14, %v3608_v60  ;;  %v1962_v25 = vpop.f32.mrb[19].mxu1  ;;  %v2774_v40 = vpop.f32.mrb[19].mxu0  ;;  %v2921_v12 = vmul.f32 %v3775_v42, %v3775_v42 }
 0x214   : > { %v2881_v45 = vadd.f32 %v3776_v1, %v2880_v7  ;;  %v2919_v46 = vmul.f32 %v3776_v1, %v3776_v1  ;;  %v2949_v47 = vadd.f32 %v2948_v6, %v2918_v27  ;;  %v3778_v32 = vadd.f32 %v2774_v40, %v1962_v25 }
 0x215   : > { %v2922_v53 = vmul.f32 %v3777_v28, %v3777_v28 }
 0x216   : > { %v2950_v18 = vadd.f32 %v2949_v47, %v2919_v46  ;;  %v2882_v43 = vadd.f32 %v3778_v32, %v2881_v45  ;;  %v2920_v55 = vmul.f32 %v3778_v32, %v3778_v32 }
 0x218   : > { %v2883_v23 = vadd.f32 %v3775_v42, %v2882_v43  ;;  %v2951_v59 = vadd.f32 %v2950_v18, %v2920_v55  ;;  %v3611_v35 = vpop.f32.mrb[20].mxu1  ;;  %v3747_v48 = vpop.f32.mrb[20].mxu0 }
 0x219   : > { %v3779_v2 = vadd.f32 %v3747_v48, %v3611_v35  ;;  %v1975_v61 = vpop.f32.mrb[21].mxu1  ;;  %v2787_v56 = vpop.f32.mrb[21].mxu0 }
 0x21a   : > { %v2952_v17 = vadd.f32 %v2951_v59, %v2921_v12  ;;  %v3780_v34 = vadd.f32 %v2787_v56, %v1975_v61  ;;  %v2884_v37 = vadd.f32 %v3777_v28, %v2883_v23  ;;  %v3612_v41 = vpop.f32.mrb[22].mxu1  ;;  %v3748_v50 = vpop.f32.mrb[22].mxu0 }
 0x21b   : > { %v3781_v20 = vadd.f32 %v3748_v50, %v3612_v41  ;;  %v1978_v0 = vpop.f32.mrb[23].mxu1  ;;  %v2790_v22 = vpop.f32.mrb[23].mxu0  ;;  %v2925_v36 = vmul.f32 %v3779_v2, %v3779_v2 }
 0x21c   : > { %v2885_v30 = vadd.f32 %v3780_v34, %v2884_v37  ;;  %v2923_v57 = vmul.f32 %v3780_v34, %v3780_v34  ;;  %v2953_v62 = vadd.f32 %v2952_v17, %v2922_v53  ;;  %v3782_v5 = vadd.f32 %v2790_v22, %v1978_v0 }
 0x21d   : > { %v2926_v4 = vmul.f32 %v3781_v20, %v3781_v20 }
 0x21e   : > { %v2954_v63 = vadd.f32 %v2953_v62, %v2923_v57  ;;  %v2886_v49 = vadd.f32 %v3782_v5, %v2885_v30  ;;  %v2924_v54 = vmul.f32 %v3782_v5, %v3782_v5 }
 0x220   : > { %v2887_v38 = vadd.f32 %v3779_v2, %v2886_v49  ;;  %v2955_v19 = vadd.f32 %v2954_v63, %v2924_v54  ;;  %v3615_v16 = vpop.f32.mrb[24].mxu1  ;;  %v3751_v31 = vpop.f32.mrb[24].mxu0 }
 0x221   : > { %v3783_v52 = vadd.f32 %v3751_v31, %v3615_v16  ;;  %v1991_v3 = vpop.f32.mrb[25].mxu1  ;;  %v2803_v29 = vpop.f32.mrb[25].mxu0 }
 0x222   : > { %v2956_v11 = vadd.f32 %v2955_v19, %v2925_v36  ;;  %v3784_v21 = vadd.f32 %v2803_v29, %v1991_v3  ;;  %v2888_v44 = vadd.f32 %v3781_v20, %v2887_v38  ;;  %v3616_v13 = vpop.f32.mrb[26].mxu1  ;;  %v3752_v24 = vpop.f32.mrb[26].mxu0 }
 0x223   : > { %v3785_v9 = vadd.f32 %v3752_v24, %v3616_v13  ;;  %v1994_v10 = vpop.f32.mrb[27].mxu1  ;;  %v2806_v51 = vpop.f32.mrb[27].mxu0  ;;  %v2929_v27 = vmul.f32 %v3783_v52, %v3783_v52 }
 0x224   : > { %v2889_v33 = vadd.f32 %v3784_v21, %v2888_v44  ;;  %v2927_v26 = vmul.f32 %v3784_v21, %v3784_v21  ;;  %v2957_v39 = vadd.f32 %v2956_v11, %v2926_v4  ;;  %v3786_v58 = vadd.f32 %v2806_v51, %v1994_v10 }
 0x225   : > { %v2930_v40 = vmul.f32 %v3785_v9, %v3785_v9 }
 0x226   : > { %v2958_v42 = vadd.f32 %v2957_v39, %v2927_v26  ;;  %v2890_v8 = vadd.f32 %v3786_v58, %v2889_v33  ;;  %v2928_v15 = vmul.f32 %v3786_v58, %v3786_v58 }
 0x228   : > { %v2891_v6 = vadd.f32 %v3783_v52, %v2890_v8  ;;  %v2959_v1 = vadd.f32 %v2958_v42, %v2928_v15  ;;  %v3619_v7 = vpop.f32.mrb[28].mxu1  ;;  %v3755_v60 = vpop.f32.mrb[28].mxu0 }
 0x229   : > { %v3787_v14 = vadd.f32 %v3755_v60, %v3619_v7  ;;  %v2007_v28 = vpop.f32.mrb[29].mxu1  ;;  %v2819_v25 = vpop.f32.mrb[29].mxu0 }
 0x22a   : > { %v2960_v45 = vadd.f32 %v2959_v1, %v2929_v27  ;;  %v3788_v46 = vadd.f32 %v2819_v25, %v2007_v28  ;;  %v2892_v47 = vadd.f32 %v3785_v9, %v2891_v6  ;;  %v3620_v32 = vpop.f32.mrb[30].mxu1  ;;  %v3756_v18 = vpop.f32.mrb[30].mxu0 }
 0x22b   : > { %v3789_v43 = vadd.f32 %v3756_v18, %v3620_v32  ;;  %v2010_v55 = vpop.f32.mrb[31].mxu1  ;;  %v2822_v12 = vpop.f32.mrb[31].mxu0  ;;  %v2933_v53 = vmul.f32 %v3787_v14, %v3787_v14 }
 0x22c   : > { %v2893_v23 = vadd.f32 %v3788_v46, %v2892_v47  ;;  %v2931_v59 = vmul.f32 %v3788_v46, %v3788_v46  ;;  %v2961_v35 = vadd.f32 %v2960_v45, %v2930_v40  ;;  %v3790_v48 = vadd.f32 %v2822_v12, %v2010_v55 }
 0x22d   : > { %v2934_v37 = vmul.f32 %v3789_v43, %v3789_v43 }
 0x22e   : > { %v2962_v2 = vadd.f32 %v2961_v35, %v2931_v59  ;;  %v2894_v61 = vadd.f32 %v3790_v48, %v2893_v23  ;;  %v2932_v56 = vmul.f32 %v3790_v48, %v3790_v48 }
 0x230   : > { %v2895_v17 = vadd.f32 %v3787_v14, %v2894_v61  ;;  %v2963_v34 = vadd.f32 %v2962_v2, %v2932_v56 }
 0x232   : > { %v2896_v41 = vadd.f32 %v3789_v43, %v2895_v17  ;;  %v2964_v50 = vadd.f32 %v2963_v34, %v2933_v53 }
 0x234   : > { %v2897_v20 = vrot.slane %v2896_v41, 4  ;;  %v2965_v0 = vadd.f32 %v2964_v50, %v2934_v37 }
 0x236   : > { %v2898_v22 = vadd.f32 %v2897_v20, %v2896_v41  ;;  %v2966_v30 = vrot.slane %v2965_v0, 4 }
 0x238   : > { %v2899_v57 = vrot.slane %v2898_v22, 2  ;;  %v2967_v62 = vadd.f32 %v2966_v30, %v2965_v0 }
 0x23a   : > { %v2900_v5 = vadd.f32 %v2899_v57, %v2898_v22  ;;  %v2968_v63 = vrot.slane %v2967_v62, 2 }
 0x23c   : > { %v2901_v49 = vrot.slane %v2900_v5, 1  ;;  %v2969_v54 = vadd.f32 %v2968_v63, %v2967_v62 }
 0x23e   : > { %v2902_v36 = vadd.f32 %v2901_v49, %v2900_v5  ;;  %v2970_v38 = vrot.slane %v2969_v54, 1 }
 0x240   : > { %v2971_v19 = vadd.f32 %v2970_v38, %v2969_v54  ;;  %2976 = vst [vmem:[%s148_s5] sm:$0x1] %v2902_v36 }
 0x242   : > { %2977 = vst [vmem:[%s148_s5 + $0x1] sm:$0x1] %v2971_v19 }
 0x243   : > { %4116 = shalt.err (!%p4113_p5)
}
 0x244   : > { %s4117_s24 = scalar_lea.hbm %s5219_s15, 128  ;;  %s4121_s27 = scalar_lea.hbm %s5268_s2, 256 }
 0x245   : > { %p4118_p6 = scmp.ne.s32.totalorder %s5219_s15, %s4117_s24  ;;  %p4122_p10 = scmp.lt.u32.totalorder %s5219_s15, %s5268_s2 }
 0x246   : > { %p4123_p11 = scmp.lt.u32.totalorder %s4121_s27, %s4117_s24  ;;  %p4125_p13 = scmp.lt.u32.totalorder %s4117_s24, %s5219_s15 }
 0x247   : > { %p4119_p7 = pnand %p4118_p6, %p4239_p4 }
 0x248   : > { %p4124_p12 = por %p4123_p11, %p4122_p10 }
 0x249   : > { %p4120_p9 = pneg %p4119_p7 }
 0x24a   : > { %p4126_p0 = por %p4125_p13, %p4124_p12 }
 0x24c   : > { %p4127_p1 = pnand %p4126_p0, %p4120_p9 }
 0x24e   : > { %4130 = shalt.err (!%p4127_p1)
}
 0x24f   : > { %4026 = dma.vmem_to_hbm [thread:$0]  (%p4239_p4), %s5221_s6, 128, %s5219_s15, %s2989_s16  }
 0x250 PF: > { %p4032_p2 = scmp.ge.s32.totalorder %s4181_s14, 2  ;;  %s3014_s30 = sand.u32 1, %s4161_s9  }
 0x251   : > { %s3015_s3 = scalar_lea.sflag [#allocation3], %s3014_s30 }
 0x252   : > { %p4029_p3 = pnand %p4032_p2, %p4246_p8 }
 0x254   : > { %4156 = dma.done.wait (!%p4029_p3), %s3015_s3, 128  }
 0x255   : > { %4158 = vsyncadd (!%p4029_p3), %s3015_s3, 4294967168  ;;  %s15_s14 = sadd.s32 1, %s4181_s14   ;;  %s5348_s9 = smov %s4165_s10 }
 0x256   : > { %p12_p5 = scmp.ge.s32.totalorder %s15_s14, 4   ;;  %s5349_s10 = smov %s4169_s11 }
 0x257   : > { %s5350_s11 = smov %s4252_s22  ;;  %s5351_s12 = smov %s4177_s13 }
 0x258   : > { %s5352_s13 = smov %s5354_s17  ;;  %14 = sbr.rel (!%p12_p5) target bundleno = 4 (0x4), region = 72 }
 0x25f   :  { %3020 = vsyncpa [#allocation3], 1 }
 0x260   :  { %3022 = vsyncpa [#allocation3 + $0x1], 1 }

</bundles_post_ra>
